<compile_context>
chip_gen: v7x
topology: tpu7x:2x2x1
jax: 0.10.0
libtpu: 0.0.40
codegen_flags: <defaults>
</compile_context>

<pallas_src>
import jax
import jax.numpy as jnp
from jax.experimental import pallas as pl
from jax.experimental.pallas import tpu as pltpu


def att2in2_kernel(xh_ref, c_ref, att_ref, patt_ref,
                   w_ref, b_ref,
                   a2c_w_ref, a2c_b_ref,
                   alpha_w_ref, alpha_b_ref,
                   nh_ref, nc_ref):
    f32 = jnp.float32
    bf16 = jnp.bfloat16
    D = c_ref.shape[1]

    # One fused MXU pass: [xt | h] @ [[i2h, 0], [h2h, h2att]]  (bf16 x bf16 -> f32 acc)
    z = (jnp.dot(xh_ref[...], w_ref[...], preferred_element_type=f32)
         + b_ref[...])                                     # (TB, 5D + H) f32
    all_sums = z[:, :5 * D]                                # gate pre-activations
    att_h = z[:, 5 * D:]                                   # (TB, H) f32

    # ---------------- Attention ----------------
    # dot = tanh(p_att_feats + att_h)  (bf16 -- largest live intermediate)
    hA = jnp.tanh(patt_ref[...] + att_h.astype(bf16)[:, None, :])      # (TB, A, H)
    # alpha_net scores: lane-broadcast multiply + keepdims lane reduce (VPU/XLU;
    # avoids an N=1 MXU matmul and keeps A in the sublane dim throughout).
    scores = (jnp.sum(hA.astype(f32) * alpha_w_ref[...], axis=-1, keepdims=True)
              + alpha_b_ref[0])                            # (TB, A, 1) f32
    # softmax over the A attention slots (sublane dim)
    m = jnp.max(scores, axis=1, keepdims=True)
    e = jnp.exp(scores - m)
    inv = pl.reciprocal(jnp.sum(e, axis=1, keepdims=True), approx=True)
    w = e * inv                                            # (TB, A, 1) weights
    # attention-weighted sum: VPU broadcast-multiply + XLU sublane reduce over A
    # (overlaps with the MXU gate matmuls instead of TB M=1 matvecs).
    att_res = jnp.sum((w.astype(bf16) * att_ref[...]).astype(f32), axis=1)  # (TB, D)

    # ---------------- LSTM-style gated core ----------------
    sig = jax.nn.sigmoid(all_sums[:, :3 * D])
    in_gate = sig[:, :D]
    forget_gate = sig[:, D:2 * D]
    out_gate = sig[:, 2 * D:3 * D]

    a2c_out = (jnp.dot(att_res.astype(bf16), a2c_w_ref[...],
                       preferred_element_type=f32) + a2c_b_ref[...])   # (TB, 2D)
    in_tr = all_sums[:, 3 * D:] + a2c_out
    in_tr = jnp.maximum(in_tr[:, :D], in_tr[:, D:])

    next_c = forget_gate * c_ref[...] + in_gate * in_tr
    next_h = out_gate * jnp.tanh(next_c)

    nh_ref[...] = next_h.astype(nh_ref.dtype)
    nc_ref[...] = next_c.astype(nc_ref.dtype)


def _pick_vmem_limit():
    """Scoped-VMEM limit ~75% of physical VMEM (96 MiB on v5e/v6e, 48 MiB on v7x)."""
    try:
        cap = pltpu.get_tpu_info().vmem_capacity_bytes
    except Exception:                                # interpret mode / older jax
        cap = 64 * 1024 * 1024
    return max(32 * 1024 * 1024, (cap * 3) // 4)


def _pick_tb(B, A, D, H, E, vmem_limit_bytes):
    """Largest batch tile that divides B, is a multiple of 16 (bf16 sublane pack),
    fits the VMEM budget, and (when possible) leaves >= 2 tiles so the 'parallel'
    batch axis shards across both TensorCores on v7x."""
    # single-buffered bf16 weights + f32 biases
    w_bytes = 2 * ((E + D) * (5 * D + H) + D * 2 * D) + 4 * (5 * D + 2 * H + 2 * D)
    # per-batch-row VMEM: double-buffered bf16 feature/state tiles + f32 intermediates
    per_row = (4 * (A * (D + H) + (E + D) + D)          # pipelined bf16 inputs/outputs
               + 16 * D                                  # f32 c / next_c tiles
               + 4 * (A * (D + H) + 5 * D + H + 8 * D))  # transient f32 intermediates
    budget = vmem_limit_bytes - w_bytes - (4 << 20)      # 4 MiB headroom
    cap = max(8, budget // per_row)
    hi = int(min(B, cap))
    for step in (16, 8):
        cands = [t for t in range(step, hi + 1, step) if B % t == 0]
        if cands:
            two_tile = [t for t in cands if B // t >= 2]
            return max(two_tile) if two_tile else max(cands)
    return B   # tiny / indivisible batch: single tile (block == full array is legal)


def att2in2_core(xt, fc_feats, att_feats, p_att_feats, state, params,
                 att_masks=None, tb=None):
    """Returns (output, (next_h[1,B,D], next_c[1,B,D])) like Att2in2Core.forward."""
    assert att_masks is None  # TODO(synk): att_masks branch not implemented
    del fc_feats              # unused by Att2in2Core.forward
    (i2h_w, i2h_b, h2h_w, h2h_b, a2c_w, a2c_b,
     h2att_w, h2att_b, alpha_w, alpha_b) = params

    h_prev = state[0][-1]
    c_prev = state[1][-1]
    B, E = xt.shape
    A = att_feats.shape[1]
    D = h_prev.shape[1]
    H = h2att_w.shape[1]

    f32, bf16 = jnp.float32, jnp.bfloat16

    # Host-side fusion: one (E+D, 5D+H) bf16 weight, one (B, E+D) bf16 activation.
    #   [xt | h] @ [[i2h_w, 0      ],   -> [:, :5D] gate pre-activations
    #               [h2h_w, h2att_w]]   -> [:, 5D:] att_h
    w_fused = jnp.concatenate(
        [jnp.concatenate([i2h_w, jnp.zeros((E, H), i2h_w.dtype)], axis=1),
         jnp.concatenate([h2h_w, h2att_w], axis=1)], axis=0).astype(bf16)
    b_fused = jnp.concatenate([i2h_b + h2h_b, h2att_b]).reshape(1, 5 * D + H).astype(f32)
    xh = jnp.concatenate([xt, h_prev], axis=-1).astype(bf16)            # (B, E+D)

    att_b = att_feats.astype(bf16)
    patt_b = p_att_feats.astype(bf16)
    a2c_wb = a2c_w.astype(bf16)
    a2c_bias = a2c_b.reshape(1, 2 * D).astype(f32)
    alpha_wr = alpha_w.reshape(1, H).astype(f32)     # (H,1) -> (1,H) lane-broadcast form
    alpha_bias = alpha_b.reshape((1,)).astype(f32)
    c_f = c_prev.astype(f32)

    vmem_limit = _pick_vmem_limit()
    if tb is None:
        tb = _pick_tb(B, A, D, H, E, vmem_limit)
    if B % tb != 0:
        tb = B
    nb = B // tb

    row = lambda i: (i, 0)
    row3 = lambda i: (i, 0, 0)
    const2 = lambda i: (0, 0)

    out_shape = (jax.ShapeDtypeStruct((B, D), bf16),   # next_h (bf16: re-cast next step anyway)
                 jax.ShapeDtypeStruct((B, D), f32))    # next_c carries accuracy -> f32
    out_specs = [pl.BlockSpec((tb, D), row), pl.BlockSpec((tb, D), row)]

    def _run(buffered_weights):
        if buffered_weights:
            # Constant-index weights: single-buffered -- their block never changes, so
            # double-buffering only burns VMEM that could go into a larger tb.
            wspec = lambda shape: pl.BlockSpec(shape, const2,
                                               pipeline_mode=pl.Buffered(1))
        else:
            wspec = lambda shape: pl.BlockSpec(shape, const2)
        in_specs = [
            pl.BlockSpec((tb, E + D), row),              # [xt | h]
            pl.BlockSpec((tb, D), row),                  # c_prev
            pl.BlockSpec((tb, A, D), row3),              # att_feats
            pl.BlockSpec((tb, A, H), row3),              # p_att_feats
            wspec((E + D, 5 * D + H)),                   # fused i2h/h2h/h2att weight
            wspec((1, 5 * D + H)),                       # fused bias
            wspec((D, 2 * D)),                           # a2c_w
            wspec((1, 2 * D)),                           # a2c_b
            wspec((1, H)),                               # alpha_w (lane-broadcast row)
            pl.BlockSpec(memory_space=pltpu.MemorySpace.SMEM),  # alpha_b scalar
        ]
        return pl.pallas_call(
            att2in2_kernel,
            out_shape=out_shape,
            grid_spec=pltpu.PrefetchScalarGridSpec(
                num_scalar_prefetch=0, grid=(nb,),
                in_specs=in_specs, out_specs=out_specs),
            compiler_params=pltpu.CompilerParams(
                dimension_semantics=("parallel",),        # shard batch tiles across TCs
                vmem_limit_bytes=int(vmem_limit)),
        )(xh, c_f, att_b, patt_b, w_fused, b_fused, a2c_wb, a2c_bias,
          alpha_wr, alpha_bias)

    try:
        next_h, next_c = _run(True)
    except Exception:
        # pl.Buffered(1) not supported by this jax build -> default double-buffered weights.
        next_h, next_c = _run(False)

    output = next_h  # dropout is identity in eval mode
    return output, (next_h[None], next_c[None])


def reference(xt, fc_feats, att_feats, p_att_feats, state, params):
    """Pure-JAX f32 reference of Att2in2Core.forward (eval mode, att_masks=None)."""
    del fc_feats
    (i2h_w, i2h_b, h2h_w, h2h_b, a2c_w, a2c_b,
     h2att_w, h2att_b, alpha_w, alpha_b) = params
    h = state[0][-1]
    c = state[1][-1]
    D = h.shape[1]
    att_h = h @ h2att_w + h2att_b
    dot = jnp.tanh(p_att_feats + att_h[:, None, :])
    scores = (dot @ alpha_w)[..., 0] + alpha_b[0]
    w = jax.nn.softmax(scores, axis=1)
    att_res = jnp.einsum('ba,bad->bd', w, att_feats)
    all_sums = xt @ i2h_w + i2h_b + h @ h2h_w + h2h_b
    sig = jax.nn.sigmoid(all_sums[:, :3 * D])
    in_g, f_g, o_g = sig[:, :D], sig[:, D:2 * D], sig[:, 2 * D:]
    in_tr = all_sums[:, 3 * D:] + (att_res @ a2c_w + a2c_b)
    in_tr = jnp.maximum(in_tr[:, :D], in_tr[:, D:])
    next_c = f_g * c + in_g * in_tr
    next_h = o_g * jnp.tanh(next_c)
    return next_h, (next_h[None], next_c[None])


if __name__ == "__main__":
    # Small but lane-dense shapes: B=32 (two batch tiles of 16 -> exercises the grid
    # and megacore sharding), A=16, D=H=E=128.
    B, A = 32, 16
    E = D = H = 128

    key = jax.random.PRNGKey(0)
    ks = jax.random.split(key, 20)
    n = lambda k, shape, s=1.0: (s * jax.random.normal(k, shape)).astype(jnp.float32)

    xt = n(ks[0], (B, E))
    fc_feats = n(ks[1], (B, D))          # unused by the forward pass
    att_feats = n(ks[2], (B, A, D))
    p_att_feats = n(ks[3], (B, A, H))
    state = (n(ks[4], (1, B, D), 0.5), n(ks[5], (1, B, D), 0.5))

    s = 0.05
    params = (
        n(ks[6], (E, 5 * D), s), n(ks[7], (5 * D,), s),    # i2h   (W^T, b)
        n(ks[8], (D, 5 * D), s), n(ks[9], (5 * D,), s),    # h2h
        n(ks[10], (D, 2 * D), s), n(ks[11], (2 * D,), s),  # a2c
        n(ks[12], (D, H), s), n(ks[13], (H,), s),          # h2att
        n(ks[14], (H, 1), s), n(ks[15], (1,), s),          # alpha_net
    )

    out, (nh, nc) = att2in2_core(xt, fc_feats, att_feats, p_att_feats, state, params)
    out = jax.block_until_ready(out)
    nc = jax.block_until_ready(nc)

    ref_out, (ref_nh, ref_nc) = reference(xt, fc_feats, att_feats, p_att_feats,
                                          state, params)
    assert out.shape == (B, D) and nh.shape == (1, B, D) and nc.shape == (1, B, D)
    # bf16 matmul operands / bf16 next_h output (f32 accumulation) -> loosened tolerance.
    assert jnp.allclose(out.astype(jnp.float32), ref_out, atol=2e-2, rtol=2e-2), \
        "next_h mismatch vs reference"
    assert jnp.allclose(nc[0], ref_nc[0], atol=2e-2, rtol=2e-2), \
        "next_c mismatch vs reference"
    print("KERNEL_OK")
</pallas_src>

<mosaic_0001>
module attributes {stable_mosaic.version = 11 : i64} {
  func.func @att2in2_kernel(%arg0: i32, %arg1: memref<16x256xbf16, #tpu.memory_space<vmem>>, %arg2: memref<16x128xf32, #tpu.memory_space<vmem>>, %arg3: memref<16x16x128xbf16, #tpu.memory_space<vmem>>, %arg4: memref<16x16x128xbf16, #tpu.memory_space<vmem>>, %arg5: memref<256x768xbf16, #tpu.memory_space<vmem>>, %arg6: memref<1x768xf32, #tpu.memory_space<vmem>>, %arg7: memref<128x256xbf16, #tpu.memory_space<vmem>>, %arg8: memref<1x256xf32, #tpu.memory_space<vmem>>, %arg9: memref<1x128xf32, #tpu.memory_space<vmem>>, %arg10: memref<1xf32, #tpu.memory_space<smem>>, %arg11: memref<16x128xbf16, #tpu.memory_space<vmem>>, %arg12: memref<16x128xf32, #tpu.memory_space<vmem>>) attributes {dimension_semantics = [#tpu.dimension_semantics<parallel>], iteration_bounds = array<i64: 2>, scalar_prefetch = 0 : i64, scratch_operands = 0 : i64, tpu.core_type = #tpu.core_type<tc>, window_params = [{transform_indices = @transform_0, window_bounds = array<i64: 16, 256>}, {transform_indices = @transform_1, window_bounds = array<i64: 16, 128>}, {transform_indices = @transform_2, window_bounds = array<i64: 16, 16, 128>}, {transform_indices = @transform_3, window_bounds = array<i64: 16, 16, 128>}, {pipeline_mode = #tpu.pipeline_mode<synchronous>, transform_indices = @transform_4, window_bounds = array<i64: 256, 768>}, {pipeline_mode = #tpu.pipeline_mode<synchronous>, transform_indices = @transform_5, window_bounds = array<i64: 1, 768>}, {pipeline_mode = #tpu.pipeline_mode<synchronous>, transform_indices = @transform_6, window_bounds = array<i64: 128, 256>}, {pipeline_mode = #tpu.pipeline_mode<synchronous>, transform_indices = @transform_7, window_bounds = array<i64: 1, 256>}, {pipeline_mode = #tpu.pipeline_mode<synchronous>, transform_indices = @transform_8, window_bounds = array<i64: 1, 128>}, {transform_indices = @transform_9, window_bounds = array<i64: 1>}, {transform_indices = @transform_10, window_bounds = array<i64: 16, 128>}, {transform_indices = @transform_11, window_bounds = array<i64: 16, 128>}]} {
    %c0 = arith.constant 0 : index
    %c0_0 = arith.constant 0 : index
    %0 = vector.load %arg1[%c0, %c0_0] : memref<16x256xbf16, #tpu.memory_space<vmem>>, vector<16x256xbf16>
    %c0_1 = arith.constant 0 : index
    %c0_2 = arith.constant 0 : index
    %1 = vector.load %arg5[%c0_1, %c0_2] : memref<256x768xbf16, #tpu.memory_space<vmem>>, vector<256x768xbf16>
    %cst = arith.constant dense<0.000000e+00> : vector<16x768xf32>
    %2 = tpu.matmul %0, %1, %cst {dimension_numbers = #tpu.dot_dimension_numbers<[1], [0], [0], [1], [0, 0, 1, 1], [], []>} : vector<16x256xbf16>, vector<256x768xbf16>, vector<16x768xf32> -> vector<16x768xf32>
    %c0_3 = arith.constant 0 : index
    %c0_4 = arith.constant 0 : index
    %3 = vector.load %arg6[%c0_3, %c0_4] : memref<1x768xf32, #tpu.memory_space<vmem>>, vector<1x768xf32>
    %4 = vector.broadcast %3 : vector<1x768xf32> to vector<16x768xf32>
    %5 = arith.addf %2, %4 : vector<16x768xf32>
    %6 = vector.extract_strided_slice %5 {offsets = [0, 0], sizes = [16, 640], strides = [1, 1]} : vector<16x768xf32> to vector<16x640xf32>
    %7 = vector.extract_strided_slice %5 {offsets = [0, 640], sizes = [16, 128], strides = [1, 1]} : vector<16x768xf32> to vector<16x128xf32>
    %c0_5 = arith.constant 0 : index
    %c0_6 = arith.constant 0 : index
    %c0_7 = arith.constant 0 : index
    %8 = vector.load %arg4[%c0_5, %c0_6, %c0_7] : memref<16x16x128xbf16, #tpu.memory_space<vmem>>, vector<16x16x128xbf16>
    %9 = arith.truncf %7 : vector<16x128xf32> to vector<16x128xbf16>
    %10 = vector.shape_cast %9 : vector<16x128xbf16> to vector<16x1x128xbf16>
    %11 = vector.broadcast %10 : vector<16x1x128xbf16> to vector<16x16x128xbf16>
    %12 = arith.addf %8, %11 : vector<16x16x128xbf16>
    %13 = math.tanh %12 : vector<16x16x128xbf16>
    %14 = arith.extf %13 : vector<16x16x128xbf16> to vector<16x16x128xf32>
    %c0_8 = arith.constant 0 : index
    %c0_9 = arith.constant 0 : index
    %15 = vector.load %arg9[%c0_8, %c0_9] : memref<1x128xf32, #tpu.memory_space<vmem>>, vector<1x128xf32>
    %16 = vector.shape_cast %15 : vector<1x128xf32> to vector<1x1x128xf32>
    %17 = vector.broadcast %16 : vector<1x1x128xf32> to vector<16x16x128xf32>
    %18 = arith.mulf %14, %17 : vector<16x16x128xf32>
    %cst_10 = arith.constant dense<0.000000e+00> : vector<16x16xf32>
    %19 = vector.multi_reduction <add>, %18, %cst_10 [2] : vector<16x16x128xf32> to vector<16x16xf32>
    %20 = vector.shape_cast %19 : vector<16x16xf32> to vector<16x16x1xf32>
    %c0_11 = arith.constant 0 : index
    %21 = memref.load %arg10[%c0_11] : memref<1xf32, #tpu.memory_space<smem>>
    %22 = vector.broadcast %21 : f32 to vector<16x16x1xf32>
    %23 = arith.addf %20, %22 : vector<16x16x1xf32>
    %cst_12 = arith.constant dense<0xFF800000> : vector<16x1xf32>
    %24 = vector.multi_reduction <maximumf>, %23, %cst_12 [1] : vector<16x16x1xf32> to vector<16x1xf32>
    %25 = vector.shape_cast %24 : vector<16x1xf32> to vector<16x1x1xf32>
    %26 = vector.broadcast %25 : vector<16x1x1xf32> to vector<16x16x1xf32>
    %27 = arith.subf %23, %26 : vector<16x16x1xf32>
    %28 = math.exp %27 : vector<16x16x1xf32>
    %cst_13 = arith.constant dense<0.000000e+00> : vector<16x1xf32>
    %29 = vector.multi_reduction <add>, %28, %cst_13 [1] : vector<16x16x1xf32> to vector<16x1xf32>
    %30 = vector.shape_cast %29 : vector<16x1xf32> to vector<16x1x1xf32>
    %31 = tpu.reciprocal %30 {approx = true} : vector<16x1x1xf32> -> vector<16x1x1xf32>
    %32 = vector.broadcast %31 : vector<16x1x1xf32> to vector<16x16x1xf32>
    %33 = arith.mulf %28, %32 : vector<16x16x1xf32>
    %34 = arith.truncf %33 : vector<16x16x1xf32> to vector<16x16x1xbf16>
    %c0_14 = arith.constant 0 : index
    %c0_15 = arith.constant 0 : index
    %c0_16 = arith.constant 0 : index
    %35 = vector.load %arg3[%c0_14, %c0_15, %c0_16] : memref<16x16x128xbf16, #tpu.memory_space<vmem>>, vector<16x16x128xbf16>
    %36 = vector.broadcast %34 : vector<16x16x1xbf16> to vector<16x16x128xbf16>
    %37 = arith.mulf %36, %35 : vector<16x16x128xbf16>
    %38 = arith.extf %37 : vector<16x16x128xbf16> to vector<16x16x128xf32>
    %cst_17 = arith.constant dense<0.000000e+00> : vector<16x128xf32>
    %39 = vector.multi_reduction <add>, %38, %cst_17 [1] : vector<16x16x128xf32> to vector<16x128xf32>
    %40 = vector.extract_strided_slice %6 {offsets = [0, 0], sizes = [16, 384], strides = [1, 1]} : vector<16x640xf32> to vector<16x384xf32>
    %41 = arith.negf %40 : vector<16x384xf32>
    %42 = math.exp %41 : vector<16x384xf32>
    %cst_18 = arith.constant 1.000000e+00 : f32
    %43 = vector.broadcast %cst_18 : f32 to vector<16x384xf32>
    %44 = arith.addf %43, %42 : vector<16x384xf32>
    %45 = arith.divf %43, %44 : vector<16x384xf32>
    %46 = vector.extract_strided_slice %45 {offsets = [0, 0], sizes = [16, 128], strides = [1, 1]} : vector<16x384xf32> to vector<16x128xf32>
    %47 = vector.extract_strided_slice %45 {offsets = [0, 128], sizes = [16, 128], strides = [1, 1]} : vector<16x384xf32> to vector<16x128xf32>
    %48 = vector.extract_strided_slice %45 {offsets = [0, 256], sizes = [16, 128], strides = [1, 1]} : vector<16x384xf32> to vector<16x128xf32>
    %49 = arith.truncf %39 : vector<16x128xf32> to vector<16x128xbf16>
    %c0_19 = arith.constant 0 : index
    %c0_20 = arith.constant 0 : index
    %50 = vector.load %arg7[%c0_19, %c0_20] : memref<128x256xbf16, #tpu.memory_space<vmem>>, vector<128x256xbf16>
    %cst_21 = arith.constant dense<0.000000e+00> : vector<16x256xf32>
    %51 = tpu.matmul %49, %50, %cst_21 {dimension_numbers = #tpu.dot_dimension_numbers<[1], [0], [0], [1], [0, 0, 1, 1], [], []>} : vector<16x128xbf16>, vector<128x256xbf16>, vector<16x256xf32> -> vector<16x256xf32>
    %c0_22 = arith.constant 0 : index
    %c0_23 = arith.constant 0 : index
    %52 = vector.load %arg8[%c0_22, %c0_23] : memref<1x256xf32, #tpu.memory_space<vmem>>, vector<1x256xf32>
    %53 = vector.broadcast %52 : vector<1x256xf32> to vector<16x256xf32>
    %54 = arith.addf %51, %53 : vector<16x256xf32>
    %55 = vector.extract_strided_slice %6 {offsets = [0, 384], sizes = [16, 256], strides = [1, 1]} : vector<16x640xf32> to vector<16x256xf32>
    %56 = arith.addf %55, %54 : vector<16x256xf32>
    %57 = vector.extract_strided_slice %56 {offsets = [0, 0], sizes = [16, 128], strides = [1, 1]} : vector<16x256xf32> to vector<16x128xf32>
    %58 = vector.extract_strided_slice %56 {offsets = [0, 128], sizes = [16, 128], strides = [1, 1]} : vector<16x256xf32> to vector<16x128xf32>
    %59 = arith.maximumf %57, %58 : vector<16x128xf32>
    %c0_24 = arith.constant 0 : index
    %c0_25 = arith.constant 0 : index
    %60 = vector.load %arg2[%c0_24, %c0_25] : memref<16x128xf32, #tpu.memory_space<vmem>>, vector<16x128xf32>
    %61 = arith.mulf %47, %60 : vector<16x128xf32>
    %62 = arith.mulf %46, %59 : vector<16x128xf32>
    %63 = arith.addf %61, %62 : vector<16x128xf32>
    %64 = math.tanh %63 : vector<16x128xf32>
    %65 = arith.mulf %48, %64 : vector<16x128xf32>
    %66 = arith.truncf %65 : vector<16x128xf32> to vector<16x128xbf16>
    %c0_26 = arith.constant 0 : index
    %c0_27 = arith.constant 0 : index
    %67 = vector.load %arg11[%c0_26, %c0_27] : memref<16x128xbf16, #tpu.memory_space<vmem>>, vector<16x128xbf16>
    tpu.vector_store %arg11[%c0_26, %c0_27], %66 {strides = array<i32>} : memref<16x128xbf16, #tpu.memory_space<vmem>>, vector<16x128xbf16>,
    %c0_28 = arith.constant 0 : index
    %c0_29 = arith.constant 0 : index
    %68 = vector.load %arg12[%c0_28, %c0_29] : memref<16x128xf32, #tpu.memory_space<vmem>>, vector<16x128xf32>
    tpu.vector_store %arg12[%c0_28, %c0_29], %63 {strides = array<i32>} : memref<16x128xf32, #tpu.memory_space<vmem>>, vector<16x128xf32>,
    return
  }
  func.func @transform_0(%arg0: i32) -> (i32, i32) {
    %c0_i32 = arith.constant 0 : i32
    %c0_i32_0 = arith.constant 0 : i32
    return %arg0, %c0_i32 : i32, i32
  }
  func.func @transform_1(%arg0: i32) -> (i32, i32) {
    %c0_i32 = arith.constant 0 : i32
    %c0_i32_0 = arith.constant 0 : i32
    return %arg0, %c0_i32 : i32, i32
  }
  func.func @transform_2(%arg0: i32) -> (i32, i32, i32) {
    %c0_i32 = arith.constant 0 : i32
    %c0_i32_0 = arith.constant 0 : i32
    %c0_i32_1 = arith.constant 0 : i32
    return %arg0, %c0_i32, %c0_i32_0 : i32, i32, i32
  }
  func.func @transform_3(%arg0: i32) -> (i32, i32, i32) {
    %c0_i32 = arith.constant 0 : i32
    %c0_i32_0 = arith.constant 0 : i32
    %c0_i32_1 = arith.constant 0 : i32
    return %arg0, %c0_i32, %c0_i32_0 : i32, i32, i32
  }
  func.func @transform_4(%arg0: i32) -> (i32, i32) {
    %c0_i32 = arith.constant 0 : i32
    %c0_i32_0 = arith.constant 0 : i32
    %c0_i32_1 = arith.constant 0 : i32
    return %c0_i32, %c0_i32_0 : i32, i32
  }
  func.func @transform_5(%arg0: i32) -> (i32, i32) {
    %c0_i32 = arith.constant 0 : i32
    %c0_i32_0 = arith.constant 0 : i32
    %c0_i32_1 = arith.constant 0 : i32
    return %c0_i32, %c0_i32_0 : i32, i32
  }
  func.func @transform_6(%arg0: i32) -> (i32, i32) {
    %c0_i32 = arith.constant 0 : i32
    %c0_i32_0 = arith.constant 0 : i32
    %c0_i32_1 = arith.constant 0 : i32
    return %c0_i32, %c0_i32_0 : i32, i32
  }
  func.func @transform_7(%arg0: i32) -> (i32, i32) {
    %c0_i32 = arith.constant 0 : i32
    %c0_i32_0 = arith.constant 0 : i32
    %c0_i32_1 = arith.constant 0 : i32
    return %c0_i32, %c0_i32_0 : i32, i32
  }
  func.func @transform_8(%arg0: i32) -> (i32, i32) {
    %c0_i32 = arith.constant 0 : i32
    %c0_i32_0 = arith.constant 0 : i32
    %c0_i32_1 = arith.constant 0 : i32
    return %c0_i32, %c0_i32_0 : i32, i32
  }
  func.func @transform_9(%arg0: i32) -> i32 {
    %c0_i32 = arith.constant 0 : i32
    %c0_i32_0 = arith.constant 0 : i32
    return %c0_i32 : i32
  }
  func.func @transform_10(%arg0: i32) -> (i32, i32) {
    %c0_i32 = arith.constant 0 : i32
    %c0_i32_0 = arith.constant 0 : i32
    return %arg0, %c0_i32 : i32, i32
  }
  func.func @transform_11(%arg0: i32) -> (i32, i32) {
    %c0_i32 = arith.constant 0 : i32
    %c0_i32_0 = arith.constant 0 : i32
    return %arg0, %c0_i32 : i32, i32
  }
}

module attributes {stable_mosaic.version = 11 : i64} {
  func.func @att2in2_kernel(%arg0: i32, %arg1: memref<16x256xbf16, #tpu.memory_space<vmem>>, %arg2: memref<16x128xf32, #tpu.memory_space<vmem>>, %arg3: memref<16x16x128xbf16, #tpu.memory_space<vmem>>, %arg4: memref<16x16x128xbf16, #tpu.memory_space<vmem>>, %arg5: memref<256x768xbf16, #tpu.memory_space<vmem>>, %arg6: memref<1x768xf32, #tpu.memory_space<vmem>>, %arg7: memref<128x256xbf16, #tpu.memory_space<vmem>>, %arg8: memref<1x256xf32, #tpu.memory_space<vmem>>, %arg9: memref<1x128xf32, #tpu.memory_space<vmem>>, %arg10: memref<1xf32, #tpu.memory_space<smem>>, %arg11: memref<16x128xbf16, #tpu.memory_space<vmem>>, %arg12: memref<16x128xf32, #tpu.memory_space<vmem>>) attributes {dimension_semantics = [#tpu.dimension_semantics<parallel>], iteration_bounds = array<i64: 2>, scalar_prefetch = 0 : i64, scratch_operands = 0 : i64, tpu.core_type = #tpu.core_type<tc>, window_params = [{transform_indices = @transform_0, window_bounds = array<i64: 16, 256>}, {transform_indices = @transform_1, window_bounds = array<i64: 16, 128>}, {transform_indices = @transform_2, window_bounds = array<i64: 16, 16, 128>}, {transform_indices = @transform_3, window_bounds = array<i64: 16, 16, 128>}, {pipeline_mode = #tpu.pipeline_mode<synchronous>, transform_indices = @transform_4, window_bounds = array<i64: 256, 768>}, {pipeline_mode = #tpu.pipeline_mode<synchronous>, transform_indices = @transform_5, window_bounds = array<i64: 1, 768>}, {pipeline_mode = #tpu.pipeline_mode<synchronous>, transform_indices = @transform_6, window_bounds = array<i64: 128, 256>}, {pipeline_mode = #tpu.pipeline_mode<synchronous>, transform_indices = @transform_7, window_bounds = array<i64: 1, 256>}, {pipeline_mode = #tpu.pipeline_mode<synchronous>, transform_indices = @transform_8, window_bounds = array<i64: 1, 128>}, {transform_indices = @transform_9, window_bounds = array<i64: 1>}, {transform_indices = @transform_10, window_bounds = array<i64: 16, 128>}, {transform_indices = @transform_11, window_bounds = array<i64: 16, 128>}]} {
    %c0 = arith.constant 0 : index
    %c0_0 = arith.constant 0 : index
    %0 = vector.load %arg1[%c0, %c0_0] : memref<16x256xbf16, #tpu.memory_space<vmem>>, vector<16x256xbf16>
    %c0_1 = arith.constant 0 : index
    %c0_2 = arith.constant 0 : index
    %1 = vector.load %arg5[%c0_1, %c0_2] : memref<256x768xbf16, #tpu.memory_space<vmem>>, vector<256x768xbf16>
    %cst = arith.constant dense<0.000000e+00> : vector<16x768xf32>
    %2 = tpu.matmul %0, %1, %cst {dimension_numbers = #tpu.dot_dimension_numbers<[1], [0], [0], [1], [0, 0, 1, 1], [], []>} : vector<16x256xbf16>, vector<256x768xbf16>, vector<16x768xf32> -> vector<16x768xf32>
    %c0_3 = arith.constant 0 : index
    %c0_4 = arith.constant 0 : index
    %3 = vector.load %arg6[%c0_3, %c0_4] : memref<1x768xf32, #tpu.memory_space<vmem>>, vector<1x768xf32>
    %4 = vector.broadcast %3 : vector<1x768xf32> to vector<16x768xf32>
    %5 = arith.addf %2, %4 : vector<16x768xf32>
    %6 = vector.extract_strided_slice %5 {offsets = [0, 0], sizes = [16, 640], strides = [1, 1]} : vector<16x768xf32> to vector<16x640xf32>
    %7 = vector.extract_strided_slice %5 {offsets = [0, 640], sizes = [16, 128], strides = [1, 1]} : vector<16x768xf32> to vector<16x128xf32>
    %c0_5 = arith.constant 0 : index
    %c0_6 = arith.constant 0 : index
    %c0_7 = arith.constant 0 : index
    %8 = vector.load %arg4[%c0_5, %c0_6, %c0_7] : memref<16x16x128xbf16, #tpu.memory_space<vmem>>, vector<16x16x128xbf16>
    %9 = arith.truncf %7 : vector<16x128xf32> to vector<16x128xbf16>
    %10 = vector.shape_cast %9 : vector<16x128xbf16> to vector<16x1x128xbf16>
    %11 = vector.broadcast %10 : vector<16x1x128xbf16> to vector<16x16x128xbf16>
    %12 = arith.addf %8, %11 : vector<16x16x128xbf16>
    %13 = math.tanh %12 : vector<16x16x128xbf16>
    %14 = arith.extf %13 : vector<16x16x128xbf16> to vector<16x16x128xf32>
    %c0_8 = arith.constant 0 : index
    %c0_9 = arith.constant 0 : index
    %15 = vector.load %arg9[%c0_8, %c0_9] : memref<1x128xf32, #tpu.memory_space<vmem>>, vector<1x128xf32>
    %16 = vector.shape_cast %15 : vector<1x128xf32> to vector<1x1x128xf32>
    %17 = vector.broadcast %16 : vector<1x1x128xf32> to vector<16x16x128xf32>
    %18 = arith.mulf %14, %17 : vector<16x16x128xf32>
    %cst_10 = arith.constant dense<0.000000e+00> : vector<16x16xf32>
    %19 = vector.multi_reduction <add>, %18, %cst_10 [2] : vector<16x16x128xf32> to vector<16x16xf32>
    %20 = vector.shape_cast %19 : vector<16x16xf32> to vector<16x16x1xf32>
    %c0_11 = arith.constant 0 : index
    %21 = memref.load %arg10[%c0_11] : memref<1xf32, #tpu.memory_space<smem>>
    %22 = vector.broadcast %21 : f32 to vector<16x16x1xf32>
    %23 = arith.addf %20, %22 : vector<16x16x1xf32>
    %cst_12 = arith.constant dense<0xFF800000> : vector<16x1xf32>
    %24 = vector.multi_reduction <maximumf>, %23, %cst_12 [1] : vector<16x16x1xf32> to vector<16x1xf32>
    %25 = vector.shape_cast %24 : vector<16x1xf32> to vector<16x1x1xf32>
    %26 = vector.broadcast %25 : vector<16x1x1xf32> to vector<16x16x1xf32>
    %27 = arith.subf %23, %26 : vector<16x16x1xf32>
    %28 = math.exp %27 : vector<16x16x1xf32>
    %cst_13 = arith.constant dense<0.000000e+00> : vector<16x1xf32>
    %29 = vector.multi_reduction <add>, %28, %cst_13 [1] : vector<16x16x1xf32> to vector<16x1xf32>
    %30 = vector.shape_cast %29 : vector<16x1xf32> to vector<16x1x1xf32>
    %31 = tpu.reciprocal %30 {approx = true} : vector<16x1x1xf32> -> vector<16x1x1xf32>
    %32 = vector.broadcast %31 : vector<16x1x1xf32> to vector<16x16x1xf32>
    %33 = arith.mulf %28, %32 : vector<16x16x1xf32>
    %34 = arith.truncf %33 : vector<16x16x1xf32> to vector<16x16x1xbf16>
    %c0_14 = arith.constant 0 : index
    %c0_15 = arith.constant 0 : index
    %c0_16 = arith.constant 0 : index
    %35 = vector.load %arg3[%c0_14, %c0_15, %c0_16] : memref<16x16x128xbf16, #tpu.memory_space<vmem>>, vector<16x16x128xbf16>
    %36 = vector.broadcast %34 : vector<16x16x1xbf16> to vector<16x16x128xbf16>
    %37 = arith.mulf %36, %35 : vector<16x16x128xbf16>
    %38 = arith.extf %37 : vector<16x16x128xbf16> to vector<16x16x128xf32>
    %cst_17 = arith.constant dense<0.000000e+00> : vector<16x128xf32>
    %39 = vector.multi_reduction <add>, %38, %cst_17 [1] : vector<16x16x128xf32> to vector<16x128xf32>
    %40 = vector.extract_strided_slice %6 {offsets = [0, 0], sizes = [16, 384], strides = [1, 1]} : vector<16x640xf32> to vector<16x384xf32>
    %41 = arith.negf %40 : vector<16x384xf32>
    %42 = math.exp %41 : vector<16x384xf32>
    %cst_18 = arith.constant 1.000000e+00 : f32
    %43 = vector.broadcast %cst_18 : f32 to vector<16x384xf32>
    %44 = arith.addf %43, %42 : vector<16x384xf32>
    %45 = arith.divf %43, %44 : vector<16x384xf32>
    %46 = vector.extract_strided_slice %45 {offsets = [0, 0], sizes = [16, 128], strides = [1, 1]} : vector<16x384xf32> to vector<16x128xf32>
    %47 = vector.extract_strided_slice %45 {offsets = [0, 128], sizes = [16, 128], strides = [1, 1]} : vector<16x384xf32> to vector<16x128xf32>
    %48 = vector.extract_strided_slice %45 {offsets = [0, 256], sizes = [16, 128], strides = [1, 1]} : vector<16x384xf32> to vector<16x128xf32>
    %49 = arith.truncf %39 : vector<16x128xf32> to vector<16x128xbf16>
    %c0_19 = arith.constant 0 : index
    %c0_20 = arith.constant 0 : index
    %50 = vector.load %arg7[%c0_19, %c0_20] : memref<128x256xbf16, #tpu.memory_space<vmem>>, vector<128x256xbf16>
    %cst_21 = arith.constant dense<0.000000e+00> : vector<16x256xf32>
    %51 = tpu.matmul %49, %50, %cst_21 {dimension_numbers = #tpu.dot_dimension_numbers<[1], [0], [0], [1], [0, 0, 1, 1], [], []>} : vector<16x128xbf16>, vector<128x256xbf16>, vector<16x256xf32> -> vector<16x256xf32>
    %c0_22 = arith.constant 0 : index
    %c0_23 = arith.constant 0 : index
    %52 = vector.load %arg8[%c0_22, %c0_23] : memref<1x256xf32, #tpu.memory_space<vmem>>, vector<1x256xf32>
    %53 = vector.broadcast %52 : vector<1x256xf32> to vector<16x256xf32>
    %54 = arith.addf %51, %53 : vector<16x256xf32>
    %55 = vector.extract_strided_slice %6 {offsets = [0, 384], sizes = [16, 256], strides = [1, 1]} : vector<16x640xf32> to vector<16x256xf32>
    %56 = arith.addf %55, %54 : vector<16x256xf32>
    %57 = vector.extract_strided_slice %56 {offsets = [0, 0], sizes = [16, 128], strides = [1, 1]} : vector<16x256xf32> to vector<16x128xf32>
    %58 = vector.extract_strided_slice %56 {offsets = [0, 128], sizes = [16, 128], strides = [1, 1]} : vector<16x256xf32> to vector<16x128xf32>
    %59 = arith.maximumf %57, %58 : vector<16x128xf32>
    %c0_24 = arith.constant 0 : index
    %c0_25 = arith.constant 0 : index
    %60 = vector.load %arg2[%c0_24, %c0_25] : memref<16x128xf32, #tpu.memory_space<vmem>>, vector<16x128xf32>
    %61 = arith.mulf %47, %60 : vector<16x128xf32>
    %62 = arith.mulf %46, %59 : vector<16x128xf32>
    %63 = arith.addf %61, %62 : vector<16x128xf32>
    %64 = math.tanh %63 : vector<16x128xf32>
    %65 = arith.mulf %48, %64 : vector<16x128xf32>
    %66 = arith.truncf %65 : vector<16x128xf32> to vector<16x128xbf16>
    %c0_26 = arith.constant 0 : index
    %c0_27 = arith.constant 0 : index
    %67 = vector.load %arg11[%c0_26, %c0_27] : memref<16x128xbf16, #tpu.memory_space<vmem>>, vector<16x128xbf16>
    tpu.vector_store %arg11[%c0_26, %c0_27], %66 {strides = array<i32>} : memref<16x128xbf16, #tpu.memory_space<vmem>>, vector<16x128xbf16>,
    %c0_28 = arith.constant 0 : index
    %c0_29 = arith.constant 0 : index
    %68 = vector.load %arg12[%c0_28, %c0_29] : memref<16x128xf32, #tpu.memory_space<vmem>>, vector<16x128xf32>
    tpu.vector_store %arg12[%c0_28, %c0_29], %63 {strides = array<i32>} : memref<16x128xf32, #tpu.memory_space<vmem>>, vector<16x128xf32>,
    return
  }
  func.func @transform_0(%arg0: i32) -> (i32, i32) {
    %c0_i32 = arith.constant 0 : i32
    %c0_i32_0 = arith.constant 0 : i32
    return %arg0, %c0_i32 : i32, i32
  }
  func.func @transform_1(%arg0: i32) -> (i32, i32) {
    %c0_i32 = arith.constant 0 : i32
    %c0_i32_0 = arith.constant 0 : i32
    return %arg0, %c0_i32 : i32, i32
  }
  func.func @transform_2(%arg0: i32) -> (i32, i32, i32) {
    %c0_i32 = arith.constant 0 : i32
    %c0_i32_0 = arith.constant 0 : i32
    %c0_i32_1 = arith.constant 0 : i32
    return %arg0, %c0_i32, %c0_i32_0 : i32, i32, i32
  }
  func.func @transform_3(%arg0: i32) -> (i32, i32, i32) {
    %c0_i32 = arith.constant 0 : i32
    %c0_i32_0 = arith.constant 0 : i32
    %c0_i32_1 = arith.constant 0 : i32
    return %arg0, %c0_i32, %c0_i32_0 : i32, i32, i32
  }
  func.func @transform_4(%arg0: i32) -> (i32, i32) {
    %c0_i32 = arith.constant 0 : i32
    %c0_i32_0 = arith.constant 0 : i32
    %c0_i32_1 = arith.constant 0 : i32
    return %c0_i32, %c0_i32_0 : i32, i32
  }
  func.func @transform_5(%arg0: i32) -> (i32, i32) {
    %c0_i32 = arith.constant 0 : i32
    %c0_i32_0 = arith.constant 0 : i32
    %c0_i32_1 = arith.constant 0 : i32
    return %c0_i32, %c0_i32_0 : i32, i32
  }
  func.func @transform_6(%arg0: i32) -> (i32, i32) {
    %c0_i32 = arith.constant 0 : i32
    %c0_i32_0 = arith.constant 0 : i32
    %c0_i32_1 = arith.constant 0 : i32
    return %c0_i32, %c0_i32_0 : i32, i32
  }
  func.func @transform_7(%arg0: i32) -> (i32, i32) {
    %c0_i32 = arith.constant 0 : i32
    %c0_i32_0 = arith.constant 0 : i32
    %c0_i32_1 = arith.constant 0 : i32
    return %c0_i32, %c0_i32_0 : i32, i32
  }
  func.func @transform_8(%arg0: i32) -> (i32, i32) {
    %c0_i32 = arith.constant 0 : i32
    %c0_i32_0 = arith.constant 0 : i32
    %c0_i32_1 = arith.constant 0 : i32
    return %c0_i32, %c0_i32_0 : i32, i32
  }
  func.func @transform_9(%arg0: i32) -> i32 {
    %c0_i32 = arith.constant 0 : i32
    %c0_i32_0 = arith.constant 0 : i32
    return %c0_i32 : i32
  }
  func.func @transform_10(%arg0: i32) -> (i32, i32) {
    %c0_i32 = arith.constant 0 : i32
    %c0_i32_0 = arith.constant 0 : i32
    return %arg0, %c0_i32 : i32, i32
  }
  func.func @transform_11(%arg0: i32) -> (i32, i32) {
    %c0_i32 = arith.constant 0 : i32
    %c0_i32_0 = arith.constant 0 : i32
    return %arg0, %c0_i32 : i32, i32
  }
}

</mosaic_0001>

<bundles_post_ra>
// kernel: tpu_custom_call.1
= control target key start
LH: loop header
LB: loop body
LE: loop exit
PB: predicated region body
PF: predicated region fallthrough
CT: control target
= control target key end

     0   :  { %s5153_s0 = inlined_call_operand.hbm [shape: bf16[32,256], index: 0, kind: input, shape index: {}]   ;;  %s5154_s1 = inlined_call_operand.hbm [shape: f32[32,128], index: 1, kind: input, shape index: {}]   ;;  %s5155_s2 = inlined_call_operand.hbm [shape: bf16[32,16,128], index: 2, kind: input, shape index: {}]   ;;  %s5156_s3 = inlined_call_operand.hbm [shape: bf16[32,16,128], index: 3, kind: input, shape index: {}]   ;;  %s5157_s4 = inlined_call_operand.hbm [shape: bf16[256,768], index: 4, kind: input, shape index: {}]   ;;  %s5158_s5 = inlined_call_operand.vmem [shape: f32[1,768], index: 5, kind: input, shape index: {}]   ;;  %s5159_s6 = inlined_call_operand.hbm [shape: bf16[128,256], index: 6, kind: input, shape index: {}]   ;;  %s5160_s7 = inlined_call_operand.vmem [shape: f32[1,256], index: 7, kind: input, shape index: {}]   ;;  %s5161_s8 = inlined_call_operand.vmem [shape: f32[1,128], index: 8, kind: input, shape index: {}]   ;;  %s5162_s9 = inlined_call_operand.<no memory space> [shape: f32[1], index: 9, kind: input, shape index: {}]   ;;  %s5163_s10 = inlined_call_operand.hbm [shape: bf16[32,128], index: 10, kind: output, shape index: {0}]   ;;  %s5164_s11 = inlined_call_operand.hbm [shape: f32[32,128], index: 11, kind: output, shape index: {1}]  }
   0x1   :  { %5188 = sst [smem:[#allocation33_spill]] %s5154_s1 }
   0x2   :  { %5189 = sst [smem:[#allocation34_spill]] %s5157_s4 }
   0x3   :  { %5190 = sst [smem:[#allocation35_spill]] %s5160_s7 }
   0x4   :  { %5191 = sst [smem:[#allocation36_spill]] %s5163_s10 }
   0x5   :  { %5192 = sst [smem:[#allocation37_spill]] %s5164_s11 }
   0x6   :  { %17 = sst [smem:[#allocation2]] %s5162_s9 }
   0x7   :  { %18 = vsyncpa [#allocation4], 0 }
   0x8   :  { %20 = vsyncpa [#allocation4 + $0x1], 0 }
   0x9   :  { %21 = vsyncpa [#allocation7], 0 }
   0xa   :  { %23 = vsyncpa [#allocation7 + $0x1], 0 }
   0xb   :  { %24 = vsyncpa [#allocation10], 0 }
   0xc   :  { %26 = vsyncpa [#allocation10 + $0x1], 0 }
   0xd   :  { %27 = vsyncpa [#allocation13], 0 }
   0xe   :  { %28 = vsyncpa [#allocation5], 0 }
   0xf   :  { %30 = vsyncpa [#allocation5 + $0x1], 0 }
  0x10   :  { %31 = vsyncpa [#allocation16], 0 }
  0x11   :  { %33 = vsyncpa [#allocation16 + $0x1], 0  ;;  %s4163_s19 = smov 0   ;;  %s4165_s20 = smov 0  }
  0x12   :  { %s4167_s21 = smov 0   ;;  %s4169_s22 = smov 0  }
  0x13 LB: > { %5193 = sst [smem:[#allocation24_spill]] %s4066_s19  ;;  %s4184_s9 = sadd.s32 4294967295, %s4078_s22   ;;  %s4078_s22 = sphi %s4169_s22, %s5241_s22   ;;  %s4074_s21 = sphi %s4167_s21, %s5243_s21   ;;  %s4070_s20 = sphi %s4165_s20, %s5245_s20   ;;  %s4066_s19 = sphi %s4163_s19, %s5244_s19  }
  0x14   : > { %5194 = sst [smem:[#allocation25_spill]] %s4074_s21  ;;  %s3095_s23 = sadd.s32 4294967294, %s4078_s22  }
  0x15   : > { %s4188_s24 = sadd.s32 1, %s4078_s22   ;;  %s46_s25 = sadd.s32 1, %s4074_s21 }
  0x16   : > { %5195 = sst [smem:[#allocation26_spill]] %s4188_s24  ;;  %s43_s26 = ssub.s32 %s4078_s22, %s4188_s24 }
  0x17   : > { %p53_p0 = scmp.ne.s32.totalorder %s4074_s21, %s4070_s20  ;;  %p44_p1 = scmp.eq.s32.totalorder %s43_s26, 0 }
  0x18   : > { %p54_p2 = scmp.eq.s32.totalorder %s4078_s22, 0  ;;  %p59_p3 = scmp.ne.s32.totalorder %s4070_s20, %s4066_s19 }
  0x19   : > { %p5167_p4 = scmp.eq.s32.totalorder %s4184_s9, 0  ;;  %p287_p7 = scmp.eq.s32.totalorder %s4184_s9, 1 }
  0x1a   : > { %s4200_s27 = scalar_select %p44_p1, %s4074_s21, %s46_s25  }
  0x1b   : > { %p4202_p5 = por %p54_p2, %p53_p0  ;;  %p4208_p6 = por %p5167_p4, %p59_p3 }
  0x1c   : > { %5196 = sst [smem:[#allocation27_spill]] %s4200_s27  ;;  %p293_p8 = scmp.eq.s32.totalorder %s3095_s23, 1 }
  0x1d   : > { %s5197_s28 = scalar_select %p4202_p5, 1, 0 }
  0x1e   : > { %s5198_s29 = scalar_select %p4208_p6, 1, 0 }
  0x1f   : > { %p3096_p9 = scmp.ge.s32.totalorder %s4078_s22, 1  ;;  %p326_p10 = scmp.lt.s32.totalorder %s4078_s22, 3 }
  0x20   : > { %p4215_p11 = por %p287_p7, %p53_p0  ;;  %p4219_p12 = por %p293_p8, %p59_p3 }
  0x21   : > { %p4223_p13 = pnand %p3096_p9, %p326_p10  ;;  %s4080_s14 = smov [#allocation11]  }
  0x22   : > { %s5199_s30 = scalar_select %p4215_p11, 1, 0 }
  0x23   : > { %s5201_s12 = scalar_select %p4219_p12, 1, 0 }
  0x24   : > { %5200 = sst [smem:[#allocation28_spill]] %s5199_s30  ;;  %p3332_p1 = pneg %p4223_p13 }
  0x25   : > { %5202 = sst [smem:[#allocation29_spill]] %s5201_s12  ;;  %s338_s15 = sshll.u32 %s4080_s14, 4  ;;  %s339_s15 = int_to_ptr.vmem [resolvable:$true] %s338_s15 }
  0x26   : > { %s5203_s13 = scalar_select %p4223_p13, 1, 0 }
  0x27   : > { %p4231_p2 = pnand %p3332_p1, %p5167_p4  ;;  %s5205_s4 = sld [smem:[#allocation34_spill]] }
  0x29   : > { %s5204_s16 = scalar_select %p4231_p2, 1, 0 }
  0x2a   : > { %p5177_p8 = pneg %p4231_p2 }
  0x2d   : > { %s3788_s23 = scalar_lea.hbm %s5205_s4, 12288 }
  0x2e   : > { %p3789_p7 = scmp.ne.s32.totalorder %s5205_s4, %s3788_s23  ;;  %p3795_p1 = scmp.lt.u32.totalorder %s3788_s23, %s5205_s4 }
  0x30   : > { %p3791_p9 = pnand %p5177_p8, %p3789_p7 }
  0x32   : > { %p3792_p10 = pneg %p3791_p9 }
  0x34   : > { %p3797_p0 = pnand %p3795_p1, %p3792_p10 }
  0x36   : > { %3800 = shalt.err (!%p3797_p0)
}
  0x37   : > { %s3801_s24 = scalar_lea.vmem %s339_s15, 12288  ;;  %p3809_p11 = scmp.lt.s32.totalorder %s339_s15, %s339_s15 }
  0x38   : > { %p3802_p4 = scmp.ne.s32.totalorder %s339_s15, %s3801_s24  ;;  %p3810_p6 = scmp.lt.s32.totalorder %s3801_s24, %s3801_s24 }
  0x3a   : > { %p3804_p3 = pnand %p3802_p4, %p5177_p8  ;;  %p3811_p13 = por %p3810_p6, %p3809_p11 }
  0x3c   : > { %p3805_p12 = pneg %p3804_p3 }
  0x3e   : > { %p3812_p5 = pnand %p3811_p13, %p3805_p12 }
  0x40   : > { %3815 = shalt.err (!%p3812_p5)
}
  0x41   : > { %s4081_s17 = smov 384   ;;  %s4082_s27 = smov 24  }
  0x42   : > { %3335 = dma.hbm_to_vmem [thread:$0]  (!%p4231_p2), %s5205_s4, 12288, %s339_s15, [#allocation10], %s4081_s17, %s4081_s17, %s4082_s27  }
  0x43   : > { %s4260_s25 = sand.u32 1, %s4074_s21   ;;  %s5175_s24 = sshll.u32 %s4078_s22, 8 }
  0x44   : > { %s5174_s26 = sshll.u32 %s4260_s25, 4  ;;  %p5206_p4 = scmp.ne.s32.totalorder %s5197_s28, 0 }
  0x45   : > { %p5207_p5 = scmp.lt.s32.totalorder %s4078_s22, 2  ;;  %s5176_s12 = sand.u32 1, %s4078_s22  }
  0x46   : > { %s5209_s1 = sld [smem:[#allocation33_spill]]  ;;  %s403_s15 = scalar_lea.vmem [#allocation6], %s5174_s26 }
  0x47   : > { %p4268_p6 = pnand %p5207_p5, %p5206_p4  ;;  %s410_s28 = sshll.u32 %s403_s15, 4  ;;  %s4282_s28 = int_to_ptr.vmem [resolvable:$true] %s410_s28 }
  0x48   : > { %s4286_s17 = scalar_lea.sflag [#allocation7], %s5176_s12 }
  0x49   : > { %s5208_s14 = scalar_select %p4268_p6, 1, 0 }
  0x4a   : > { %p4292_p12 = pneg %p4268_p6 }
  0x4c   : > { %s4278_s18 = scalar_lea.hbm %s5209_s1, %s5175_s24  ;;  %s3821_s15 = scalar_lea.hbm %s5209_s1, 512 }
  0x4d   : > { %s3816_s27 = scalar_lea.hbm %s4278_s18, 256  ;;  %p3822_p3 = scmp.lt.u32.totalorder %s4278_s18, %s5209_s1 }
  0x4e   : > { %p3817_p11 = scmp.ne.s32.totalorder %s4278_s18, %s3816_s27  ;;  %p3823_p7 = scmp.lt.u32.totalorder %s3821_s15, %s3816_s27 }
  0x4f   : > { %s5210_s23 = scalar_select %p4292_p12, 1, 0 }
  0x50   : > { %p3819_p13 = pnand %p4292_p12, %p3817_p11  ;;  %p3824_p9 = por %p3823_p7, %p3822_p3 }
  0x51   : > { %p3825_p10 = scmp.lt.u32.totalorder %s3816_s27, %s4278_s18 }
  0x52   : > { %p3820_p0 = pneg %p3819_p13 }
  0x53   : > { %p3826_p1 = por %p3825_p10, %p3824_p9 }
  0x55   : > { %p3827_p4 = pnand %p3826_p1, %p3820_p0 }
  0x57   : > { %3830 = shalt.err (!%p3827_p4)
}
  0x58   : > { %s3831_s12 = scalar_lea.vmem %s4282_s28, 256  ;;  %s4083_s10 = smov [#allocation6]  }
  0x59   : > { %p3832_p5 = scmp.ne.s32.totalorder %s4282_s28, %s3831_s12  ;;  %s3836_s19 = sshll.u32 %s4083_s10, 4  ;;  %s3837_s19 = int_to_ptr.vmem [resolvable:$false] %s3836_s19 }
  0x5a   : > { %s3838_s24 = scalar_lea.vmem %s3837_s19, 512  ;;  %p3839_p8 = scmp.lt.s32.totalorder %s4282_s28, %s3837_s19 }
  0x5b   : > { %p3834_p11 = pnand %p3832_p5, %p4292_p12  ;;  %p3840_p2 = scmp.lt.s32.totalorder %s3838_s24, %s3831_s12 }
  0x5d   : > { %p3835_p13 = pneg %p3834_p11  ;;  %p3841_p3 = por %p3840_p2, %p3839_p8 }
  0x5f   : > { %p3842_p7 = pnand %p3841_p3, %p3835_p13 }
  0x61   : > { %3845 = shalt.err (!%p3842_p7)
}
  0x62   : > { %s4084_s26 = smov 128   ;;  %s4085_s27 = smov 8  }
  0x63   : > { %3345 = dma.hbm_to_vmem [thread:$0]  (!%p4268_p6), %s4278_s18, 256, %s4282_s28, %s4286_s17, %s4084_s26, %s4084_s26, %s4085_s27  }
  0x64   : > { %s4086_s15 = smov [#allocation12]   ;;  %s5211_s12 = sshll.u32 %s4078_s22, 8 }
  0x65   : > { %s354_s10 = sshll.u32 %s4086_s15, 4  ;;  %s4324_s1 = scalar_lea.hbm %s5153_s0, %s5211_s12  ;;  %s355_s10 = int_to_ptr.vmem [resolvable:$true] %s354_s10 }
  0x66   : > { %s3846_s11 = scalar_lea.hbm %s5159_s6, 2048  ;;  %p5212_p8 = scmp.ne.s32.totalorder %s5204_s16, 0 }
  0x67   : > { %p3847_p2 = scmp.ne.s32.totalorder %s5159_s6, %s3846_s11  ;;  %p3853_p1 = scmp.lt.u32.totalorder %s3846_s11, %s5159_s6 }
  0x68   : > { %p5213_p0 = pneg %p5212_p8 }
  0x6a   : > { %p3849_p9 = pnand %p3847_p2, %p5213_p0 }
  0x6c   : > { %p3850_p10 = pneg %p3849_p9 }
  0x6e   : > { %p3855_p4 = pnand %p3853_p1, %p3850_p10 }
  0x70   : > { %3858 = shalt.err (!%p3855_p4)
}
  0x71   : > { %s3859_s15 = scalar_lea.vmem %s355_s10, 2048  ;;  %p5214_p11 = pmov %p5213_p0 }
  0x72   : > { %p3860_p5 = scmp.ne.s32.totalorder %s355_s10, %s3859_s15  ;;  %p3867_p7 = scmp.lt.s32.totalorder %s355_s10, %s355_s10 }
  0x73   : > { %p3868_p6 = scmp.lt.s32.totalorder %s3859_s15, %s3859_s15 }
  0x74   : > { %p3862_p13 = pnand %p3860_p5, %p5214_p11 }
  0x75   : > { %p3869_p12 = por %p3868_p6, %p3867_p7 }
  0x76   : > { %p3863_p3 = pneg %p3862_p13 }
  0x78   : > { %p3870_p0 = pnand %p3869_p12, %p3863_p3 }
  0x7a   : > { %3873 = shalt.err (!%p3870_p0)
}
  0x7b   : > { %3338 = dma.hbm_to_vmem [thread:$0]  (!%p5212_p8), %s5159_s6, 2048, %s355_s10, [#allocation13], %s4084_s26, %s4084_s26, %s4085_s27  }
  0x7c   : > { %s5215_s11 = sshll.u32 %s4260_s25, 4  ;;  %s3107_s12 = sshll.u32 %s4260_s25, 7 }
  0x7d   : > { %s381_s21 = scalar_lea.vmem [#allocation3], %s5215_s11  ;;  %s378_s16 = scalar_lea.sflag [#allocation4], %s4260_s25 }
  0x7e   : > { %s389_s30 = sshll.u32 %s381_s21, 4  ;;  %s3874_s19 = scalar_lea.hbm %s4324_s1, 256  ;;  %s4352_s30 = int_to_ptr.vmem [resolvable:$true] %s389_s30 }
  0x7f   : > { %p3875_p6 = scmp.ne.s32.totalorder %s4324_s1, %s3874_s19  ;;  %p5216_p12 = scmp.ne.s32.totalorder %s5210_s23, 0 }
  0x80   : > { %s3879_s28 = scalar_lea.hbm %s5153_s0, 512  ;;  %p3880_p8 = scmp.lt.u32.totalorder %s4324_s1, %s5153_s0 }
  0x81   : > { %p3877_p2 = pnand %p3875_p6, %p5216_p12  ;;  %p3881_p10 = scmp.lt.u32.totalorder %s3879_s28, %s3874_s19 }
  0x82   : > { %p3883_p4 = scmp.lt.u32.totalorder %s3874_s19, %s4324_s1 }
  0x83   : > { %p3878_p9 = pneg %p3877_p2  ;;  %p3882_p1 = por %p3881_p10, %p3880_p8 }
  0x85   : > { %p3884_p5 = por %p3883_p4, %p3882_p1 }
  0x87   : > { %p3885_p11 = pnand %p3884_p5, %p3878_p9 }
  0x89   : > { %3888 = shalt.err (!%p3885_p11)
}
  0x8a   : > { %s3889_s10 = scalar_lea.vmem %s4352_s30, 256  ;;  %s4087_s7 = smov [#allocation3]  }
  0x8b   : > { %p3890_p13 = scmp.ne.s32.totalorder %s4352_s30, %s3889_s10  ;;  %s3894_s11 = sshll.u32 %s4087_s7, 4  ;;  %s3895_s11 = int_to_ptr.vmem [resolvable:$false] %s3894_s11 }
  0x8c   : > { %s3896_s21 = scalar_lea.vmem %s3895_s11, 512  ;;  %p3897_p0 = scmp.lt.s32.totalorder %s4352_s30, %s3895_s11 }
  0x8d   : > { %p3892_p3 = pnand %p3890_p13, %p5216_p12  ;;  %p3898_p6 = scmp.lt.s32.totalorder %s3896_s21, %s3889_s10 }
  0x8f   : > { %p3893_p7 = pneg %p3892_p3  ;;  %p3899_p2 = por %p3898_p6, %p3897_p0 }
  0x91   : > { %p3900_p8 = pnand %p3899_p2, %p3893_p7 }
  0x93   : > { %3903 = shalt.err (!%p3900_p8)
}
  0x94   : > { %p5217_p9 = scmp.ne.s32.totalorder %s5208_s14, 0  ;;  %s3300_s19 = sshll.u32 %s4078_s22, 11 }
  0x95   : > { %s424_s24 = scalar_lea.vmem [#allocation8], %s3107_s12  ;;  %s4389_s4 = scalar_lea.hbm %s5155_s2, %s3300_s19 }
  0x96   : > { %3342 = dma.hbm_to_vmem [thread:$0]  (!%p5217_p9), %s4324_s1, 256, %s4352_s30, %s378_s16, %s4084_s26, %s4084_s26, %s4085_s27  }
  0x97   : > { %s432_s18 = sshll.u32 %s424_s24, 4  ;;  %s3904_s10 = scalar_lea.hbm %s4389_s4, 2048  ;;  %s4391_s18 = int_to_ptr.vmem [resolvable:$true] %s432_s18 }
  0x98   : > { %p3905_p10 = scmp.ne.s32.totalorder %s4389_s4, %s3904_s10  ;;  %s3909_s27 = scalar_lea.hbm %s5155_s2, 4096 }
  0x99   : > { %p3910_p5 = scmp.lt.u32.totalorder %s4389_s4, %s5155_s2  ;;  %p3911_p11 = scmp.lt.u32.totalorder %s3909_s27, %s3904_s10 }
  0x9a   : > { %p3907_p1 = pnand %p3905_p10, %p5216_p12  ;;  %p3913_p3 = scmp.lt.u32.totalorder %s3904_s10, %s4389_s4 }
  0x9b   : > { %p3912_p13 = por %p3911_p11, %p3910_p5 }
  0x9c   : > { %p3908_p4 = pneg %p3907_p1 }
  0x9d   : > { %p3914_p7 = por %p3913_p3, %p3912_p13 }
  0x9f   : > { %p3915_p0 = pnand %p3914_p7, %p3908_p4 }
  0xa1   : > { %3918 = shalt.err (!%p3915_p0)
}
  0xa2   : > { %s3919_s7 = scalar_lea.vmem %s4391_s18, 2048  ;;  %s4088_s11 = smov [#allocation8]  }
  0xa3   : > { %p3920_p6 = scmp.ne.s32.totalorder %s4391_s18, %s3919_s7  ;;  %s3924_s21 = sshll.u32 %s4088_s11, 4  ;;  %s3925_s21 = int_to_ptr.vmem [resolvable:$false] %s3924_s21 }
  0xa4   : > { %s3926_s24 = scalar_lea.vmem %s3925_s21, 4096  ;;  %p3927_p10 = scmp.lt.s32.totalorder %s4391_s18, %s3925_s21 }
  0xa5   : > { %p3922_p2 = pnand %p3920_p6, %p5216_p12  ;;  %p3928_p1 = scmp.lt.s32.totalorder %s3926_s24, %s3919_s7 }
  0xa7   : > { %p3923_p8 = pneg %p3922_p2  ;;  %p3929_p5 = por %p3928_p1, %p3927_p10 }
  0xa9   : > { %p3930_p11 = pnand %p3929_p5, %p3923_p8 }
  0xab   : > { %3933 = shalt.err (!%p3930_p11)
}
  0xac   : > { %s4089_s28 = smov 64   ;;  %s4090_s15 = smov 4  }
  0xad   : > { %3348 = dma.hbm_to_vmem [thread:$0]  (!%p5217_p9), %s4389_s4, 2048, %s4391_s18, %s4286_s17, %s4089_s28, %s4089_s28, %s4090_s15  }
  0xae   : > { %s4423_s26 = scalar_lea.hbm %s5156_s3, %s3300_s19  ;;  %s446_s27 = scalar_lea.vmem [#allocation9], %s3107_s12 }
  0xaf   : > { %s454_s30 = sshll.u32 %s446_s27, 4  ;;  %s5218_s16 = sand.u32 1, %s4078_s22   ;;  %s4427_s30 = int_to_ptr.vmem [resolvable:$true] %s454_s30 }
  0xb0   : > { %s4431_s7 = scalar_lea.sflag [#allocation10], %s5218_s16  ;;  %s3934_s11 = scalar_lea.hbm %s4423_s26, 2048 }
  0xb1   : > { %p3935_p4 = scmp.ne.s32.totalorder %s4423_s26, %s3934_s11  ;;  %s3939_s25 = scalar_lea.hbm %s5156_s3, 4096 }
  0xb2   : > { %p3940_p7 = scmp.lt.u32.totalorder %s4423_s26, %s5156_s3  ;;  %p3941_p0 = scmp.lt.u32.totalorder %s3939_s25, %s3934_s11 }
  0xb3   : > { %p3937_p13 = pnand %p3935_p4, %p5216_p12  ;;  %p3943_p2 = scmp.lt.u32.totalorder %s3934_s11, %s4423_s26 }
  0xb4   : > { %p3942_p6 = por %p3941_p0, %p3940_p7 }
  0xb5   : > { %p3938_p3 = pneg %p3937_p13 }
  0xb6   : > { %p3944_p8 = por %p3943_p2, %p3942_p6 }
  0xb8   : > { %p3945_p10 = pnand %p3944_p8, %p3938_p3 }
  0xba   : > { %3948 = shalt.err (!%p3945_p10)
}
  0xbb   : > { %s3949_s12 = scalar_lea.vmem %s4427_s30, 2048  ;;  %s4091_s21 = smov [#allocation9]  }
  0xbc   : > { %p3950_p1 = scmp.ne.s32.totalorder %s4427_s30, %s3949_s12  ;;  %s3954_s24 = sshll.u32 %s4091_s21, 4  ;;  %s3955_s24 = int_to_ptr.vmem [resolvable:$false] %s3954_s24 }
  0xbd   : > { %s3956_s10 = scalar_lea.vmem %s3955_s24, 4096  ;;  %p3957_p4 = scmp.lt.s32.totalorder %s4427_s30, %s3955_s24 }
  0xbe   : > { %p3952_p5 = pnand %p3950_p1, %p5216_p12  ;;  %p3958_p13 = scmp.lt.s32.totalorder %s3956_s10, %s3949_s12 }
  0xc0   : > { %p3953_p11 = pneg %p3952_p5  ;;  %p3959_p7 = por %p3958_p13, %p3957_p4 }
  0xc2   : > { %p3960_p0 = pnand %p3959_p7, %p3953_p11 }
  0xc4   : > { %3963 = shalt.err (!%p3960_p0)
}
  0xc5   : > { %3351 = dma.hbm_to_vmem [thread:$0]  (!%p5217_p9), %s4423_s26, 2048, %s4427_s30, %s4431_s7, %s4089_s28, %s4089_s28, %s4090_s15  }
  0xc6   : > { %p5219_p12 = scmp.ne.s32.totalorder %s5203_s13, 0 }
  0xc8   : > { %466 = sbr.rel (%p5219_p12) target bundleno = 1189 (0x4a5), region = 60 }
  0xcf   : > { %s4461_s23 = sand.u32 1, %s4070_s20   ;;  %p5220_p3 = scmp.ne.s32.totalorder %s5198_s29, 0 }
  0xd0   : > { %s4464_s1 = sshll.u32 %s4461_s23, 4  ;;  %s469_s14 = scalar_lea.sflag [#allocation4], %s4461_s23 }
  0xd1   : > { %s4468_s27 = scalar_lea.vmem [#allocation3], %s4464_s1 }
  0xd2   : > { %4037 = dma.done.wait (%p5220_p3), %s469_s14, 256  }
  0xd3   : > { %4039 = vsyncadd (%p5220_p3), %s469_s14, 4294967040  ;;  %s477_s13 = sand.u32 1, %s4184_s9   ;;  %s481_s15 = scalar_lea.vmem [#allocation6], %s4464_s1 }
  0xd4   : > { %s478_s28 = scalar_lea.sflag [#allocation7], %s477_s13 }
  0xd5   : > { %4041 = dma.done.wait (%p5220_p3), %s478_s28, 2304  }
  0xd6   : > { %4043 = vsyncadd (%p5220_p3), %s478_s28, 4294964992  ;;  %s3118_s26 = sshll.u32 %s4461_s23, 7  ;;  %s496_s16 = scalar_lea.sflag [#allocation10], %s477_s13 }
  0xd7   : > { %s4481_s30 = scalar_lea.vmem [#allocation8], %s3118_s26  ;;  %s4483_s7 = scalar_lea.vmem [#allocation9], %s3118_s26 }
  0xd8   : > { %4045 = dma.done.wait (%p5220_p3), %s496_s16, 2048  }
  0xd9   : > { %4047 = vsyncadd (%p5220_p3), %s496_s16, 4294965248  ;;  %p5221_p9 = scmp.eq.s32.totalorder %s4184_s9, 0 }
  0xdb   : > { %4049 = dma.done.wait (%p5221_p9), [#allocation10], 12288   ;;  %p5222_p6 = pmov %p5221_p9 }
  0xdd   : > { %4051 = vsyncadd (%p5222_p6), [#allocation10], 4294955008  ;;  %p5223_p2 = pmov %p5222_p6 }
  0xdf   : > { %4053 = dma.done.wait (%p5223_p2), [#allocation13], 2048   ;;  %p5224_p8 = pmov %p5223_p2 }
  0xe0   : > { %v3411_v0 = vld [vmem:[#allocation11 + $0x4] ss:$24 sps:$4 sm:$0xff]   ;;  %v3413_v1 = vld [vmem:[#allocation11] ss:$24 sps:$4 sm:$0xff]   ;;  %v3414_v2 = vld [vmem:[#allocation11 + $0x34] ss:$24 sps:$4 sm:$0xff]  }
  0xe1   : > { %4055 = vsyncadd (%p5224_p8), [#allocation13], 4294965248  ;;  %1193 = vmatprep.subr.bf16.mxu0 %v3411_v0  ;;  %v3416_v3 = vld [vmem:[#allocation11 + $0x30] ss:$24 sps:$4 sm:$0xff]   ;;  %v3417_v4 = vld [vmem:[#allocation11 + $0x64] ss:$24 sps:$4 sm:$0xff]  }
  0xe2   : > { %1194 = vmatpush1.bf16.msra.mxu0 %v3413_v1  ;;  %v3419_v5 = vld [vmem:[#allocation11 + $0x60] ss:$24 sps:$4 sm:$0xff]   ;;  %v3420_v6 = vld [vmem:[#allocation11 + $0x94] ss:$24 sps:$4 sm:$0xff]   ;;  %v3422_v7 = vld [vmem:[#allocation11 + $0x90] ss:$24 sps:$4 sm:$0xff]  }
  0xe3   : > { %1195 = vmatprep.subr.bf16.mxu0 %v3414_v2  ;;  %v3423_v8 = vld [vmem:[#allocation11 + $0xc4] ss:$24 sps:$4 sm:$0xff]   ;;  %v3425_v9 = vld [vmem:[#allocation11 + $0xc0] ss:$24 sps:$4 sm:$0xff]   ;;  %v3426_v10 = vld [vmem:[#allocation11 + $0xf4] ss:$24 sps:$4 sm:$0xff]  }
  0xe4   : > { %v3428_v11 = vld [vmem:[#allocation11 + $0xf0] ss:$24 sps:$4 sm:$0xff]   ;;  %v3429_v12 = vld [vmem:[#allocation11 + $0x124] ss:$24 sps:$4 sm:$0xff]   ;;  %v3431_v14 = vld [vmem:[#allocation11 + $0x120] ss:$24 sps:$4 sm:$0xff]  }
  0xe5   : > { %v3459_v13 = vld [vmem:[%s4468_s27 + $0x4] ss:$8 sps:$4 sm:$0xff]   ;;  %v3434_v16 = vld [vmem:[#allocation11 + $0x150] ss:$24 sps:$4 sm:$0xff]   ;;  %v3437_v18 = vld [vmem:[#allocation11 + $0x180] ss:$24 sps:$4 sm:$0xff]  }
  0xe6   : > { %1196 = vmatpush1.bf16.msra.mxu0 %v3416_v3  ;;  %v3432_v15 = vld [vmem:[#allocation11 + $0x154] ss:$24 sps:$4 sm:$0xff]   ;;  %1225 = vmatprep.mubr.bf16.mxu0 %v3459_v13  ;;  %v3435_v17 = vld [vmem:[#allocation11 + $0x184] ss:$24 sps:$4 sm:$0xff]   ;;  %v3440_v20 = vld [vmem:[#allocation11 + $0x1b0] ss:$24 sps:$4 sm:$0xff]  }
  0xe7   : > { %1197 = vmatprep.subr.bf16.mxu0 %v3417_v4  ;;  %1268 = vmatprep.mubr.bf16.mxu1 %v3459_v13  ;;  %v3438_v19 = vld [vmem:[#allocation11 + $0x1b4] ss:$24 sps:$4 sm:$0xff]   ;;  %v3441_v21 = vld [vmem:[#allocation11 + $0x1e4] ss:$24 sps:$4 sm:$0xff]   ;;  %v3443_v22 = vld [vmem:[#allocation11 + $0x1e0] ss:$24 sps:$4 sm:$0xff]  }
  0xe8   : > { %v3444_v23 = vld [vmem:[#allocation11 + $0x214] ss:$24 sps:$4 sm:$0xff]   ;;  %v3446_v24 = vld [vmem:[#allocation11 + $0x210] ss:$24 sps:$4 sm:$0xff]   ;;  %v3447_v25 = vld [vmem:[#allocation11 + $0x244] ss:$24 sps:$4 sm:$0xff]  }
  0xe9   : > { %v3449_v26 = vld [vmem:[#allocation11 + $0x240] ss:$24 sps:$4 sm:$0xff]   ;;  %v3450_v27 = vld [vmem:[#allocation11 + $0x274] ss:$24 sps:$4 sm:$0xff]   ;;  %v3452_v28 = vld [vmem:[#allocation11 + $0x270] ss:$24 sps:$4 sm:$0xff]  }
  0xea   : > { %1198 = vmatpush1.bf16.msra.mxu0 %v3419_v5  ;;  %v3453_v29 = vld [vmem:[#allocation11 + $0x2a4] ss:$24 sps:$4 sm:$0xff]   ;;  %v3455_v30 = vld [vmem:[#allocation11 + $0x2a0] ss:$24 sps:$4 sm:$0xff]   ;;  %v3456_v31 = vld [vmem:[#allocation11 + $0x2d4] ss:$24 sps:$4 sm:$0xff]  }
  0xeb   : > { %1199 = vmatprep.subr.bf16.mxu0 %v3420_v6  ;;  %v3458_v32 = vld [vmem:[#allocation11 + $0x2d0] ss:$24 sps:$4 sm:$0xff]   ;;  %v3464_v33 = vld [vmem:[#allocation11 + $0x14] ss:$24 sps:$4 sm:$0xff]   ;;  %v3467_v36 = vld [vmem:[#allocation11 + $0x44] ss:$24 sps:$4 sm:$0xff]   ;;  %v673_v6 = vlaneseq }
  0xec   : > { %v4499_v34 = vld [vmem:[%s4468_s27] ss:$8 sps:$4 sm:$0xff]   ;;  %v3470_v38 = vld [vmem:[#allocation11 + $0x74] ss:$24 sps:$4 sm:$0xff]   ;;  %v3473_v40 = vld [vmem:[#allocation11 + $0xa4] ss:$24 sps:$4 sm:$0xff]  }
  0xed   : > { %v3462_v35 = vld [vmem:[#allocation11 + $0x10] ss:$24 sps:$4 sm:$0xff]   ;;  %v3465_v37 = vld [vmem:[#allocation11 + $0x40] ss:$24 sps:$4 sm:$0xff]   ;;  %v3476_v42 = vld [vmem:[#allocation11 + $0xd4] ss:$24 sps:$4 sm:$0xff]  }
  0xee   : > { %1200 = vmatpush1.bf16.msra.mxu0 %v3422_v7  ;;  %v3468_v39 = vld [vmem:[#allocation11 + $0x70] ss:$24 sps:$4 sm:$0xff]   ;;  %v3471_v41 = vld [vmem:[#allocation11 + $0xa0] ss:$24 sps:$4 sm:$0xff]   ;;  %v3479_v44 = vld [vmem:[#allocation11 + $0x104] ss:$24 sps:$4 sm:$0xff]  }
  0xef   : > { %1201 = vmatprep.subr.bf16.mxu0 %v3423_v8  ;;  %v3474_v43 = vld [vmem:[#allocation11 + $0xd0] ss:$24 sps:$4 sm:$0xff]   ;;  %v3477_v45 = vld [vmem:[#allocation11 + $0x100] ss:$24 sps:$4 sm:$0xff]   ;;  %v3482_v46 = vld [vmem:[#allocation11 + $0x134] ss:$24 sps:$4 sm:$0xff]  }
  0xf0   : > { %v3480_v47 = vld [vmem:[#allocation11 + $0x130] ss:$24 sps:$4 sm:$0xff]   ;;  %v3485_v48 = vld [vmem:[#allocation11 + $0x164] ss:$24 sps:$4 sm:$0xff]   ;;  %v3483_v49 = vld [vmem:[#allocation11 + $0x160] ss:$24 sps:$4 sm:$0xff]  }
  0xf1   : > { %v3488_v50 = vld [vmem:[#allocation11 + $0x194] ss:$24 sps:$4 sm:$0xff]   ;;  %v3486_v51 = vld [vmem:[#allocation11 + $0x190] ss:$24 sps:$4 sm:$0xff]   ;;  %v3491_v52 = vld [vmem:[#allocation11 + $0x1c4] ss:$24 sps:$4 sm:$0xff]  }
  0xf2   : > { %1202 = vmatpush1.bf16.msra.mxu0 %v3425_v9  ;;  %v3489_v53 = vld [vmem:[#allocation11 + $0x1c0] ss:$24 sps:$4 sm:$0xff]   ;;  %v3494_v54 = vld [vmem:[#allocation11 + $0x1f4] ss:$24 sps:$4 sm:$0xff]   ;;  %v3492_v55 = vld [vmem:[#allocation11 + $0x1f0] ss:$24 sps:$4 sm:$0xff]  }
  0xf3   : > { %1203 = vmatprep.subr.bf16.mxu0 %v3426_v10  ;;  %v3497_v56 = vld [vmem:[#allocation11 + $0x224] ss:$24 sps:$4 sm:$0xff]   ;;  %v3495_v57 = vld [vmem:[#allocation11 + $0x220] ss:$24 sps:$4 sm:$0xff]   ;;  %v3500_v58 = vld [vmem:[#allocation11 + $0x254] ss:$24 sps:$4 sm:$0xff]  }
  0xf4   : > { %v3498_v59 = vld [vmem:[#allocation11 + $0x250] ss:$24 sps:$4 sm:$0xff]   ;;  %v3503_v60 = vld [vmem:[#allocation11 + $0x284] ss:$24 sps:$4 sm:$0xff]   ;;  %v3501_v61 = vld [vmem:[#allocation11 + $0x280] ss:$24 sps:$4 sm:$0xff]  }
  0xf5   : > { %v3506_v62 = vld [vmem:[#allocation11 + $0x2b4] ss:$24 sps:$4 sm:$0xff]   ;;  %v3504_v63 = vld [vmem:[#allocation11 + $0x2b0] ss:$24 sps:$4 sm:$0xff]   ;;  %v3509_v0 = vld [vmem:[#allocation11 + $0x2e4] ss:$24 sps:$4 sm:$0xff]  }
  0xf6   : > { %1204 = vmatpush1.bf16.msra.mxu0 %v3428_v11  ;;  %v3507_v1 = vld [vmem:[#allocation11 + $0x2e0] ss:$24 sps:$4 sm:$0xff]   ;;  %v4511_v7 = vshrl.u32 %v673_v6, 7  ;;  %v4092_v9 = vmov 1966171168   ;;  %s1876_s25 = sld [smem:[#allocation2]] }
  0xf7   : > { %1205 = vmatprep.subr.bf16.mxu0 %v3429_v12  ;;  %v1358_v10 = vunpack.c.l.s4 %v4092_v9  ;;  %v671_v11 = vld [vmem:[%s5158_s5] sm:$0x3f]  ;;  %vm2694_vm0 = vcmask 1041409   ;;  %vm2696_vm1 = vcmask 1042434   ;;  %vm2698_vm2 = vcmask 1043459   ;;  %s5230_s24 = sld [smem:[#allocation35_spill]] }
  0xf8   : > { %v695_v8 = vsub.s32 5, %v4511_v7  ;;  %vm2700_vm3 = vcmask 1044484   ;;  %vm2702_vm4 = vcmask 1045509   ;;  %vm2704_vm5 = vcmask 1046534   ;;  %s3306_s10 = sshll.u32 %s4184_s9, 8  ;;  %s565_s14 = scalar_lea.vmem [#allocation15], %s4464_s1 }
  0xf9   : > { %vm2706_vm6 = vcmask 1047559   ;;  %s5233_s13 = sld [smem:[#allocation28_spill]]  ;;  %s2876_s1 = scalar_lea.sflag [#allocation16], %s4461_s23 }
  0xfa   : > { %1206 = vmatpush1.bf16.msra.mxu0 %v3431_v14  ;;  %v1359_v14 = vunpack.c.0.s8 %v1358_v10 }
  0xfb   : > { %1207 = vmatprep.subr.bf16.mxu0 %v3432_v15 }
  0xfe   : > { %1208 = vmatpush1.bf16.msra.mxu0 %v3434_v16 }
  0xff   : > { %1209 = vmatprep.subr.bf16.mxu0 %v3435_v17  ;;  %p5235_p1 = scmp.ne.s32.totalorder %s5233_s13, 0 }
 0x102   : > { %1210 = vmatpush1.bf16.msra.mxu0 %v3437_v18 }
 0x103   : > { %1211 = vmatprep.subr.bf16.mxu0 %v3438_v19 }
 0x106   : > { %1212 = vmatpush1.bf16.msra.mxu0 %v3440_v20  ;;  %v1362_v20 = vsub.s32 %v1359_v14, %v4511_v7 }
 0x107   : > { %1213 = vmatprep.subr.bf16.mxu0 %v3441_v21 }
 0x10a   : > { %1214 = vmatpush1.bf16.msra.mxu0 %v3443_v22 }
 0x10b   : > { %1215 = vmatprep.subr.bf16.mxu0 %v3444_v23 }
 0x10e   : > { %1216 = vmatpush1.bf16.msra.mxu0 %v3446_v24 }
 0x10f   : > { %1217 = vmatprep.subr.bf16.mxu0 %v3447_v25 }
 0x112   : > { %1218 = vmatpush1.bf16.msra.mxu0 %v3449_v26 }
 0x113   : > { %1219 = vmatprep.subr.bf16.mxu0 %v3450_v27 }
 0x116   : > { %1220 = vmatpush1.bf16.msra.mxu0 %v3452_v28 }
 0x117   : > { %1221 = vmatprep.subr.bf16.mxu0 %v3453_v29 }
 0x11a   : > { %1222 = vmatpush1.bf16.msra.mxu0 %v3455_v30 }
 0x11b   : > { %1223 = vmatprep.subr.bf16.mxu0 %v3456_v31 }
 0x11e   : > { %1224 = vmatpush1.bf16.msra.mxu0 %v3458_v32 }
 0x11f   : > { %1279 = vmatprep.subr.bf16.mxu0 %v3464_v33 }
 0x121   : > { %1226 = vmatmul.mubr.bf16.vlgmr.msra.gmra.mrb[0].mxu0 %v4499_v34 }
 0x122   : > { %1280 = vmatpush1.bf16.msra.mxu0 %v3462_v35  ;;  %1311 = vmatprep.mubr.bf16.mxu0 %v3459_v13  ;;  %v696_v13 = vrot.slane %v671_v11, %v695_v8  ;;  %v1325_v11 = vld [vmem:[%s4483_s7 + $0xc] sm:$0xf] }
 0x123   : > { %1281 = vmatprep.subr.bf16.mxu0 %v3467_v36 }
 0x126   : > { %1282 = vmatpush1.bf16.msra.mxu0 %v3465_v37  ;;  %v4529_v37 = vsub.s32 0, %v4511_v7 }
 0x127   : > { %1283 = vmatprep.subr.bf16.mxu0 %v3470_v38 }
 0x12a   : > { %1284 = vmatpush1.bf16.msra.mxu0 %v3468_v39 }
 0x12b   : > { %1285 = vmatprep.subr.bf16.mxu0 %v3473_v40 }
 0x12e   : > { %1286 = vmatpush1.bf16.msra.mxu0 %v3471_v41 }
 0x12f   : > { %1287 = vmatprep.subr.bf16.mxu0 %v3476_v42 }
 0x132   : > { %1288 = vmatpush1.bf16.msra.mxu0 %v3474_v43 }
 0x133   : > { %1289 = vmatprep.subr.bf16.mxu0 %v3479_v44 }
 0x136   : > { %1290 = vmatpush1.bf16.msra.mxu0 %v3477_v45 }
 0x137   : > { %1291 = vmatprep.subr.bf16.mxu0 %v3482_v46 }
 0x13a   : > { %1292 = vmatpush1.bf16.msra.mxu0 %v3480_v47 }
 0x13b   : > { %1293 = vmatprep.subr.bf16.mxu0 %v3485_v48 }
 0x13e   : > { %1294 = vmatpush1.bf16.msra.mxu0 %v3483_v49 }
 0x13f   : > { %1295 = vmatprep.subr.bf16.mxu0 %v3488_v50 }
 0x142   : > { %1296 = vmatpush1.bf16.msra.mxu0 %v3486_v51 }
 0x143   : > { %1297 = vmatprep.subr.bf16.mxu0 %v3491_v52 }
 0x146   : > { %1298 = vmatpush1.bf16.msra.mxu0 %v3489_v53 }
 0x147   : > { %1299 = vmatprep.subr.bf16.mxu0 %v3494_v54 }
 0x14a   : > { %1300 = vmatpush1.bf16.msra.mxu0 %v3492_v55  ;;  %v1339_v55 = vld [vmem:[%s4483_s7 + $0x44] sm:$0xf] }
 0x14b   : > { %1301 = vmatprep.subr.bf16.mxu0 %v3497_v56  ;;  %v1322_v56 = vld [vmem:[%s4483_s7] sm:$0xf] }
 0x14e   : > { %1302 = vmatpush1.bf16.msra.mxu0 %v3495_v57  ;;  %v1323_v57 = vld [vmem:[%s4483_s7 + $0x4] sm:$0xf] }
 0x14f   : > { %1303 = vmatprep.subr.bf16.mxu0 %v3500_v58 }
 0x152   : > { %1304 = vmatpush1.bf16.msra.mxu0 %v3498_v59 }
 0x153   : > { %1305 = vmatprep.subr.bf16.mxu0 %v3503_v60 }
 0x156   : > { %1306 = vmatpush1.bf16.msra.mxu0 %v3501_v61 }
 0x157   : > { %1307 = vmatprep.subr.bf16.mxu0 %v3506_v62  ;;  %v1324_v62 = vld [vmem:[%s4483_s7 + $0x8] sm:$0xf] }
 0x15a   : > { %1308 = vmatpush1.bf16.msra.mxu0 %v3504_v63 }
 0x15b   : > { %1309 = vmatprep.subr.bf16.mxu0 %v3509_v0 }
 0x15e   : > { %1310 = vmatpush1.bf16.msra.mxu0 %v3507_v1  ;;  %v1338_v1 = vld [vmem:[%s4483_s7 + $0x40] sm:$0xf] }
 0x161   : > { %1312 = vmatmul.mubr.bf16.vlgmr.msra.gmra.mrb[4].mxu0 %v4499_v34 }
 0x1f4   : > { %v4503_v2 = vpop.f32.mrb[0].mxu0 }
 0x1f5   : > { %v4505_v3 = vpop.f32.mrb[1].mxu0 }
 0x1f6   : > { %v4507_v4 = vpop.f32.mrb[2].mxu0 }
 0x1f7   : > { %5225 = vst [vmem:[#allocation30_spill] sm:$0xff] %v4507_v4  ;;  %v4509_v5 = vpop.f32.mrb[3].mxu0 }
 0x234   : > { %v4517_v12 = vpop.f32.mrb[4].mxu0 }
 0x235   : > { %5226 = vst [vmem:[#allocation31_spill] sm:$0xff] %v4517_v12  ;;  %v1315_v15 = vpop.f32.mrb[5].mxu0 }
 0x236   : > { %v4519_v16 = vpop.f32.mrb[6].mxu0  ;;  %v1316_v18 = vadd.f32 %v1315_v15, %v696_v13 }
 0x237   : > { %5227 = vst [vmem:[#allocation32_spill] sm:$0xff] %v4519_v16  ;;  %v1319_v17 = vpop.f32.mrb[7].mxu0 }
 0x238   : > { %v1320_v19 = vadd.f32 %v1319_v17, %v696_v13 }
 0x23a   : > { %v1354_v21 = vpack.c.bf16 %v1320_v19, %v1316_v18  ;;  %v3222_v22 = vpack.c.bf16 %v1320_v19, %v1320_v19 }
 0x23c   : > { %v1363_v23 = vrot.slane %v1354_v21, %v1362_v20  ;;  %v1370_v24 = vrot.slane %v3222_v22, %v1362_v20  ;;  %v1341_v22 = vld [vmem:[%s4483_s7 + $0x4c] sm:$0xf] }
 0x23e   : > { %v1371_v25 = vcombine.high %v1363_v23, %v1363_v23  ;;  %v1379_v26 = vrot.slane %v1363_v23, %v1362_v20  ;;  %v1386_v27 = vrot.slane %v1370_v24, %v1362_v20  ;;  %v1372_v28 = vcombine.high %v1370_v24, %v1370_v24  ;;  %v1340_v23 = vld [vmem:[%s4483_s7 + $0x48] sm:$0xf] }
 0x240   : > { %v4522_v29 = vrot.slane %v1371_v25, %v1362_v20  ;;  %v1406_v30 = vunpack.i.h.s16 %v1379_v26  ;;  %v1414_v31 = vunpack.i.h.s16 %v1386_v27  ;;  %v3223_v32 = vpack.i.b16 %v1379_v26, %v1379_v26 }
 0x241   : > { %v3227_v33 = vpack.i.b16 %v1386_v27, %v1386_v27  ;;  %v4524_v34 = vrot.slane %v1372_v28, %v1362_v20  ;;  %v4535_v43 = vcombine.high %v1379_v26, %v1379_v26  ;;  %v4540_v50 = vcombine.high %v1386_v27, %v1386_v27 }
 0x242   : > { %v1422_v35 = vpack.i.b16 %v1406_v30, %v1406_v30  ;;  %v3224_v36 = vpack.i.b16 %v4522_v29, %v4522_v29  ;;  %v1430_v38 = vpack.i.b16 %v1414_v31, %v1414_v31  ;;  %v1440_v40 = vrot.slane %v3223_v32, %v4529_v37 }
 0x243   : > { %v1472_v39 = vrot.slane %v3227_v33, %v4529_v37  ;;  %v3228_v44 = vpack.i.b16 %v4524_v34, %v4524_v34  ;;  %v3225_v54 = vpack.i.b16 %v4535_v43, %v4535_v43  ;;  %v3229_v6 = vpack.i.b16 %v4540_v50, %v4540_v50  ;;  %v1327_v33 = vld [vmem:[%s4483_s7 + $0x14] sm:$0xf] }
 0x244   : > { %v1444_v41 = vrot.slane %v1422_v35, %v4529_v37  ;;  %v1476_v42 = vrot.slane %v1430_v38, %v4529_v37  ;;  %v1448_v45 = vrot.slane %v3224_v36, %v4529_v37  ;;  %v1502_v47 = vpack.i.b16 %v1440_v40, %v1440_v40  ;;  %v1326_v35 = vld [vmem:[%s4483_s7 + $0x10] sm:$0xf] }
 0x245   : > { %v1558_v46 = vpack.i.b16 %v1472_v39, %v1472_v39  ;;  %v1480_v59 = vrot.slane %v3228_v44, %v4529_v37  ;;  %v1408_v13 = vunpack.i.h.s16 %v4522_v29  ;;  %v1456_v17 = vrot.slane %v3225_v54, %v4529_v37  ;;  %v1343_v44 = vld [vmem:[%s4483_s7 + $0x54] sm:$0xf] }
 0x246   : > { %v1509_v48 = vpack.i.b16 %v1444_v41, %v1444_v41  ;;  %v1565_v49 = vpack.i.b16 %v1476_v42, %v1476_v42  ;;  %v1507_v52 = vrot.slane %v1502_v47, %v4529_v37  ;;  %v1516_v58 = vpack.i.b16 %v1448_v45, %v1448_v45 }
 0x247   : > { %v1563_v51 = vrot.slane %v1558_v46, %v4529_v37  ;;  %v1572_v15 = vpack.i.b16 %v1480_v59, %v1480_v59  ;;  %v1488_v24 = vrot.slane %v3229_v6, %v4529_v37  ;;  %v1416_v25 = vunpack.i.h.s16 %v4524_v34  ;;  %v1330_v6 = vld [vmem:[%s4483_s7 + $0x20] sm:$0xf] }
 0x248   : > { %v1514_v53 = vrot.slane %v1509_v48, %v4529_v37  ;;  %v3231_v61 = vcombine.low %v1507_v52, %v1507_v52  ;;  %v1570_v0 = vrot.slane %v1565_v49, %v4529_v37  ;;  %v1521_v20 = vrot.slane %v1516_v58, %v4529_v37  ;;  %v1342_v48 = vld [vmem:[%s4483_s7 + $0x50] sm:$0xf] }
 0x249   : > { %v3239_v60 = vcombine.low %v1563_v51, %v1563_v51  ;;  %v1577_v26 = vrot.slane %v1572_v15, %v4529_v37  ;;  %v1530_v27 = vpack.i.b16 %v1456_v17, %v1456_v17  ;;  %v1424_v28 = vpack.i.b16 %v1408_v13, %v1408_v13 }
 0x24a   : > { %v3232_v63 = vcombine.low %v1514_v53, %v1514_v53  ;;  %v1677_v9 = vadd.bf16 %v3231_v61, %v1322_v56  ;;  %v1678_v10 = vadd.bf16 %v3231_v61, %v1323_v57  ;;  %v3240_v19 = vcombine.low %v1570_v0, %v1570_v0  ;;  %v1331_v61 = vld [vmem:[%s4483_s7 + $0x24] sm:$0xf] }
 0x24b   : > { %v1694_v8 = vadd.bf16 %v3239_v60, %v1339_v55  ;;  %v1693_v18 = vadd.bf16 %v3239_v60, %v1338_v1  ;;  %v3233_v31 = vcombine.low %v1521_v20, %v1521_v20  ;;  %v1586_v36 = vpack.i.b16 %v1488_v24, %v1488_v24  ;;  %v1347_v20 = vld [vmem:[%s4483_s7 + $0x64] sm:$0xf]  ;;  %v1346_v24 = vld [vmem:[%s4483_s7 + $0x60] sm:$0xf] }
 0x24c   : > { %v1679_v14 = vadd.bf16 %v3232_v63, %v1324_v62  ;;  %v1680_v21 = vadd.bf16 %v3232_v63, %v1325_v11  ;;  %v1696_v30 = vadd.bf16 %v3240_v19, %v1341_v22  ;;  %v1695_v32 = vadd.bf16 %v3240_v19, %v1340_v23 }
 0x24d   : > { %3598 = vtanh.bf16 %v1694_v8  ;;  %v1410_v38 = vunpack.i.h.s16 %v4535_v43  ;;  %v3241_v39 = vcombine.low %v1577_v26, %v1577_v26  ;;  %v1535_v40 = vrot.slane %v1530_v27, %v4529_v37  ;;  %v4577_v43 = vld [vmem:[%s5161_s8] ss:$0 sm:$0xff] }
 0x24e   : > { %3600 = vtanh.bf16 %v1677_v9  ;;  %v1432_v41 = vpack.i.b16 %v1416_v25, %v1416_v25  ;;  %v1682_v42 = vadd.bf16 %v3233_v31, %v1327_v33  ;;  %v1452_v45 = vrot.slane %v1424_v28, %v4529_v37 }
 0x24f   : > { %3602 = vtanh.bf16 %v1678_v10  ;;  %v1681_v46 = vadd.bf16 %v3233_v31, %v1326_v35  ;;  %v1418_v47 = vunpack.i.h.s16 %v4540_v50  ;;  %v1591_v49 = vrot.slane %v1586_v36, %v4529_v37 }
 0x250   : > { %3604 = vtanh.bf16 %v1679_v14  ;;  %v1426_v52 = vpack.i.b16 %v1410_v38, %v1410_v38  ;;  %v1698_v53 = vadd.bf16 %v3241_v39, %v1343_v44  ;;  %v3235_v54 = vcombine.low %v1535_v40, %v1535_v40  ;;  %v1329_v38 = vld [vmem:[%s4483_s7 + $0x1c] sm:$0xf] }
 0x251   : > { %3606 = vtanh.bf16 %v1693_v18  ;;  %v1523_v57 = vpack.i.b16 %v1452_v45, %v1452_v45  ;;  %v1484_v50 = vrot.slane %v1432_v41, %v4529_v37  ;;  %v1697_v60 = vadd.bf16 %v3241_v39, %v1342_v48  ;;  %v1328_v41 = vld [vmem:[%s4483_s7 + $0x18] sm:$0xf] }
 0x252   : > { %3608 = vtanh.bf16 %v1680_v21  ;;  %v4583_v63 = vcombine.high %v4522_v29, %v4522_v29  ;;  %v1434_v0 = vpack.i.b16 %v1418_v47, %v1418_v47  ;;  %v3243_v8 = vcombine.low %v1591_v49, %v1591_v49 }
 0x253   : > { %3610 = vtanh.bf16 %v1696_v30  ;;  %v1460_v14 = vrot.slane %v1426_v52, %v4529_v37  ;;  %v1686_v17 = vadd.bf16 %v3235_v54, %v1331_v61  ;;  %v1528_v29 = vrot.slane %v1523_v57, %v4529_v37 }
 0x254   : > { %3612 = vtanh.bf16 %v1695_v32  ;;  %v1579_v18 = vpack.i.b16 %v1484_v50, %v1484_v50  ;;  %v1685_v19 = vadd.bf16 %v3235_v54, %v1330_v6  ;;  %v4593_v21 = vcombine.high %v4524_v34, %v4524_v34 }
 0x255   : > { %3614 = vtanh.bf16 %v1682_v42  ;;  %v1492_v25 = vrot.slane %v1434_v0, %v4529_v37  ;;  %v1537_v30 = vpack.i.b16 %v1460_v14, %v1460_v14  ;;  %v3226_v31 = vpack.i.b16 %v4583_v63, %v4583_v63 }
 0x256   : > { %3616 = vtanh.bf16 %v1681_v46  ;;  %v1702_v34 = vadd.bf16 %v3243_v8, %v1347_v20  ;;  %v3234_v33 = vcombine.low %v1528_v29, %v1528_v29  ;;  %v1584_v35 = vrot.slane %v1579_v18, %v4529_v37 }
 0x257   : > { %3618 = vtanh.bf16 %v1698_v53  ;;  %v1701_v36 = vadd.bf16 %v3243_v8, %v1346_v24  ;;  %v1593_v42 = vpack.i.b16 %v1492_v25, %v1492_v25  ;;  %v3230_v44 = vpack.i.b16 %v4593_v21, %v4593_v21  ;;  %v1349_v25 = vld [vmem:[%s4483_s7 + $0x6c] sm:$0xf] }
 0x258   : > { %v3599_v51 = vpop.eup %3598  ;;  %3620 = vtanh.bf16 %v1697_v60  ;;  %v1542_v48 = vrot.slane %v1537_v30, %v4529_v37  ;;  %v1464_v49 = vrot.slane %v3226_v31, %v4529_v37  ;;  %v1684_v52 = vadd.bf16 %v3234_v33, %v1329_v38 }
 0x259   : > { %v3601_v55 = vpop.eup %3600  ;;  %v1758_v56 = vunpack.c.l.bf16 %v3599_v51  ;;  %3622 = vtanh.bf16 %v1686_v17  ;;  %v3242_v53 = vcombine.low %v1584_v35, %v1584_v35  ;;  %v1412_v54 = vunpack.i.h.s16 %v4583_v63  ;;  %v1332_v17 = vld [vmem:[%s4483_s7 + $0x28] sm:$0xf] }
 0x25a   : > { %v3603_v58 = vpop.eup %3602  ;;  %v1741_v59 = vunpack.c.l.bf16 %v3601_v55  ;;  %3624 = vtanh.bf16 %v1685_v19  ;;  %v1683_v55 = vadd.bf16 %v3234_v33, %v1328_v41  ;;  %v1496_v60 = vrot.slane %v3230_v44, %v4529_v37 }
 0x25b   : > { %v3605_v62 = vpop.eup %3604  ;;  %v1797_v1 = vmul.f32 %v4577_v43, %v1758_v56  ;;  %v1742_v11 = vunpack.c.l.bf16 %v3603_v58  ;;  %3626 = vtanh.bf16 %v1702_v34  ;;  %v1345_v56 = vld [vmem:[%s4483_s7 + $0x5c] sm:$0xf]  ;;  %v1344_v58 = vld [vmem:[%s4483_s7 + $0x58] sm:$0xf]  ;;  %v1544_v63 = vpack.i.b16 %v1464_v49, %v1464_v49 }
 0x25c   : > { %v3607_v9 = vpop.eup %3606  ;;  %v1780_v10 = vmul.f32 %v4577_v43, %v1741_v59  ;;  %v1743_v13 = vunpack.c.l.bf16 %v3605_v62  ;;  %3628 = vtanh.bf16 %v1701_v36  ;;  %v1598_v59 = vrot.slane %v1593_v42, %v4529_v37 }
 0x25d   : > { %v3609_v15 = vpop.eup %3608  ;;  %1846 = vadd.xlane.f32.xlu1 %v1797_v1  ;;  %v1781_v27 = vmul.f32 %v4577_v43, %v1742_v11  ;;  %v1757_v28 = vunpack.c.l.bf16 %v3607_v9  ;;  %v3236_v1 = vcombine.low %v1542_v48, %v1542_v48  ;;  %3630 = vtanh.bf16 %v1684_v52  ;;  %v1334_v48 = vld [vmem:[%s4483_s7 + $0x30] sm:$0xf] }
 0x25e   : > { %1812 = vadd.xlane.f32.xlu0 %v1780_v10  ;;  %v1782_v22 = vmul.f32 %v4577_v43, %v1743_v13  ;;  %v1744_v23 = vunpack.c.l.bf16 %v3609_v15  ;;  %v3611_v26 = vpop.eup %3610  ;;  %v1700_v8 = vadd.bf16 %v3242_v53, %v1345_v56  ;;  %v1428_v9 = vpack.i.b16 %v1412_v54, %v1412_v54  ;;  %v1333_v13 = vld [vmem:[%s4483_s7 + $0x2c] sm:$0xf] }
 0x25f   : > { %v3613_v32 = vpop.eup %3612  ;;  %v1760_v40 = vunpack.c.l.bf16 %v3611_v26  ;;  %v1796_v46 = vmul.f32 %v4577_v43, %v1757_v28  ;;  %v1420_v10 = vunpack.i.h.s16 %v4593_v21  ;;  %3632 = vtanh.bf16 %v1683_v55 }
 0x260   : > { %v1783_v39 = vmul.f32 %v4577_v43, %v1744_v23  ;;  %v3615_v45 = vpop.eup %3614  ;;  %v1759_v47 = vunpack.c.l.bf16 %v3613_v32  ;;  %v1699_v11 = vadd.bf16 %v3242_v53, %v1344_v58  ;;  %v1600_v29 = vpack.i.b16 %v1496_v60, %v1496_v60  ;;  %v1348_v32 = vld [vmem:[%s4483_s7 + $0x68] sm:$0xf]  ;;  %v1351_v58 = vld [vmem:[%s4483_s7 + $0x74] sm:$0xf] }
 0x261   : > { %1816 = vadd.xlane.f32.xlu1 %v1782_v22  ;;  %v3617_v51 = vpop.eup %3616  ;;  %v1799_v57 = vmul.f32 %v4577_v43, %v1760_v40  ;;  %v1746_v50 = vunpack.c.l.bf16 %v3615_v45  ;;  %v3244_v22 = vcombine.low %v1598_v59, %v1598_v59  ;;  %v1549_v23 = vrot.slane %v1544_v63, %v4529_v37  ;;  %v1335_v40 = vld [vmem:[%s4483_s7 + $0x34] sm:$0xf] }
 0x262   : > { %1814 = vadd.xlane.f32.xlu0 %v1781_v27  ;;  %v3619_v61 = vpop.eup %3618  ;;  %v1798_v62 = vmul.f32 %v4577_v43, %v1759_v47  ;;  %v1745_v0 = vunpack.c.l.bf16 %v3617_v51  ;;  %3634 = vtanh.bf16 %v1700_v8  ;;  %v1688_v21 = vadd.bf16 %v3236_v1, %v1333_v13 }
 0x263   : > { %v3621_v6 = vpop.eup %3620  ;;  %v1785_v14 = vmul.f32 %v4577_v43, %v1746_v50  ;;  %v1762_v15 = vunpack.c.l.bf16 %v3619_v61  ;;  %v1468_v26 = vrot.slane %v1428_v9, %v4529_v37  ;;  %v1436_v27 = vpack.i.b16 %v1420_v10, %v1420_v10  ;;  %v1350_v61 = vld [vmem:[%s4483_s7 + $0x70] sm:$0xf] }
 0x264   : > { %v3623_v18 = vpop.eup %3622  ;;  %v1784_v19 = vmul.f32 %v4577_v43, %v1745_v0  ;;  %v1761_v20 = vunpack.c.l.bf16 %v3621_v6  ;;  %3636 = vtanh.bf16 %v1699_v11  ;;  %v1687_v28 = vadd.bf16 %v3236_v1, %v1332_v17  ;;  %v1337_v11 = vld [vmem:[%s4483_s7 + $0x3c] sm:$0xf] }
 0x265   : > { %1818 = vadd.xlane.f32.xlu1 %v1783_v39  ;;  %v3625_v24 = vpop.eup %3624  ;;  %v1801_v30 = vmul.f32 %v4577_v43, %v1762_v15  ;;  %v1750_v31 = vunpack.c.l.bf16 %v3623_v18  ;;  %v1704_v36 = vadd.bf16 %v3244_v22, %v1349_v25  ;;  %v3237_v38 = vcombine.low %v1549_v23, %v1549_v23  ;;  %v1336_v15 = vld [vmem:[%s4483_s7 + $0x38] sm:$0xf] }
 0x266   : > { %1844 = vadd.xlane.f32.xlu0 %v1796_v46  ;;  %v3627_v34 = vpop.eup %3626  ;;  %v1800_v33 = vmul.f32 %v4577_v43, %v1761_v20  ;;  %v1749_v35 = vunpack.c.l.bf16 %v3625_v24  ;;  %3638 = vtanh.bf16 %v1688_v21  ;;  %v1605_v41 = vrot.slane %v1600_v29, %v4529_v37  ;;  %v1353_v24 = vld [vmem:[%s4483_s7 + $0x7c] sm:$0xf] }
 0x267   : > { %v3629_v39 = vpop.eup %3628  ;;  %v1551_v42 = vpack.i.b16 %v1468_v26, %v1468_v26  ;;  %v1500_v44 = vrot.slane %v1436_v27, %v4529_v37  ;;  %3640 = vtanh.bf16 %v1687_v28  ;;  %v1703_v45 = vadd.bf16 %v3244_v22, %v1348_v32  ;;  %v1352_v26 = vld [vmem:[%s4483_s7 + $0x78] sm:$0xf]  ;;  %s4094_s7 = smov [#allocation15]  }
 0x268   : > { %v1789_v46 = vmul.f32 %v4577_v43, %v1750_v31  ;;  %v1766_v47 = vunpack.c.l.bf16 %v3627_v34  ;;  %v3631_v49 = vpop.eup %3630  ;;  %v1788_v51 = vmul.f32 %v4577_v43, %v1749_v35  ;;  %v1765_v52 = vunpack.c.l.bf16 %v3629_v39  ;;  %s3968_s29 = sshll.u32 %s4094_s7, 4  ;;  %s3969_s29 = int_to_ptr.vmem [resolvable:$false] %s3968_s29 }
 0x269   : > { %1850 = vadd.xlane.f32.xlu1 %v1799_v57  ;;  %v1690_v53 = vadd.bf16 %v3237_v38, %v1335_v40  ;;  %3642 = vtanh.bf16 %v1704_v36  ;;  %v3245_v55 = vcombine.low %v1605_v41, %v1605_v41  ;;  %v1556_v56 = vrot.slane %v1551_v42, %v4529_v37  ;;  %s3970_s11 = scalar_lea.vmem %s3969_s29, 512 }
 0x26a   : > { %1848 = vadd.xlane.f32.xlu0 %v1798_v62  ;;  %v3633_v54 = vpop.eup %3632  ;;  %v1607_v57 = vpack.i.b16 %v1500_v44, %v1500_v44  ;;  %3644 = vtanh.bf16 %v1703_v45  ;;  %v1689_v50 = vadd.bf16 %v3237_v38, %v1334_v48  ;;  %v1805_v59 = vmul.f32 %v4577_v43, %v1766_v47 }
 0x26b   : > { %v1748_v60 = vunpack.c.l.bf16 %v3631_v49  ;;  %v1804_v0 = vmul.f32 %v4577_v43, %v1765_v52  ;;  %v1747_v1 = vunpack.c.l.bf16 %v3633_v54  ;;  %3646 = vtanh.bf16 %v1690_v53 }
 0x26c   : > { %v1706_v6 = vadd.bf16 %v3245_v55, %v1351_v58  ;;  %v3238_v8 = vcombine.low %v1556_v56, %v1556_v56  ;;  %v1612_v9 = vrot.slane %v1607_v57, %v4529_v37  ;;  %3648 = vtanh.bf16 %v1689_v50 }
 0x26d   : > { %1822 = vadd.xlane.f32.xlu1 %v1785_v14  ;;  %v3635_v62 = vpop.eup %3634  ;;  %v1705_v10 = vadd.bf16 %v3245_v55, %v1350_v61  ;;  %v1787_v13 = vmul.f32 %v4577_v43, %v1748_v60  ;;  %v1786_v29 = vmul.f32 %v4577_v43, %v1747_v1 }
 0x26e   : > { %1820 = vadd.xlane.f32.xlu0 %v1784_v19  ;;  %v1764_v14 = vunpack.c.l.bf16 %v3635_v62  ;;  %3650 = vtanh.bf16 %v1706_v6  ;;  %v1692_v20 = vadd.bf16 %v3238_v8, %v1337_v11  ;;  %v3246_v22 = vcombine.low %v1612_v9, %v1612_v9  ;;  %v3522_v6 = vld [vmem:[#allocation11 + $0xc] ss:$24 sps:$4 sm:$0xff]   ;;  %v3526_v9 = vld [vmem:[#allocation11 + $0x3c] ss:$24 sps:$4 sm:$0xff]  }
 0x26f   : > { %v3637_v63 = vpop.eup %3636  ;;  %3652 = vtanh.bf16 %v1705_v10  ;;  %v1691_v23 = vadd.bf16 %v3238_v8, %v1336_v15  ;;  %1236 = vmatprep.subr.bf16.mxu1 %v3522_v6  ;;  %v3525_v8 = vld [vmem:[#allocation11 + $0x8] ss:$24 sps:$4 sm:$0xff]   ;;  %v3529_v10 = vld [vmem:[#allocation11 + $0x38] ss:$24 sps:$4 sm:$0xff]   ;;  %v3530_v11 = vld [vmem:[#allocation11 + $0x6c] ss:$24 sps:$4 sm:$0xff]  }
 0x270   : > { %v1763_v18 = vunpack.c.l.bf16 %v3637_v63  ;;  %v1803_v21 = vmul.f32 %v4577_v43, %v1764_v14  ;;  %3654 = vtanh.bf16 %v1692_v20  ;;  %v1708_v32 = vadd.bf16 %v3246_v22, %v1353_v24  ;;  %1237 = vmatpush1.bf16.msra.mxu1 %v3525_v8  ;;  %v3534_v14 = vld [vmem:[#allocation11 + $0x9c] ss:$24 sps:$4 sm:$0xff]   ;;  %v3537_v15 = vld [vmem:[#allocation11 + $0x98] ss:$24 sps:$4 sm:$0xff]   ;;  %v3546_v20 = vld [vmem:[#allocation11 + $0x128] ss:$24 sps:$4 sm:$0xff]  }
 0x271   : > { %1854 = vadd.xlane.f32.xlu1 %v1801_v30  ;;  %v3639_v17 = vpop.eup %3638  ;;  %3656 = vtanh.bf16 %v1691_v23  ;;  %v1707_v34 = vadd.bf16 %v3246_v22, %v1352_v26  ;;  %1238 = vmatprep.subr.bf16.mxu1 %v3526_v9  ;;  %v3547_v22 = vld [vmem:[#allocation11 + $0x15c] ss:$24 sps:$4 sm:$0xff]   ;;  %v3549_v23 = vld [vmem:[#allocation11 + $0x158] ss:$24 sps:$4 sm:$0xff]   ;;  %v3552_v26 = vld [vmem:[#allocation11 + $0x188] ss:$24 sps:$4 sm:$0xff]  }
 0x272   : > { %1852 = vadd.xlane.f32.xlu0 %v1800_v33  ;;  %v3641_v19 = vpop.eup %3640  ;;  %v1752_v25 = vunpack.c.l.bf16 %v3639_v17  ;;  %v1802_v28 = vmul.f32 %v4577_v43, %v1763_v18  ;;  %3658 = vtanh.bf16 %v1708_v32  ;;  %v3538_v17 = vld [vmem:[#allocation11 + $0xcc] ss:$24 sps:$4 sm:$0xff]   ;;  %v3543_v18 = vld [vmem:[#allocation11 + $0xf8] ss:$24 sps:$4 sm:$0xff]  }
 0x273   : > { %v1751_v30 = vunpack.c.l.bf16 %v3641_v19  ;;  %3660 = vtanh.bf16 %v1707_v34  ;;  %v3544_v19 = vld [vmem:[#allocation11 + $0x12c] ss:$24 sps:$4 sm:$0xff]  }
 0x274   : > { %v3643_v27 = vpop.eup %3642  ;;  %v1791_v33 = vmul.f32 %v4577_v43, %v1752_v25  ;;  %1239 = vmatpush1.bf16.msra.mxu1 %v3529_v10  ;;  %v3550_v25 = vld [vmem:[#allocation11 + $0x18c] ss:$24 sps:$4 sm:$0xff]  }
 0x275   : > { %1830 = vadd.xlane.f32.xlu1 %v1789_v46  ;;  %v3645_v31 = vpop.eup %3644  ;;  %v1768_v35 = vunpack.c.l.bf16 %v3643_v27  ;;  %v1790_v38 = vmul.f32 %v4577_v43, %v1751_v30  ;;  %1240 = vmatprep.subr.bf16.mxu1 %v3530_v11  ;;  %v4660_v27 = vstv %s1876_s25  ;;  %v3562_v8 = vld [vmem:[#allocation11 + $0x24c] ss:$24 sps:$4 sm:$0xff]  }
 0x276   : > { %1828 = vadd.xlane.f32.xlu0 %v1788_v51  ;;  %v3647_v36 = vpop.eup %3646  ;;  %v1767_v39 = vunpack.c.l.bf16 %v3645_v31  ;;  %v3553_v31 = vld [vmem:[#allocation11 + $0x1bc] ss:$24 sps:$4 sm:$0xff]  }
 0x277   : > { %v3649_v40 = vpop.eup %3648  ;;  %v1807_v41 = vmul.f32 %v4577_v43, %v1768_v35  ;;  %v1754_v42 = vunpack.c.l.bf16 %v3647_v36 }
 0x278   : > { %v1806_v45 = vmul.f32 %v4577_v43, %v1767_v39  ;;  %v1753_v46 = vunpack.c.l.bf16 %v3649_v40 }
 0x279   : > { %1862 = vadd.xlane.f32.xlu1 %v1805_v59  ;;  %v3651_v44 = vpop.eup %3650  ;;  %v1793_v48 = vmul.f32 %v4577_v43, %v1754_v42 }
 0x27a   : > { %1860 = vadd.xlane.f32.xlu0 %v1804_v0  ;;  %v3653_v47 = vpop.eup %3652  ;;  %v1770_v49 = vunpack.c.l.bf16 %v3651_v44  ;;  %v1792_v52 = vmul.f32 %v4577_v43, %v1753_v46  ;;  %v3558_v46 = vld [vmem:[#allocation11 + $0x1e8] ss:$24 sps:$4 sm:$0xff]  }
 0x27b   : > { %v3655_v51 = vpop.eup %3654  ;;  %v1769_v53 = vunpack.c.l.bf16 %v3653_v47 }
 0x27c   : > { %v3657_v54 = vpop.eup %3656  ;;  %v1809_v55 = vmul.f32 %v4577_v43, %v1770_v49  ;;  %v1756_v56 = vunpack.c.l.bf16 %v3655_v51 }
 0x27d   : > { %1826 = vadd.xlane.f32.xlu1 %v1787_v13  ;;  %v3659_v57 = vpop.eup %3658  ;;  %v1808_v50 = vmul.f32 %v4577_v43, %v1769_v53  ;;  %v1755_v58 = vunpack.c.l.bf16 %v3657_v54  ;;  %v3533_v13 = vld [vmem:[#allocation11 + $0x68] ss:$24 sps:$4 sm:$0xff]  }
 0x27e   : > { %1824 = vadd.xlane.f32.xlu0 %v1786_v29  ;;  %v3661_v59 = vpop.eup %3660  ;;  %v1795_v60 = vmul.f32 %v4577_v43, %v1756_v56  ;;  %v1772_v61 = vunpack.c.l.bf16 %v3659_v57  ;;  %1241 = vmatpush1.bf16.msra.mxu1 %v3533_v13  ;;  %v3541_v29 = vld [vmem:[#allocation11 + $0xfc] ss:$24 sps:$4 sm:$0xff]  }
 0x27f   : > { %v1794_v62 = vmul.f32 %v4577_v43, %v1755_v58  ;;  %v1771_v0 = vunpack.c.l.bf16 %v3661_v59  ;;  %1242 = vmatprep.subr.bf16.mxu1 %v3534_v14  ;;  %v3561_v58 = vld [vmem:[#allocation11 + $0x218] ss:$24 sps:$4 sm:$0xff]   ;;  %v3564_v14 = vld [vmem:[#allocation11 + $0x248] ss:$24 sps:$4 sm:$0xff]  }
 0x280   : > { %v1811_v1 = vmul.f32 %v4577_v43, %v1772_v61 }
 0x281   : > { %1858 = vadd.xlane.f32.xlu1 %v1803_v21  ;;  %v1810_v63 = vmul.f32 %v4577_v43, %v1771_v0  ;;  %v3540_v43 = vld [vmem:[#allocation11 + $0xc8] ss:$24 sps:$4 sm:$0xff]  }
 0x282   : > { %1856 = vadd.xlane.f32.xlu0 %v1802_v28  ;;  %1243 = vmatpush1.bf16.msra.mxu1 %v3537_v15 }
 0x283   : > { %1244 = vmatprep.subr.bf16.mxu1 %v3538_v17 }
 0x285   : > { %1834 = vadd.xlane.f32.xlu1 %v1791_v33  ;;  %v3555_v33 = vld [vmem:[#allocation11 + $0x1b8] ss:$24 sps:$4 sm:$0xff]  }
 0x286   : > { %1832 = vadd.xlane.f32.xlu0 %v1790_v38  ;;  %1245 = vmatpush1.bf16.msra.mxu1 %v3540_v43 }
 0x287   : > { %1246 = vmatprep.subr.bf16.mxu1 %v3541_v29 }
 0x289   : > { %1866 = vadd.xlane.f32.xlu1 %v1807_v41  ;;  %v3556_v41 = vld [vmem:[#allocation11 + $0x1ec] ss:$24 sps:$4 sm:$0xff]  }
 0x28a   : > { %1864 = vadd.xlane.f32.xlu0 %v1806_v45  ;;  %1247 = vmatpush1.bf16.msra.mxu1 %v3543_v18 }
 0x28b   : > { %1248 = vmatprep.subr.bf16.mxu1 %v3544_v19 }
 0x28d   : > { %1838 = vadd.xlane.f32.xlu1 %v1793_v48 }
 0x28e   : > { %1836 = vadd.xlane.f32.xlu0 %v1792_v52  ;;  %1249 = vmatpush1.bf16.msra.mxu1 %v3546_v20 }
 0x28f   : > { %1250 = vmatprep.subr.bf16.mxu1 %v3547_v22 }
 0x291   : > { %1870 = vadd.xlane.f32.xlu1 %v1809_v55  ;;  %v3559_v55 = vld [vmem:[#allocation11 + $0x21c] ss:$24 sps:$4 sm:$0xff]  }
 0x292   : > { %1868 = vadd.xlane.f32.xlu0 %v1808_v50  ;;  %1251 = vmatpush1.bf16.msra.mxu1 %v3549_v23 }
 0x293   : > { %1252 = vmatprep.subr.bf16.mxu1 %v3550_v25 }
 0x295   : > { %1842 = vadd.xlane.f32.xlu1 %v1795_v60 }
 0x296   : > { %1840 = vadd.xlane.f32.xlu0 %v1794_v62  ;;  %1253 = vmatpush1.bf16.msra.mxu1 %v3552_v26 }
 0x297   : > { %1254 = vmatprep.subr.bf16.mxu1 %v3553_v31 }
 0x299   : > { %1874 = vadd.xlane.f32.xlu1 %v1811_v1 }
 0x29a   : > { %1872 = vadd.xlane.f32.xlu0 %v1810_v63  ;;  %1255 = vmatpush1.bf16.msra.mxu1 %v3555_v33 }
 0x29b   : > { %1256 = vmatprep.subr.bf16.mxu1 %v3556_v41 }
 0x29e   : > { %1257 = vmatpush1.bf16.msra.mxu1 %v3558_v46 }
 0x29f   : > { %1258 = vmatprep.subr.bf16.mxu1 %v3559_v55 }
 0x2a2   : > { %1259 = vmatpush1.bf16.msra.mxu1 %v3561_v58 }
 0x2a3   : > { %1260 = vmatprep.subr.bf16.mxu1 %v3562_v8  ;;  %v3573_v8 = vld [vmem:[#allocation11 + $0x2d8] ss:$24 sps:$4 sm:$0xff]  }
 0x2a6   : > { %1261 = vmatpush1.bf16.msra.mxu1 %v3564_v14 }
 0x2ea   : > { %v1847_v24 = vpop.xlane.xlu1 %1846 }
 0x2eb   : > { %v1813_v21 = vpop.xlane.xlu0 %1812  ;;  %v4677_v42 = vadd.f32 %v4660_v27, %v1847_v24  ;;  %v3565_v24 = vld [vmem:[#allocation11 + $0x27c] ss:$24 sps:$4 sm:$0xff]  }
 0x2ec   : > { %v4663_v32 = vadd.f32 %v4660_v27, %v1813_v21  ;;  %1262 = vmatprep.subr.bf16.mxu1 %v3565_v24  ;;  %v3786_v24 = vld [vmem:[%s4468_s27] ss:$8 sps:$4 sm:$0xff]   ;;  %s2905_s27 = sshll.u32 %s565_s14, 4  ;;  %s5076_s27 = int_to_ptr.vmem [resolvable:$true] %s2905_s27 }
 0x2ed   : > { %p3971_p4 = scmp.lt.s32.totalorder %s5076_s27, %s3969_s29 }
 0x2ee   : > { %v1817_v28 = vpop.xlane.xlu1 %1816 }
 0x2ef   : > { %v1815_v30 = vpop.xlane.xlu0 %1814  ;;  %v4671_v38 = vadd.f32 %v4660_v27, %v1817_v28 }
 0x2f0   : > { %v4666_v34 = vadd.f32 %v4660_v27, %v1815_v30  ;;  %v3567_v30 = vld [vmem:[#allocation11 + $0x278] ss:$24 sps:$4 sm:$0xff]  }
 0x2f1   : > { %1263 = vmatpush1.bf16.msra.mxu1 %v3567_v30 }
 0x2f2   : > { %v1910_v35 = vmax.f32 %v4663_v32, %v4666_v34  ;;  %v1819_v36 = vpop.xlane.xlu1 %1818 }
 0x2f3   : > { %v1845_v39 = vpop.xlane.xlu0 %1844  ;;  %v4674_v40 = vadd.f32 %v4660_v27, %v1819_v36 }
 0x2f4   : > { %v1911_v44 = vrot.slane %v1910_v35, 4  ;;  %v4680_v45 = vadd.f32 %v4660_v27, %v1845_v39 }
 0x2f5   : > { %v1917_v47 = vmax.f32 %v4671_v38, %v4674_v40 }
 0x2f6   : > { %v1912_v48 = vmax.f32 %v1910_v35, %v1911_v44  ;;  %v1966_v49 = vmax.f32 %v4680_v45, %v4677_v42  ;;  %v1851_v51 = vpop.xlane.xlu1 %1850 }
 0x2f7   : > { %v1918_v52 = vrot.slane %v1917_v47, 4  ;;  %v1849_v53 = vpop.xlane.xlu0 %1848  ;;  %v4687_v54 = vadd.f32 %v4660_v27, %v1851_v51 }
 0x2f8   : > { %v1913_v56 = vrot.slane %v1912_v48, 2  ;;  %v1967_v57 = vrot.slane %v1966_v49, 4  ;;  %v4690_v50 = vadd.f32 %v4660_v27, %v1849_v53 }
 0x2f9   : > { %v1919_v59 = vmax.f32 %v1917_v47, %v1918_v52  ;;  %v3570_v52 = vld [vmem:[#allocation11 + $0x2a8] ss:$24 sps:$4 sm:$0xff]  }
 0x2fa   : > { %v1914_v60 = vmax.f32 %v1912_v48, %v1913_v56  ;;  %v1968_v61 = vmax.f32 %v1966_v49, %v1967_v57  ;;  %v1973_v62 = vmax.f32 %v4690_v50, %v4687_v54  ;;  %v1823_v0 = vpop.xlane.xlu1 %1822  ;;  %v3568_v48 = vld [vmem:[#allocation11 + $0x2ac] ss:$24 sps:$4 sm:$0xff]  }
 0x2fb   : > { %v1920_v1 = vrot.slane %v1919_v59, 2  ;;  %v4695_v63 = vadd.f32 %v4660_v27, %v1823_v0  ;;  %v1821_v6 = vpop.xlane.xlu0 %1820  ;;  %1264 = vmatprep.subr.bf16.mxu1 %v3568_v48  ;;  %v3571_v0 = vld [vmem:[#allocation11 + $0x2dc] ss:$24 sps:$4 sm:$0xff]  }
 0x2fc   : > { %v1915_v9 = vrot.slane %v1914_v60, 1  ;;  %v1969_v10 = vrot.slane %v1968_v61, 2  ;;  %v1974_v11 = vrot.slane %v1973_v62, 4  ;;  %v4698_v13 = vadd.f32 %v4660_v27, %v1821_v6  ;;  %1265 = vmatpush1.bf16.msra.mxu1 %v3570_v52 }
 0x2fd   : > { %v1921_v15 = vmax.f32 %v1919_v59, %v1920_v1  ;;  %1266 = vmatprep.subr.bf16.mxu1 %v3571_v0 }
 0x2fe   : > { %v1916_v17 = vmax.f32 %v1914_v60, %v1915_v9  ;;  %v1970_v43 = vmax.f32 %v1968_v61, %v1969_v10  ;;  %v1975_v29 = vmax.f32 %v1973_v62, %v1974_v11  ;;  %v1924_v18 = vmax.f32 %v4698_v13, %v4695_v63  ;;  %v1855_v19 = vpop.xlane.xlu1 %1854 }
 0x2ff   : > { %v1922_v20 = vrot.slane %v1921_v15, 1  ;;  %v4703_v22 = vadd.f32 %v4660_v27, %v1855_v19  ;;  %v1853_v23 = vpop.xlane.xlu0 %1852 }
 0x300   : > { %v2022_v21 = vsub.f32 %v4663_v32, %v1916_v17  ;;  %v2023_v25 = vsub.f32 %v4666_v34, %v1916_v17  ;;  %v1971_v26 = vrot.slane %v1970_v43, 1  ;;  %v1976_v28 = vrot.slane %v1975_v29, 2  ;;  %1267 = vmatpush1.bf16.msra.mxu1 %v3573_v8 }
 0x301   : > { %v1923_v31 = vmax.f32 %v1921_v15, %v1922_v20  ;;  %v1925_v33 = vrot.slane %v1924_v18, 4  ;;  %v4708_v35 = vadd.f32 %v4660_v27, %v1853_v23 }
 0x302   : > { %v2054_v36 = vmul.f32 1.442695, %v2022_v21  ;;  %v2056_v39 = vmul.f32 1.442695, %v2023_v25  ;;  %v1972_v41 = vmax.f32 %v1970_v43, %v1971_v26  ;;  %v1977_v44 = vmax.f32 %v1975_v29, %v1976_v28  ;;  %v1831_v46 = vpop.xlane.xlu1 %1830  ;;  %v3576_v21 = vld [vmem:[#allocation12 + $0x4] ss:$8 sps:$4 sm:$0xff]  }
 0x303   : > { %v1926_v47 = vmax.f32 %v1924_v18, %v1925_v33  ;;  %v1980_v32 = vmax.f32 %v4708_v35, %v4703_v22  ;;  %v1829_v34 = vpop.xlane.xlu0 %1828  ;;  %v2024_v56 = vsub.f32 %v4671_v38, %v1923_v31  ;;  %v2025_v57 = vsub.f32 %v4674_v40, %v1923_v31  ;;  %1269 = vmatmul.mubr.bf16.vlgmr.msra.gmra.mrb[0].mxu1 %v3786_v24  ;;  %v3574_v33 = vld [vmem:[#allocation12] ss:$8 sps:$4 sm:$0xff]  }
 0x304   : > { %3662 = vpow2.f32 %v2054_v36  ;;  %v2038_v49 = vsub.f32 %v4680_v45, %v1972_v41  ;;  %v2039_v51 = vsub.f32 %v4677_v42, %v1972_v41  ;;  %v1978_v53 = vrot.slane %v1977_v44, 1  ;;  %2797 = vmatprep.subr.bf16.mxu1 %v3576_v21 }
 0x305   : > { %3664 = vpow2.f32 %v2056_v39  ;;  %v1927_v55 = vrot.slane %v1926_v47, 2  ;;  %v1981_v58 = vrot.slane %v1980_v32, 4  ;;  %v4717_v62 = vadd.f32 %v4660_v27, %v1831_v46  ;;  %2798 = vmatpush1.bf16.msra.mxu1 %v3574_v33 }
 0x306   : > { %v1863_v59 = vpop.xlane.xlu1 %1862  ;;  %v2086_v60 = vmul.f32 1.442695, %v2038_v49  ;;  %v4720_v45 = vadd.f32 %v4660_v27, %v1829_v34  ;;  %v2088_v1 = vmul.f32 1.442695, %v2039_v51  ;;  %v1979_v9 = vmax.f32 %v1977_v44, %v1978_v53  ;;  %v3579_v34 = vld [vmem:[#allocation12 + $0x14] ss:$8 sps:$4 sm:$0xff]  }
 0x307   : > { %v1928_v61 = vmax.f32 %v1926_v47, %v1927_v55  ;;  %v1861_v42 = vpop.xlane.xlu0 %1860  ;;  %v1982_v6 = vmax.f32 %v1980_v32, %v1981_v58  ;;  %v2058_v40 = vmul.f32 1.442695, %v2024_v56  ;;  %v2060_v15 = vmul.f32 1.442695, %v2025_v57  ;;  %v3577_v53 = vld [vmem:[#allocation12 + $0x10] ss:$8 sps:$4 sm:$0xff]   ;;  %2799 = vmatprep.subr.bf16.mxu1 %v3579_v34 }
 0x308   : > { %v1938_v38 = vmax.f32 %v4720_v45, %v4717_v62  ;;  %3666 = vpow2.f32 %v2086_v60  ;;  %v2040_v20 = vsub.f32 %v4690_v50, %v1979_v9  ;;  %v2041_v26 = vsub.f32 %v4687_v54, %v1979_v9 }
 0x309   : > { %v1929_v10 = vrot.slane %v1928_v61, 1  ;;  %v1983_v11 = vrot.slane %v1982_v6, 2  ;;  %3668 = vpow2.f32 %v2088_v1  ;;  %v4749_v51 = vadd.f32 %v4660_v27, %v1863_v59  ;;  %2800 = vmatpush1.bf16.msra.mxu1 %v3577_v53  ;;  %v3582_v59 = vld [vmem:[#allocation12 + $0x24] ss:$8 sps:$4 sm:$0xff]   ;;  %v3580_v1 = vld [vmem:[#allocation12 + $0x20] ss:$8 sps:$4 sm:$0xff]  }
 0x30a   : > { %v1827_v14 = vpop.xlane.xlu1 %1826  ;;  %v1939_v17 = vrot.slane %v1938_v38, 4  ;;  %3670 = vpow2.f32 %v2058_v40  ;;  %v2090_v46 = vmul.f32 1.442695, %v2040_v20  ;;  %v2092_v48 = vmul.f32 1.442695, %v2041_v26  ;;  %2801 = vmatprep.subr.bf16.mxu1 %v3582_v59 }
 0x30b   : > { %v4725_v43 = vadd.f32 %v4660_v27, %v1827_v14  ;;  %v1825_v29 = vpop.xlane.xlu0 %1824  ;;  %v1984_v18 = vmax.f32 %v1982_v6, %v1983_v11  ;;  %v1930_v28 = vmax.f32 %v1928_v61, %v1929_v10  ;;  %3672 = vpow2.f32 %v2060_v15  ;;  %v3583_v11 = vld [vmem:[#allocation12 + $0x30] ss:$8 sps:$4 sm:$0xff]   ;;  %v3585_v14 = vld [vmem:[#allocation12 + $0x34] ss:$8 sps:$4 sm:$0xff]   ;;  %v3588_v20 = vld [vmem:[#allocation12 + $0x44] ss:$8 sps:$4 sm:$0xff]  }
 0x30c   : > { %v4728_v19 = vadd.f32 %v4660_v27, %v1825_v29  ;;  %v1940_v23 = vmax.f32 %v1938_v38, %v1939_v17  ;;  %v4752_v52 = vadd.f32 %v4660_v27, %v1861_v42  ;;  %3674 = vpow2.f32 %v2090_v46 }
 0x30d   : > { %v1985_v39 = vrot.slane %v1984_v18, 1  ;;  %v2026_v49 = vsub.f32 %v4698_v13, %v1930_v28  ;;  %v2027_v55 = vsub.f32 %v4695_v63, %v1930_v28  ;;  %3676 = vpow2.f32 %v2092_v48  ;;  %2802 = vmatpush1.bf16.msra.mxu1 %v3580_v1  ;;  %v3586_v28 = vld [vmem:[#allocation12 + $0x40] ss:$8 sps:$4 sm:$0xff]   ;;  %v3589_v48 = vld [vmem:[#allocation12 + $0x50] ss:$8 sps:$4 sm:$0xff]  }
 0x30e   : > { %v4732_v25 = vpop.eup %3662  ;;  %v1931_v30 = vmax.f32 %v4728_v19, %v4725_v43  ;;  %v1859_v31 = vpop.xlane.xlu1 %1858  ;;  %v1941_v47 = vrot.slane %v1940_v23, 2  ;;  %v1994_v63 = vmax.f32 %v4752_v52, %v4749_v51  ;;  %2803 = vmatprep.subr.bf16.mxu1 %v3585_v14  ;;  %v3592_v1 = vld [vmem:[#allocation12 + $0x60] ss:$8 sps:$4 sm:$0xff]  }
 0x30f   : > { %v4737_v36 = vpop.eup %3664  ;;  %v4740_v50 = vadd.f32 %v4660_v27, %v1859_v31  ;;  %v1857_v41 = vpop.xlane.xlu0 %1856  ;;  %v1986_v56 = vmax.f32 %v1984_v18, %v1985_v39  ;;  %v2062_v42 = vmul.f32 1.442695, %v2026_v49  ;;  %v2064_v6 = vmul.f32 1.442695, %v2027_v55  ;;  %v3591_v39 = vld [vmem:[#allocation12 + $0x54] ss:$8 sps:$4 sm:$0xff]  }
 0x310   : > { %v1932_v44 = vrot.slane %v1931_v30, 4  ;;  %v2118_v54 = vadd.f32 %v4737_v36, %v4732_v25  ;;  %v4745_v32 = vadd.f32 %v4660_v27, %v1857_v41  ;;  %v1942_v13 = vmax.f32 %v1940_v23, %v1941_v47 }
 0x311   : > { %v2042_v8 = vsub.f32 %v4708_v35, %v1986_v56  ;;  %v2043_v10 = vsub.f32 %v4703_v22, %v1986_v56  ;;  %3678 = vpow2.f32 %v2062_v42  ;;  %v1995_v35 = vrot.slane %v1994_v63, 4  ;;  %2804 = vmatpush1.bf16.msra.mxu1 %v3583_v11  ;;  %v3594_v56 = vld [vmem:[#allocation12 + $0x64] ss:$8 sps:$4 sm:$0xff]  }
 0x312   : > { %v1933_v57 = vmax.f32 %v1931_v30, %v1932_v44  ;;  %v1987_v58 = vmax.f32 %v4745_v32, %v4740_v50  ;;  %v4757_v60 = vpop.eup %3666  ;;  %v2119_v61 = vrot.slane %v2118_v54, 4  ;;  %v1943_v18 = vrot.slane %v1942_v13, 1  ;;  %2805 = vmatprep.subr.bf16.mxu1 %v3588_v20 }
 0x313   : > { %v4759_v0 = vpop.eup %3668  ;;  %3680 = vpow2.f32 %v2064_v6  ;;  %v2094_v23 = vmul.f32 1.442695, %v2042_v8  ;;  %v2096_v26 = vmul.f32 1.442695, %v2043_v10  ;;  %v1996_v41 = vmax.f32 %v1994_v63, %v1995_v35  ;;  %v1835_v35 = vpop.xlane.xlu1 %1834 }
 0x314   : > { %v1934_v9 = vrot.slane %v1933_v57, 2  ;;  %v1988_v38 = vrot.slane %v1987_v58, 4  ;;  %v4764_v40 = vpop.eup %3670  ;;  %v2120_v17 = vadd.f32 %v2119_v61, %v2118_v54  ;;  %v2174_v29 = vadd.f32 %v4759_v0, %v4757_v60 }
 0x315   : > { %v4767_v15 = vpop.eup %3672  ;;  %v1944_v33 = vmax.f32 %v1942_v13, %v1943_v18  ;;  %3682 = vpow2.f32 %v2094_v23  ;;  %2806 = vmatpush1.bf16.msra.mxu1 %v3586_v28  ;;  %v1833_v23 = vpop.xlane.xlu0 %1832 }
 0x316   : > { %v1935_v24 = vmax.f32 %v1933_v57, %v1934_v9  ;;  %v1989_v21 = vmax.f32 %v1987_v58, %v1988_v38  ;;  %v2125_v22 = vadd.f32 %v4767_v15, %v4764_v40  ;;  %v2121_v30 = vrot.slane %v2120_v17, 2  ;;  %v4773_v44 = vpop.eup %3674  ;;  %2807 = vmatprep.subr.bf16.mxu1 %v3591_v39  ;;  %v3597_v38 = vld [vmem:[#allocation12 + $0x74] ss:$8 sps:$4 sm:$0xff]  }
 0x317   : > { %v2175_v31 = vrot.slane %v2174_v29, 4  ;;  %v4775_v47 = vpop.eup %3676  ;;  %3684 = vpow2.f32 %v2096_v26  ;;  %v2030_v55 = vsub.f32 %v4720_v45, %v1944_v33  ;;  %v2031_v57 = vsub.f32 %v4717_v62, %v1944_v33 }
 0x318   : > { %v1936_v54 = vrot.slane %v1935_v24, 1  ;;  %v1990_v46 = vrot.slane %v1989_v21, 2  ;;  %v2126_v34 = vrot.slane %v2125_v22, 4  ;;  %v2122_v49 = vadd.f32 %v2121_v30, %v2120_v17 }
 0x319   : > { %v2176_v53 = vadd.f32 %v2175_v31, %v2174_v29  ;;  %v1997_v58 = vrot.slane %v1996_v41, 2  ;;  %v2181_v61 = vadd.f32 %v4775_v47, %v4773_v44  ;;  %2808 = vmatpush1.bf16.msra.mxu1 %v3589_v48  ;;  %v2070_v45 = vmul.f32 1.442695, %v2030_v55 }
 0x31a   : > { %v1937_v13 = vmax.f32 %v1935_v24, %v1936_v54  ;;  %v1991_v59 = vmax.f32 %v1989_v21, %v1990_v46  ;;  %v2127_v63 = vadd.f32 %v2126_v34, %v2125_v22  ;;  %v2123_v8 = vrot.slane %v2122_v49, 1  ;;  %2809 = vmatprep.subr.bf16.mxu1 %v3594_v56  ;;  %v3595_v24 = vld [vmem:[#allocation12 + $0x70] ss:$8 sps:$4 sm:$0xff]  }
 0x31b   : > { %v4781_v42 = vpop.eup %3678  ;;  %v2177_v9 = vrot.slane %v2176_v53, 2  ;;  %v2072_v10 = vmul.f32 1.442695, %v2031_v57  ;;  %v1998_v62 = vmax.f32 %v1996_v41, %v1997_v58  ;;  %v2182_v14 = vrot.slane %v2181_v61, 4 }
 0x31c   : > { %v1992_v11 = vrot.slane %v1991_v59, 1  ;;  %v2028_v17 = vsub.f32 %v4728_v19, %v1937_v13  ;;  %v2128_v29 = vrot.slane %v2127_v63, 2  ;;  %v2029_v20 = vsub.f32 %v4725_v43, %v1937_v13 }
 0x31d   : > { %v4783_v6 = vpop.eup %3680  ;;  %2810 = vmatpush1.bf16.msra.mxu1 %v3592_v1  ;;  %v2124_v22 = vadd.f32 %v2123_v8, %v2122_v49  ;;  %v2178_v26 = vadd.f32 %v2177_v9, %v2176_v53  ;;  %3686 = vpow2.f32 %v2070_v45  ;;  %v1999_v19 = vrot.slane %v1998_v62, 1 }
 0x31e   : > { %v2132_v18 = vadd.f32 %v4783_v6, %v4781_v42  ;;  %2811 = vmatprep.subr.bf16.mxu1 %v3597_v38  ;;  %3688 = vpow2.f32 %v2072_v10  ;;  %v1993_v30 = vmax.f32 %v1991_v59, %v1992_v11  ;;  %v2183_v31 = vadd.f32 %v2182_v14, %v2181_v61  ;;  %v1867_v11 = vpop.xlane.xlu1 %1866 }
 0x31f   : > { %v4789_v21 = vpop.eup %3682  ;;  %v2066_v33 = vmul.f32 1.442695, %v2028_v17  ;;  %v4794_v39 = vadd.f32 %v4660_v27, %v1835_v35  ;;  %v4797_v43 = vadd.f32 %v4660_v27, %v1833_v23  ;;  %v2129_v41 = vadd.f32 %v2128_v29, %v2127_v63  ;;  %v1865_v17 = vpop.xlane.xlu0 %1864 }
 0x320   : > { %v2133_v54 = vrot.slane %v2132_v18, 4  ;;  %v2068_v46 = vmul.f32 1.442695, %v2029_v20  ;;  %3690 = vrcp.f32 %v2124_v22  ;;  %v2179_v34 = vrot.slane %v2178_v26, 1 }
 0x321   : > { %v4791_v28 = vpop.eup %3684  ;;  %2812 = vmatpush1.bf16.msra.mxu1 %v3595_v24  ;;  %v2000_v49 = vmax.f32 %v1998_v62, %v1999_v19  ;;  %v2044_v53 = vsub.f32 %v4745_v32, %v1993_v30  ;;  %v2184_v55 = vrot.slane %v2183_v31, 2  ;;  %3692 = vpow2.f32 %v2066_v33 }
 0x322   : > { %v2188_v48 = vadd.f32 %v4791_v28, %v4789_v21  ;;  %v2045_v56 = vsub.f32 %v4740_v50, %v1993_v30  ;;  %v1945_v57 = vmax.f32 %v4797_v43, %v4794_v39  ;;  %v2130_v58 = vrot.slane %v2129_v41, 1 }
 0x323   : > { %v2134_v61 = vadd.f32 %v2133_v54, %v2132_v18  ;;  %3694 = vpow2.f32 %v2068_v46  ;;  %v2180_v13 = vadd.f32 %v2179_v34, %v2178_v26  ;;  %v2046_v63 = vsub.f32 %v4752_v52, %v2000_v49 }
 0x324   : > { %v2189_v59 = vrot.slane %v2188_v48, 4  ;;  %v2047_v1 = vsub.f32 %v4749_v51, %v2000_v49  ;;  %v2098_v8 = vmul.f32 1.442695, %v2044_v53  ;;  %v2185_v32 = vadd.f32 %v2184_v55, %v2183_v31 }
 0x325   : > { %v2100_v45 = vmul.f32 1.442695, %v2045_v56  ;;  %v1946_v38 = vrot.slane %v1945_v57, 4  ;;  %v2131_v50 = vadd.f32 %v2130_v58, %v2129_v41  ;;  %v2135_v62 = vrot.slane %v2134_v61, 2  ;;  %v1839_v41 = vpop.xlane.xlu1 %1838 }
 0x326   : > { %3696 = vrcp.f32 %v2180_v13  ;;  %v2190_v14 = vadd.f32 %v2189_v59, %v2188_v48  ;;  %v2102_v29 = vmul.f32 1.442695, %v2046_v63  ;;  %v2104_v18 = vmul.f32 1.442695, %v2047_v1  ;;  %v1837_v48 = vpop.xlane.xlu0 %1836 }
 0x327   : > { %v4807_v9 = vpop.eup %3686  ;;  %3698 = vpow2.f32 %v2098_v8  ;;  %v2186_v20 = vrot.slane %v2185_v32, 1  ;;  %v1947_v35 = vmax.f32 %v1945_v57, %v1946_v38  ;;  %v2136_v23 = vadd.f32 %v2135_v62, %v2134_v61  ;;  %v3510_v57 = vld [vmem:[%s4481_s30] sm:$0xff]  }
 0x328   : > { %v4809_v10 = vpop.eup %3688  ;;  %3700 = vpow2.f32 %v2100_v45  ;;  %v4814_v24 = vadd.f32 %v4660_v27, %v1867_v11  ;;  %v4817_v22 = vadd.f32 %v4660_v27, %v1865_v17  ;;  %v2191_v19 = vrot.slane %v2190_v14, 2 }
 0x329   : > { %v2146_v51 = vadd.f32 %v4809_v10, %v4807_v9  ;;  %3702 = vrcp.f32 %v2131_v50  ;;  %v2187_v54 = vadd.f32 %v2186_v20, %v2185_v32  ;;  %v1948_v34 = vrot.slane %v1947_v35, 2  ;;  %v1871_v1 = vpop.xlane.xlu1 %1870 }
 0x32a   : > { %v3691_v52 = vpop.eup %3690  ;;  %3704 = vpow2.f32 %v2102_v29  ;;  %v2137_v49 = vrot.slane %v2136_v23, 1  ;;  %v2001_v53 = vmax.f32 %v4817_v22, %v4814_v24  ;;  %v2192_v55 = vadd.f32 %v2191_v19, %v2190_v14  ;;  %v1869_v38 = vpop.xlane.xlu0 %1868 }
 0x32b   : > { %v4819_v26 = vpop.eup %3692  ;;  %v2246_v31 = vmul.f32 %v3691_v52, %v4732_v25  ;;  %v2247_v33 = vmul.f32 %v3691_v52, %v4737_v36  ;;  %v2147_v46 = vrot.slane %v2146_v51, 4  ;;  %3706 = vpow2.f32 %v2104_v18 }
 0x32c   : > { %3708 = vrcp.f32 %v2187_v54  ;;  %v1949_v61 = vmax.f32 %v1947_v35, %v1948_v34  ;;  %v2138_v59 = vadd.f32 %v2137_v49, %v2136_v23  ;;  %v2002_v63 = vrot.slane %v2001_v53, 4 }
 0x32d   : > { %v4821_v30 = vpop.eup %3694  ;;  %v2278_v58 = vpack.c.bf16 %v2247_v33, %v2246_v31  ;;  %v2148_v36 = vadd.f32 %v2147_v46, %v2146_v51  ;;  %v2193_v32 = vrot.slane %v2192_v55, 1  ;;  %v4845_v54 = vadd.f32 %v4660_v27, %v1839_v41  ;;  %v1843_v46 = vpop.xlane.xlu1 %1842 }
 0x32e   : > { %v2139_v56 = vadd.f32 %v4821_v30, %v4819_v26  ;;  %v1950_v29 = vrot.slane %v1949_v61, 1  ;;  %3710 = vrcp.f32 %v2138_v59  ;;  %v2003_v52 = vmax.f32 %v2001_v53, %v2002_v63 }
 0x32f   : > { %v2422_v62 = vmul.bf16 %v3510_v57, %v2278_v58  ;;  %v2149_v17 = vrot.slane %v2148_v36, 2  ;;  %v2194_v35 = vadd.f32 %v2193_v32, %v2192_v55  ;;  %v3511_v55 = vld [vmem:[%s4481_s30 + $0x40] sm:$0xff]  }
 0x330   : > { %v3697_v25 = vpop.eup %3696  ;;  %v2140_v45 = vrot.slane %v2139_v56, 4  ;;  %v1951_v19 = vmax.f32 %v1949_v61, %v1950_v29  ;;  %v2004_v33 = vrot.slane %v2003_v52, 2  ;;  %v4853_v61 = vadd.f32 %v4660_v27, %v1837_v48  ;;  %v3512_v29 = vld [vmem:[%s4481_s30 + $0x8] sm:$0xff]  }
 0x331   : > { %v4830_v13 = vpop.eup %3698  ;;  %v2262_v11 = vmul.f32 %v3697_v25, %v4757_v60  ;;  %v2263_v14 = vmul.f32 %v3697_v25, %v4759_v0  ;;  %v2438_v60 = vunpack.c.l.bf16 %v2422_v62  ;;  %v2439_v34 = vunpack.c.h.bf16 %v2422_v62 }
 0x332   : > { %v4832_v8 = vpop.eup %3700  ;;  %v2141_v23 = vadd.f32 %v2140_v45, %v2139_v56  ;;  %v4847_v53 = vadd.f32 %v2149_v17, %v2148_v36  ;;  %v2032_v57 = vsub.f32 %v4797_v43, %v1951_v19  ;;  %v2033_v58 = vsub.f32 %v4794_v39, %v1951_v19  ;;  %v1875_v17 = vpop.xlane.xlu1 %1874 }
 0x333   : > { %v3703_v50 = vpop.eup %3702  ;;  %v2195_v18 = vadd.f32 %v4832_v8, %v4830_v13  ;;  %v2286_v49 = vpack.c.bf16 %v2263_v14, %v2262_v11  ;;  %v2005_v25 = vmax.f32 %v2003_v52, %v2004_v33  ;;  %3712 = vrcp.f32 %v2194_v35 }
 0x334   : > { %v4838_v20 = vpop.eup %3704  ;;  %v2248_v51 = vmul.f32 %v3703_v50, %v4764_v40  ;;  %v2249_v0 = vmul.f32 %v3703_v50, %v4767_v15  ;;  %v1841_v40 = vpop.xlane.xlu0 %1840  ;;  %v2142_v59 = vrot.slane %v2141_v23, 2  ;;  %v2074_v36 = vmul.f32 1.442695, %v2032_v57 }
 0x335   : > { %v4841_v31 = vpop.eup %3706  ;;  %v2196_v56 = vrot.slane %v2195_v18, 4  ;;  %v2076_v63 = vmul.f32 1.442695, %v2033_v58  ;;  %v2006_v32 = vrot.slane %v2005_v25, 1  ;;  %v1952_v43 = vmax.f32 %v4853_v61, %v4845_v54 }
 0x336   : > { %v3709_v15 = vpop.eup %3708  ;;  %v2202_v41 = vadd.f32 %v4841_v31, %v4838_v20  ;;  %v4860_v45 = vadd.f32 %v4660_v27, %v1871_v1  ;;  %v4862_v39 = vadd.f32 %v2439_v34, %v2438_v60  ;;  %v2279_v48 = vpack.c.bf16 %v2249_v0, %v2248_v51 }
 0x337   : > { %3714 = vpow2.f32 %v2074_v36  ;;  %v4865_v50 = vadd.f32 %v4660_v27, %v1869_v38  ;;  %v4867_v62 = vmul.bf16 %v3511_v55, %v2286_v49  ;;  %v4870_v11 = vmul.f32 %v3709_v15, %v4773_v44 }
 0x338   : > { %v2197_v14 = vadd.f32 %v2196_v56, %v2195_v18  ;;  %3716 = vpow2.f32 %v2076_v63  ;;  %v4874_v52 = vmul.f32 %v3709_v15, %v4775_v47  ;;  %v2203_v1 = vrot.slane %v2202_v41, 4  ;;  %v1873_v51 = vpop.xlane.xlu0 %1872  ;;  %v4876_v60 = vpop.eup %3710 }
 0x339   : > { %v2007_v35 = vmax.f32 %v2005_v25, %v2006_v32  ;;  %v1953_v19 = vrot.slane %v1952_v43, 4  ;;  %v2143_v38 = vadd.f32 %v2142_v59, %v2141_v23  ;;  %v2008_v0 = vmax.f32 %v4865_v50, %v4860_v45 }
 0x33a   : > { %v4881_v44 = vadd.f32 %v4660_v27, %v1843_v46  ;;  %v4884_v18 = vadd.f32 %v4660_v27, %v1841_v40  ;;  %v4889_v49 = vadd.f32 %v4660_v27, %v1875_v17  ;;  %v2198_v57 = vrot.slane %v2197_v14, 2 }
 0x33b   : > { %v2048_v33 = vsub.f32 %v4817_v22, %v2007_v35  ;;  %v2049_v47 = vsub.f32 %v4814_v24, %v2007_v35  ;;  %v1954_v34 = vmax.f32 %v1952_v43, %v1953_v19  ;;  %v2009_v55 = vrot.slane %v2008_v0, 4 }
 0x33c   : > { %v1959_v23 = vmax.f32 %v4884_v18, %v4881_v44  ;;  %v4894_v56 = vadd.f32 %v4660_v27, %v1873_v51  ;;  %v4896_v46 = vmul.bf16 %v3512_v29, %v2279_v48  ;;  %v2151_v40 = vrot.slane %v4847_v53, 1 }
 0x33d   : > { %v2106_v58 = vmul.f32 1.442695, %v2048_v33  ;;  %v2108_v22 = vmul.f32 1.442695, %v2049_v47  ;;  %v2204_v25 = vadd.f32 %v2203_v1, %v2202_v41  ;;  %v1955_v15 = vrot.slane %v1954_v34, 2  ;;  %v4900_v36 = vpop.eup %3712 }
 0x33e   : > { %v2010_v59 = vmax.f32 %v2008_v0, %v2009_v55  ;;  %v2144_v63 = vrot.slane %v2143_v38, 1  ;;  %v1960_v32 = vrot.slane %v1959_v23, 4  ;;  %v2015_v27 = vmax.f32 %v4894_v56, %v4889_v49 }
 0x33f   : > { %3718 = vpow2.f32 %v2106_v58  ;;  %v2199_v43 = vadd.f32 %v2198_v57, %v2197_v14  ;;  %v1956_v48 = vmax.f32 %v1954_v34, %v1955_v15  ;;  %v2454_v35 = vunpack.c.l.bf16 %v4867_v62 }
 0x340   : > { %3720 = vpow2.f32 %v2108_v22  ;;  %v2011_v17 = vrot.slane %v2010_v59, 2  ;;  %v2455_v41 = vunpack.c.h.bf16 %v4867_v62  ;;  %v1961_v1 = vmax.f32 %v1959_v23, %v1960_v32 }
 0x341   : > { %v4904_v29 = vpop.eup %3714  ;;  %v2152_v51 = vadd.f32 %v2151_v40, %v4847_v53  ;;  %v1957_v0 = vrot.slane %v1956_v48, 1  ;;  %v2016_v47 = vrot.slane %v2015_v27, 4  ;;  %v4093_v55 = vmov 0  }
 0x342   : > { %v4908_v19 = vpop.eup %3716  ;;  %v2012_v33 = vmax.f32 %v2010_v59, %v2011_v17  ;;  %2829 = vmatprep.mubr.bf16.mxu1 %v4093_v55  ;;  %v2287_v14 = vpack.c.bf16 %v4874_v52, %v4870_v11  ;;  %v2205_v34 = vrot.slane %v2204_v25, 2  ;;  %v1962_v58 = vrot.slane %v1961_v1, 2  ;;  %v3513_v17 = vld [vmem:[%s4481_s30 + $0x48] sm:$0xff]  }
 0x343   : > { %v2153_v57 = vadd.f32 %v4908_v19, %v4904_v29  ;;  %v2440_v62 = vunpack.c.l.bf16 %v4896_v46  ;;  %v2145_v23 = vadd.f32 %v2144_v63, %v2143_v38  ;;  %v2200_v22 = vrot.slane %v2199_v43, 1 }
 0x344   : > { %v1958_v15 = vmax.f32 %v1956_v48, %v1957_v0  ;;  %v2441_v53 = vunpack.c.h.bf16 %v4896_v46  ;;  %v2013_v59 = vrot.slane %v2012_v33, 1  ;;  %v1963_v32 = vmax.f32 %v1961_v1, %v1962_v58 }
 0x345   : > { %v2154_v40 = vrot.slane %v2153_v57, 4  ;;  %3722 = vrcp.f32 %v2152_v51  ;;  %v2017_v52 = vmax.f32 %v2015_v27, %v2016_v47  ;;  %v2206_v24 = vadd.f32 %v2205_v34, %v2204_v25 }
 0x346   : > { %v2034_v55 = vsub.f32 %v4853_v61, %v1958_v15  ;;  %v2035_v11 = vsub.f32 %v4845_v54, %v1958_v15  ;;  %v2014_v12 = vmax.f32 %v2012_v33, %v2013_v59  ;;  %v1964_v4 = vrot.slane %v1963_v32, 1 }
 0x347   : > { %v2155_v16 = vadd.f32 %v2154_v40, %v2153_v57  ;;  %3724 = vrcp.f32 %v2145_v23  ;;  %v2201_v38 = vadd.f32 %v2200_v22, %v2199_v43  ;;  %v2018_v58 = vrot.slane %v2017_v52, 2 }
 0x348   : > { %v2078_v63 = vmul.f32 1.442695, %v2034_v55  ;;  %v2080_v48 = vmul.f32 1.442695, %v2035_v11  ;;  %v2050_v1 = vsub.f32 %v4865_v50, %v2014_v12  ;;  %v2051_v51 = vsub.f32 %v4860_v45, %v2014_v12 }
 0x349   : > { %v4920_v0 = vpop.eup %3718  ;;  %v2156_v46 = vrot.slane %v2155_v16, 2  ;;  %v2526_v54 = vadd.f32 %v2455_v41, %v2454_v35  ;;  %v2431_v27 = vmul.bf16 %v3513_v17, %v2287_v14  ;;  %v1965_v25 = vmax.f32 %v1963_v32, %v1964_v4 }
 0x34a   : > { %v4924_v61 = vpop.eup %3720  ;;  %3726 = vpow2.f32 %v2078_v63  ;;  %v2207_v33 = vrot.slane %v2206_v24, 1  ;;  %v2110_v34 = vmul.f32 1.442695, %v2050_v1  ;;  %v2112_v57 = vmul.f32 1.442695, %v2051_v51 }
 0x34b   : > { %v2157_v47 = vadd.f32 %v2156_v46, %v2155_v16  ;;  %v2209_v43 = vadd.f32 %v4924_v61, %v4920_v0  ;;  %3728 = vpow2.f32 %v2080_v48  ;;  %v2036_v50 = vsub.f32 %v4884_v18, %v1965_v25 }
 0x34c   : > { %3730 = vrcp.f32 %v2201_v38  ;;  %v2037_v45 = vsub.f32 %v4881_v44, %v1965_v25  ;;  %v2019_v22 = vmax.f32 %v2017_v52, %v2018_v58  ;;  %v2477_v35 = vadd.f32 %v2441_v53, %v2440_v62 }
 0x34d   : > { %v2158_v23 = vrot.slane %v2157_v47, 1  ;;  %v2210_v12 = vrot.slane %v2209_v43, 4  ;;  %v2250_v4 = vmul.f32 %v4876_v60, %v4781_v42  ;;  %3732 = vpow2.f32 %v2110_v34 }
 0x34e   : > { %v2082_v16 = vmul.f32 1.442695, %v2036_v50  ;;  %3734 = vpow2.f32 %v2112_v57  ;;  %v2084_v15 = vmul.f32 1.442695, %v2037_v45  ;;  %v2251_v59 = vmul.f32 %v4876_v60, %v4783_v6 }
 0x34f   : > { %v2159_v41 = vadd.f32 %v2158_v23, %v2157_v47  ;;  %v2211_v14 = vadd.f32 %v2210_v12, %v2209_v43  ;;  %v3723_v40 = vpop.eup %3722  ;;  %v2208_v18 = vadd.f32 %v2207_v33, %v2206_v24  ;;  %v2020_v32 = vrot.slane %v2019_v22, 1  ;;  %v3515_v43 = vld [vmem:[%s4481_s30 + $0x50] sm:$0xff]  }
 0x350   : > { %3736 = vpow2.f32 %v2082_v16  ;;  %v5228_v44 = vrot.slane %v4862_v39, 4  ;;  %v2527_v53 = vrot.slane %v2526_v54, 4  ;;  %v2456_v42 = vunpack.c.l.bf16 %v2431_v27 }
 0x351   : > { %v2212_v17 = vrot.slane %v2211_v14, 2  ;;  %v3725_v55 = vpop.eup %3724  ;;  %v2478_v11 = vrot.slane %v2477_v35, 4  ;;  %v2457_v52 = vunpack.c.h.bf16 %v2431_v27  ;;  %3738 = vpow2.f32 %v2084_v15 }
 0x352   : > { %v2472_v62 = vadd.f32 %v5228_v44, %v4862_v39  ;;  %v2021_v38 = vmax.f32 %v2019_v22, %v2020_v32  ;;  %v2266_v63 = vmul.f32 %v4900_v36, %v4789_v21  ;;  %v2267_v6 = vmul.f32 %v4900_v36, %v4791_v28  ;;  %v3514_v39 = vld [vmem:[%s4481_s30 + $0x10] sm:$0xff]  }
 0x353   : > { %3740 = vrcp.f32 %v2159_v41  ;;  %v2213_v60 = vadd.f32 %v2212_v17, %v2211_v14  ;;  %v2280_v48 = vpack.c.bf16 %v2251_v59, %v2250_v4  ;;  %v4950_v33 = vadd.f32 %v2527_v53, %v2526_v54  ;;  %v3516_v53 = vld [vmem:[%s4481_s30 + $0x20] sm:$0xff]  }
 0x354   : > { %v4941_v24 = vpop.eup %3726  ;;  %3742 = vrcp.f32 %v2208_v18  ;;  %v2052_v46 = vsub.f32 %v4894_v56, %v2021_v38  ;;  %v2053_v1 = vsub.f32 %v4889_v49, %v2021_v38  ;;  %v2473_v21 = vrot.slane %v2472_v62, 2 }
 0x355   : > { %v4946_v51 = vpop.eup %3728  ;;  %v2214_v58 = vrot.slane %v2213_v60, 1  ;;  %v2533_v47 = vadd.f32 %v2457_v52, %v2456_v42  ;;  %v2288_v34 = vpack.c.bf16 %v2267_v6, %v2266_v63  ;;  %v4955_v56 = vadd.f32 %v2478_v11, %v2477_v35  ;;  %v3519_v6 = vld [vmem:[%s4481_s30 + $0x58] sm:$0xff]  }
 0x356   : > { %v3731_v27 = vpop.eup %3730  ;;  %v2160_v28 = vadd.f32 %v4946_v51, %v4941_v24  ;;  %v2114_v36 = vmul.f32 1.442695, %v2052_v46  ;;  %v2116_v25 = vmul.f32 1.442695, %v2053_v1  ;;  %v2424_v49 = vmul.bf16 %v3514_v39, %v2280_v48 }
 0x357   : > { %v2215_v57 = vadd.f32 %v2214_v58, %v2213_v60  ;;  %v4953_v50 = vpop.eup %3732  ;;  %v2254_v45 = vmul.f32 %v3723_v40, %v4807_v9  ;;  %v2255_v22 = vmul.f32 %v3723_v40, %v4809_v10  ;;  %v2252_v54 = vmul.f32 %v3725_v55, %v4819_v26 }
 0x358   : > { %v2161_v23 = vrot.slane %v2160_v28, 4  ;;  %3744 = vpow2.f32 %v2114_v36  ;;  %v4957_v12 = vpop.eup %3734  ;;  %v2253_v16 = vmul.f32 %v3725_v55, %v4821_v30  ;;  %v2432_v14 = vmul.bf16 %v3515_v43, %v2288_v34  ;;  %v3518_v55 = vld [vmem:[%s4481_s30 + $0x18] sm:$0xff]  }
 0x359   : > { %3746 = vrcp.f32 %v2215_v57  ;;  %v2216_v35 = vadd.f32 %v4957_v12, %v4953_v50  ;;  %v2268_v15 = vmul.f32 %v3731_v27, %v4830_v13  ;;  %v2269_v9 = vmul.f32 %v3731_v27, %v4832_v8 }
 0x35a   : > { %v4962_v4 = vpop.eup %3736  ;;  %v2162_v41 = vadd.f32 %v2161_v23, %v2160_v28  ;;  %3748 = vpow2.f32 %v2116_v25  ;;  %v4971_v26 = vadd.f32 %v2473_v21, %v2472_v62  ;;  %v2529_v40 = vrot.slane %v4950_v33, 2 }
 0x35b   : > { %v4969_v10 = vpop.eup %3738  ;;  %v2217_v30 = vrot.slane %v2216_v35, 4  ;;  %v2480_v32 = vrot.slane %v4955_v56, 2  ;;  %v2534_v44 = vrot.slane %v2533_v47, 4  ;;  %v2282_v42 = vpack.c.bf16 %v2255_v22, %v2254_v45 }
 0x35c   : > { %v2163_v59 = vrot.slane %v2162_v41, 2  ;;  %v2167_v13 = vadd.f32 %v4969_v10, %v4962_v4  ;;  %v2442_v8 = vunpack.c.l.bf16 %v2424_v49  ;;  %v2281_v11 = vpack.c.bf16 %v2253_v16, %v2252_v54  ;;  %v3520_v16 = vld [vmem:[%s4481_s30 + $0x28] sm:$0xff]  }
 0x35d   : > { %v3741_v18 = vpop.eup %3740  ;;  %v2218_v52 = vadd.f32 %v2217_v30, %v2216_v35  ;;  %v2443_v38 = vunpack.c.h.bf16 %v2424_v49  ;;  %v2458_v63 = vunpack.c.l.bf16 %v2432_v14  ;;  %v2289_v60 = vpack.c.bf16 %v2269_v9, %v2268_v15  ;;  %v3517_v30 = vld [vmem:[%s4481_s30 + $0x60] sm:$0xff]  }
 0x35e   : > { %v3743_v17 = vpop.eup %3742  ;;  %v2164_v62 = vadd.f32 %v2163_v59, %v2162_v41  ;;  %v2168_v39 = vrot.slane %v2167_v13, 4  ;;  %v2256_v48 = vmul.f32 %v3741_v18, %v4904_v29  ;;  %v2257_v46 = vmul.f32 %v3741_v18, %v4908_v19 }
 0x35f   : > { %v2219_v58 = vrot.slane %v2218_v52, 2  ;;  %v2459_v27 = vunpack.c.h.bf16 %v2432_v14  ;;  %v2426_v21 = vmul.bf16 %v3516_v53, %v2282_v42  ;;  %v2270_v28 = vmul.f32 %v3743_v17, %v4838_v20  ;;  %v3521_v14 = vld [vmem:[%s4481_s30 + $0x68] sm:$0xff]  }
 0x360   : > { %v2165_v1 = vrot.slane %v2164_v62, 1  ;;  %v2169_v36 = vadd.f32 %v2168_v39, %v2167_v13  ;;  %v2271_v43 = vmul.f32 %v3743_v17, %v4841_v31  ;;  %v2425_v34 = vmul.bf16 %v3518_v55, %v2281_v11 }
 0x361   : > { %v2220_v49 = vadd.f32 %v2219_v58, %v2218_v52  ;;  %v4986_v29 = vadd.f32 %v2534_v44, %v2533_v47  ;;  %v2484_v19 = vadd.f32 %v2443_v38, %v2442_v8  ;;  %v2433_v45 = vmul.bf16 %v3519_v6, %v2289_v60 }
 0x362   : > { %v4983_v25 = vpop.eup %3744  ;;  %v2166_v57 = vadd.f32 %v2165_v1, %v2164_v62  ;;  %v2170_v22 = vrot.slane %v2169_v36, 2  ;;  %v2283_v20 = vpack.c.bf16 %v2257_v46, %v2256_v48  ;;  %v2540_v31 = vadd.f32 %v2459_v27, %v2458_v63 }
 0x363   : > { %v3747_v23 = vpop.eup %3746  ;;  %v2221_v15 = vrot.slane %v2220_v49, 1  ;;  %v2446_v59 = vunpack.c.l.bf16 %v2426_v21  ;;  %v2290_v18 = vpack.c.bf16 %v2271_v43, %v2270_v28  ;;  %v2444_v44 = vunpack.c.l.bf16 %v2425_v34 }
 0x364   : > { %v4988_v54 = vpop.eup %3748  ;;  %v2272_v41 = vmul.f32 %v3747_v23, %v4920_v0  ;;  %v2273_v35 = vmul.f32 %v3747_v23, %v4924_v61  ;;  %3750 = vrcp.f32 %v2166_v57  ;;  %v2171_v9 = vadd.f32 %v2170_v22, %v2169_v36 }
 0x365   : > { %v2223_v47 = vadd.f32 %v4988_v54, %v4983_v25  ;;  %v2445_v42 = vunpack.c.h.bf16 %v2425_v34  ;;  %v2222_v13 = vadd.f32 %v2221_v15, %v2220_v49  ;;  %v2447_v0 = vunpack.c.h.bf16 %v2426_v21 }
 0x366   : > { %v2291_v53 = vpack.c.bf16 %v2273_v35, %v2272_v41  ;;  %v2172_v17 = vrot.slane %v2171_v9, 1  ;;  %v2460_v55 = vunpack.c.l.bf16 %v2433_v45  ;;  %v2461_v61 = vunpack.c.h.bf16 %v2433_v45 }
 0x367   : > { %v2224_v8 = vrot.slane %v2223_v47, 4  ;;  %v2427_v11 = vmul.bf16 %v3520_v16, %v2283_v20  ;;  %3752 = vrcp.f32 %v2222_v13  ;;  %v5000_v63 = vadd.f32 %v2529_v40, %v4950_v33 }
 0x368   : > { %v2435_v62 = vmul.bf16 %v3521_v14, %v2291_v53  ;;  %v2173_v52 = vadd.f32 %v2172_v17, %v2171_v9  ;;  %v2485_v6 = vrot.slane %v2484_v19, 4  ;;  %v2541_v60 = vrot.slane %v2540_v31, 4 }
 0x369   : > { %v2225_v38 = vadd.f32 %v2224_v8, %v2223_v47  ;;  %v2434_v39 = vmul.bf16 %v3517_v30, %v2290_v18  ;;  %v5005_v48 = vadd.f32 %v2480_v32, %v4955_v56  ;;  %v2491_v46 = vadd.f32 %v2445_v42, %v2444_v44  ;;  %v3524_v32 = vld [vmem:[%s4481_s30 + $0x30] sm:$0xff]  }
 0x36a   : > { %3754 = vrcp.f32 %v2173_v52  ;;  %v2536_v58 = vrot.slane %v4986_v29, 2  ;;  %v2498_v27 = vadd.f32 %v2447_v0, %v2446_v59  ;;  %v2547_v21 = vadd.f32 %v2461_v61, %v2460_v55  ;;  %v3528_v8 = vld [vmem:[%s4481_s30 + $0x70] sm:$0xff]  }
 0x36b   : > { %v2226_v1 = vrot.slane %v2225_v38, 2  ;;  %v2448_v28 = vunpack.c.l.bf16 %v2427_v11  ;;  %v2449_v36 = vunpack.c.h.bf16 %v2427_v11  ;;  %v2464_v33 = vunpack.c.l.bf16 %v2435_v62 }
 0x36c   : > { %v2465_v40 = vunpack.c.h.bf16 %v2435_v62  ;;  %v2486_v57 = vadd.f32 %v2485_v6, %v2484_v19  ;;  %v2542_v49 = vadd.f32 %v2541_v60, %v2540_v31  ;;  %v2462_v23 = vunpack.c.l.bf16 %v2434_v39  ;;  %v3532_v60 = vld [vmem:[%s4481_s30 + $0x38] sm:$0xff]  }
 0x36d   : > { %v2227_v43 = vadd.f32 %v2226_v1, %v2225_v38  ;;  %v2463_v45 = vunpack.c.h.bf16 %v2434_v39  ;;  %v2492_v56 = vrot.slane %v2491_v46, 4  ;;  %v2475_v41 = vrot.slane %v4971_v26, 1 }
 0x36e   : > { %v3751_v34 = vpop.eup %3750  ;;  %v2531_v35 = vrot.slane %v5000_v63, 1  ;;  %v2499_v14 = vrot.slane %v2498_v27, 4  ;;  %v2548_v15 = vrot.slane %v2547_v21, 4  ;;  %v2505_v9 = vadd.f32 %v2449_v36, %v2448_v28 }
 0x36f   : > { %v2258_v22 = vmul.f32 %v3751_v34, %v4941_v24  ;;  %v2259_v16 = vmul.f32 %v3751_v34, %v4946_v51  ;;  %v2228_v20 = vrot.slane %v2227_v43, 1  ;;  %v2561_v47 = vadd.f32 %v2465_v40, %v2464_v33 }
 0x370   : > { %v2482_v59 = vrot.slane %v5005_v48, 1  ;;  %v5015_v30 = vadd.f32 %v2536_v58, %v4986_v29  ;;  %v2487_v24 = vrot.slane %v2486_v57, 2  ;;  %v2543_v18 = vrot.slane %v2542_v49, 2 }
 0x371   : > { %v2284_v19 = vpack.c.bf16 %v2259_v16, %v2258_v22  ;;  %v2229_v31 = vadd.f32 %v2228_v20, %v2227_v43  ;;  %v3753_v51 = vpop.eup %3752  ;;  %v2554_v44 = vadd.f32 %v2463_v45, %v2462_v23  ;;  %v2493_v53 = vadd.f32 %v2492_v56, %v2491_v46 }
 0x372   : > { %v2500_v13 = vadd.f32 %v2499_v14, %v2498_v27  ;;  %v2549_v17 = vadd.f32 %v2548_v15, %v2547_v21  ;;  %v2274_v0 = vmul.f32 %v3753_v51, %v4953_v50  ;;  %v2275_v55 = vmul.f32 %v3753_v51, %v4957_v12 }
 0x373   : > { %v2428_v42 = vmul.bf16 %v3524_v32, %v2284_v19  ;;  %3756 = vrcp.f32 %v2229_v31  ;;  %v2506_v29 = vrot.slane %v2505_v9, 4  ;;  %v2562_v52 = vrot.slane %v2561_v47, 4 }
 0x374   : > { %v3755_v61 = vpop.eup %3754  ;;  %v2538_v38 = vrot.slane %v5015_v30, 1  ;;  %v2292_v6 = vpack.c.bf16 %v2275_v55, %v2274_v0  ;;  %v2488_v1 = vadd.f32 %v2487_v24, %v2486_v57  ;;  %v2555_v58 = vrot.slane %v2554_v44, 4  ;;  %v3536_v24 = vld [vmem:[%s4481_s30 + $0x78] sm:$0xff]   ;;  %s5234_s30 = sld [smem:[#allocation37_spill]] }
 0x375   : > { %v2450_v11 = vunpack.c.l.bf16 %v2428_v42  ;;  %v2451_v62 = vunpack.c.h.bf16 %v2428_v42  ;;  %v2260_v39 = vmul.f32 %v3755_v61, %v4962_v4  ;;  %v2261_v46 = vmul.f32 %v3755_v61, %v4969_v10 }
 0x376   : > { %v2494_v27 = vrot.slane %v2493_v53, 2  ;;  %v2544_v50 = vadd.f32 %v2543_v18, %v2542_v49  ;;  %v2436_v28 = vmul.bf16 %v3528_v8, %v2292_v6  ;;  %v2501_v36 = vrot.slane %v2500_v13, 2 }
 0x377   : > { %v2512_v21 = vadd.f32 %v2451_v62, %v2450_v11  ;;  %v2285_v12 = vpack.c.bf16 %v2261_v46, %v2260_v39  ;;  %v2550_v33 = vrot.slane %v2549_v17, 2  ;;  %v2507_v40 = vadd.f32 %v2506_v29, %v2505_v9 }
 0x378   : > { %v2563_v34 = vadd.f32 %v2562_v52, %v2561_v47  ;;  %v2466_v23 = vunpack.c.l.bf16 %v2436_v28  ;;  %v2467_v45 = vunpack.c.h.bf16 %v2436_v28  ;;  %v5025_v4 = vadd.f32 %v2475_v41, %v4971_v26 }
 0x379   : > { %v2513_v43 = vrot.slane %v2512_v21, 4  ;;  %v2429_v56 = vmul.bf16 %v3532_v60, %v2285_v12  ;;  %v2556_v10 = vadd.f32 %v2555_v58, %v2554_v44  ;;  %v2489_v57 = vrot.slane %v2488_v1, 1 }
 0x37a   : > { %v2495_v32 = vadd.f32 %v2494_v27, %v2493_v53  ;;  %v5028_v20 = vadd.f32 %v2482_v59, %v5005_v48  ;;  %v2568_v14 = vadd.f32 %v2467_v45, %v2466_v23  ;;  %v2502_v9 = vadd.f32 %v2501_v36, %v2500_v13  ;;  %s5074_s16 = scalar_lea.hbm %s5234_s30, %s3306_s10 }
 0x37b   : > { %v2514_v22 = vadd.f32 %v2513_v43, %v2512_v21  ;;  %v2452_v16 = vunpack.c.l.bf16 %v2429_v56  ;;  %v2453_v49 = vunpack.c.h.bf16 %v2429_v56  ;;  %v2508_v47 = vrot.slane %v2507_v40, 2 }
 0x37c   : > { %v2551_v19 = vadd.f32 %v2550_v33, %v2549_v17  ;;  %v2564_v31 = vrot.slane %v2563_v34, 2  ;;  %v2569_v51 = vrot.slane %v2568_v14, 4  ;;  %v2490_v44 = vadd.f32 %v2489_v57, %v2488_v1 }
 0x37d   : > { %v3757_v15 = vpop.eup %3756  ;;  %v2519_v41 = vadd.f32 %v2453_v49, %v2452_v16  ;;  %v2496_v53 = vrot.slane %v2495_v32, 1  ;;  %v2515_v42 = vrot.slane %v2514_v22, 2  ;;  %v2557_v8 = vrot.slane %v2556_v10, 2 }
 0x37e   : > { %v2276_v18 = vmul.f32 %v3757_v15, %v4983_v25  ;;  %v2277_v26 = vmul.f32 %v3757_v15, %v4988_v54  ;;  %v2532_v59 = vadd.f32 %v2531_v35, %v5000_v63  ;;  %v2570_v13 = vadd.f32 %v2569_v51, %v2568_v14 }
 0x37f   : > { %v2520_v48 = vrot.slane %v2519_v41, 4  ;;  %v2503_v17 = vrot.slane %v2502_v9, 1  ;;  %v2509_v55 = vadd.f32 %v2508_v47, %v2507_v40  ;;  %v2545_v61 = vrot.slane %v2544_v50, 1 }
 0x380   : > { %v2293_v0 = vpack.c.bf16 %v2277_v26, %v2276_v18  ;;  %v2552_v11 = vrot.slane %v2551_v19, 1  ;;  %v2565_v54 = vadd.f32 %v2564_v31, %v2563_v34  ;;  %v2571_v29 = vrot.slane %v2570_v13, 2 }
 0x381   : > { %v2521_v62 = vadd.f32 %v2520_v48, %v2519_v41  ;;  %v2497_v52 = vadd.f32 %v2496_v53, %v2495_v32  ;;  %v2516_v6 = vadd.f32 %v2515_v42, %v2514_v22  ;;  %v2539_v60 = vadd.f32 %v2538_v38, %v5015_v30 }
 0x382   : > { %v2437_v25 = vmul.bf16 %v3536_v24, %v2293_v0  ;;  %v2558_v39 = vadd.f32 %v2557_v8, %v2556_v10  ;;  %v2572_v27 = vadd.f32 %v2571_v29, %v2570_v13  ;;  %v2504_v63 = vadd.f32 %v2503_v17, %v2502_v9 }
 0x383   : > { %v2522_v58 = vrot.slane %v2521_v62, 2  ;;  %v2546_v35 = vadd.f32 %v2545_v61, %v2544_v50  ;;  %v2553_v21 = vadd.f32 %v2552_v11, %v2551_v19  ;;  %v2618_v28 = vpack.c.bf16 %v5025_v4, %v5025_v4 }
 0x384   : > { %v2468_v46 = vunpack.c.l.bf16 %v2437_v25  ;;  %v2469_v1 = vunpack.c.h.bf16 %v2437_v25  ;;  %v2510_v12 = vrot.slane %v2509_v55, 1  ;;  %v2566_v33 = vrot.slane %v2565_v54, 1 }
 0x385   : > { %v2523_v36 = vadd.f32 %v2522_v58, %v2521_v62  ;;  %v2517_v43 = vrot.slane %v2516_v6, 1  ;;  %v2559_v30 = vrot.slane %v2558_v39, 1  ;;  %v2573_v38 = vrot.slane %v2572_v27, 1 }
 0x386   : > { %v2575_v40 = vadd.f32 %v2469_v1, %v2468_v46  ;;  %v2619_v34 = vpack.c.bf16 %v5028_v20, %v5028_v20  ;;  %v2620_v56 = vpack.c.bf16 %v2490_v44, %v2490_v44  ;;  %v2627_v50 = vpack.c.bf16 %v2539_v60, %v2539_v60 }
 0x387   : > { %v2524_v23 = vrot.slane %v2523_v36, 1  ;;  %v2621_v10 = vpack.c.bf16 %v2497_v52, %v2497_v52  ;;  %v2622_v57 = vpack.c.bf16 %v2504_v63, %v2504_v63  ;;  %v2626_v32 = vpack.c.bf16 %v2532_v59, %v2532_v59 }
 0x388   : > { %v2576_v45 = vrot.slane %v2575_v40, 4  ;;  %v2628_v4 = vpack.c.bf16 %v2546_v35, %v2546_v35  ;;  %v2511_v22 = vadd.f32 %v2510_v12, %v2509_v55  ;;  %v2567_v16 = vadd.f32 %v2566_v33, %v2565_v54 }
 0x389   : > { %v2629_v14 = vpack.c.bf16 %v2553_v21, %v2553_v21  ;;  %v2518_v15 = vadd.f32 %v2517_v43, %v2516_v6  ;;  %v2560_v9 = vadd.f32 %v2559_v30, %v2558_v39  ;;  %v2574_v47 = vadd.f32 %v2573_v38, %v2572_v27 }
 0x38a   : > { %v2577_v49 = vadd.f32 %v2576_v45, %v2575_v40  ;;  %v2679_v19 = vunpack.c.l.b16 %v2619_v34  ;;  %v2525_v31 = vadd.f32 %v2524_v23, %v2523_v36  ;;  %v2680_v18 = vunpack.c.l.b16 %v2620_v56 }
 0x38b   : > { %v2687_v20 = vunpack.c.l.b16 %v2627_v50  ;;  %v2678_v26 = vunpack.c.l.b16 %v2618_v28  ;;  %v2681_v41 = vunpack.c.l.b16 %v2621_v10  ;;  %v2686_v51 = vunpack.c.l.b16 %v2626_v32  ;;  %v3787_v10 = vld [vmem:[%s5158_s5] sm:$0x3f] }
 0x38c   : > { %v2578_v24 = vrot.slane %v2577_v49, 2  ;;  %v2688_v44 = vunpack.c.l.b16 %v2628_v4  ;;  %v2623_v42 = vpack.c.bf16 %v2511_v22, %v2511_v22  ;;  %v2631_v8 = vpack.c.bf16 %v2567_v16, %v2567_v16 }
 0x38d   : > { %v2689_v0 = vunpack.c.l.b16 %v2629_v14  ;;  %v2624_v48 = vpack.c.bf16 %v2518_v15, %v2518_v15  ;;  %v2630_v59 = vpack.c.bf16 %v2560_v9, %v2560_v9  ;;  %v2632_v13 = vpack.c.bf16 %v2574_v47, %v2574_v47  ;;  %v5229_v15 = vld [vmem:[#allocation30_spill] sm:$0xff] }
 0x38e   : > { %v2579_v53 = vadd.f32 %v2578_v24, %v2577_v49  ;;  %v2695_v17 = vsel %vm2694_vm0, %v2679_v19, %v2678_v26  ;;  %v2625_v61 = vpack.c.bf16 %v2525_v31, %v2525_v31  ;;  %v2708_v25 = vsel %vm2694_vm0, %v2687_v20, %v2686_v51 }
 0x38f   : > { %v2697_v11 = vsel %vm2696_vm1, %v2680_v18, %v2695_v17  ;;  %v2682_v62 = vunpack.c.l.b16 %v2622_v57  ;;  %v2709_v29 = vsel %vm2696_vm1, %v2688_v44, %v2708_v25  ;;  %v2683_v6 = vunpack.c.l.b16 %v2623_v42 }
 0x390   : > { %v2580_v55 = vrot.slane %v2579_v53, 1  ;;  %v2699_v54 = vsel %vm2698_vm2, %v2681_v41, %v2697_v11  ;;  %v2691_v60 = vunpack.c.l.b16 %v2631_v8  ;;  %v2710_v39 = vsel %vm2698_vm2, %v2689_v0, %v2709_v29 }
 0x391   : > { %v2684_v46 = vunpack.c.l.b16 %v2624_v48  ;;  %v2690_v1 = vunpack.c.l.b16 %v2630_v59  ;;  %v2692_v58 = vunpack.c.l.b16 %v2632_v13  ;;  %v2685_v63 = vunpack.c.l.b16 %v2625_v61  ;;  %v2650_v48 = vld [vmem:[%s5230_s24] sm:$0x3] }
 0x392   : > { %v2581_v52 = vadd.f32 %v2580_v55, %v2579_v53  ;;  %v2701_v35 = vsel %vm2700_vm3, %v2682_v62, %v2699_v54  ;;  %v679_v50 = vsub.s32 1, %v4511_v7  ;;  %v676_v57 = vrot.slane %v3787_v10, %v4529_v37  ;;  %v5231_v54 = vld [vmem:[#allocation31_spill] sm:$0xff] }
 0x393   : > { %v2711_v21 = vsel %vm2700_vm3, %v2690_v1, %v2710_v39  ;;  %v2703_v12 = vsel %vm2702_vm4, %v2683_v6, %v2701_v35  ;;  %v683_v31 = vsub.s32 2, %v4511_v7  ;;  %v687_v8 = vsub.s32 3, %v4511_v7 }
 0x394   : > { %v2633_v27 = vpack.c.bf16 %v2581_v52, %v2581_v52  ;;  %v2712_v36 = vsel %vm2702_vm4, %v2691_v60, %v2711_v21  ;;  %v2705_v33 = vsel %vm2704_vm5, %v2684_v46, %v2703_v12  ;;  %v680_v32 = vrot.slane %v3787_v10, %v679_v50  ;;  %v2846_v12 = vld [vmem:[%s481_s15] sm:$0xff] }
 0x395   : > { %v2713_v40 = vsel %vm2704_vm5, %v2692_v58, %v2712_v36  ;;  %v2707_v43 = vsel %vm2706_vm6, %v2685_v63, %v2705_v33  ;;  %v1228_v4 = vadd.f32 %v4503_v2, %v676_v57  ;;  %v1232_v9 = vadd.f32 %v5229_v15, %v676_v57 }
 0x396   : > { %v2693_v28 = vunpack.c.l.b16 %v2633_v27  ;;  %v1230_v22 = vadd.f32 %v4505_v3, %v680_v32  ;;  %v1234_v49 = vadd.f32 %v4509_v5, %v680_v32  ;;  %v684_v24 = vrot.slane %v3787_v10, %v683_v31 }
 0x397   : > { %v3264_v16 = vmul.f32 -1.442695, %v1228_v4  ;;  %v3267_v19 = vmul.f32 -1.442695, %v1232_v9  ;;  %v691_v0 = vsub.s32 4, %v4511_v7  ;;  %v688_v13 = vrot.slane %v3787_v10, %v687_v8 }
 0x398   : > { %v2714_v30 = vsel %vm2706_vm6, %v2693_v28, %v2713_v40  ;;  %v3265_v14 = vmul.f32 -1.442695, %v1230_v22  ;;  %v3268_v47 = vmul.f32 -1.442695, %v1234_v49  ;;  %v2655_v17 = vrot.slane %v2650_v48, %v4529_v37  ;;  %v5232_v37 = vld [vmem:[#allocation32_spill] sm:$0xff] }
 0x399   : > { %v2715_v38 = vpack.c.b16 %v2714_v30, %v2707_v43  ;;  %3758 = vpow2.f32 %v3264_v16  ;;  %v692_v55 = vrot.slane %v3787_v10, %v691_v0  ;;  %v2659_v61 = vrot.slane %v2650_v48, %v679_v50 }
 0x39a   : > { %3760 = vpow2.f32 %v3265_v14 }
 0x39b   : > { %2830 = vmatmul.mubr.bf16.vlgmr.msra.gmra.mrb[4].mxu1 %v2715_v38  ;;  %3762 = vpow2.f32 %v3268_v47  ;;  %v1314_v29 = vadd.f32 %v5231_v54, %v692_v55  ;;  %v1318_v63 = vadd.f32 %v5232_v37, %v692_v55 }
 0x39c   : > { %3764 = vpow2.f32 %v3267_v19 }
 0x3a3   : > { %v3759_v18 = vpop.eup %3758 }
 0x3a4   : > { %v3761_v2 = vpop.eup %3760  ;;  %v2600_v3 = vadd.f32 1.0, %v3759_v18 }
 0x3a5   : > { %v3763_v41 = vpop.eup %3762  ;;  %v2601_v5 = vadd.f32 1.0, %v3761_v2 }
 0x3a6   : > { %v3765_v44 = vpop.eup %3764  ;;  %3766 = vrcp.f32 %v2600_v3  ;;  %v2604_v42 = vadd.f32 1.0, %v3763_v41 }
 0x3a7   : > { %v2603_v59 = vadd.f32 1.0, %v3765_v44 }
 0x3b0   : > { %v3767_v60 = vpop.eup %3766 }
 0x3d6   : > { %v1270_v34 = vpop.f32.mrb[0].mxu1 }
 0x3d7   : > { %v1272_v23 = vpop.f32.mrb[1].mxu1  ;;  %v1271_v20 = vadd.f32 %v1270_v34, %v684_v24  ;;  %v2847_v34 = vld [vmem:[%s481_s15 + $0x8] sm:$0xff]  ;;  %s3964_s15 = scalar_lea.vmem %s5076_s27, 256 }
 0x3d8   : > { %v1274_v45 = vpop.f32.mrb[2].mxu1  ;;  %v1273_v25 = vadd.f32 %v1272_v23, %v688_v13  ;;  %p3965_p10 = scmp.ne.s32.totalorder %s5076_s27, %s3964_s15  ;;  %p3972_p13 = scmp.lt.s32.totalorder %s3970_s11, %s3964_s15 }
 0x3d9   : > { %v1276_v56 = vpop.f32.mrb[3].mxu1  ;;  %v1275_v26 = vadd.f32 %v1274_v45, %v684_v24  ;;  %v3266_v51 = vmul.f32 -1.442695, %v1271_v20 }
 0x3da   : > { %v1277_v39 = vadd.f32 %v1276_v56, %v688_v13  ;;  %p3966_p5 = pnand %p3965_p10, %p5235_p1  ;;  %p3973_p7 = por %p3972_p13, %p3971_p4 }
 0x3db   : > { %v3269_v53 = vmul.f32 -1.442695, %v1275_v26  ;;  %3768 = vpow2.f32 %v3266_v51 }
 0x3dc   : > { %3770 = vrcp.f32 %v2601_v5  ;;  %p3967_p11 = pneg %p3966_p5 }
 0x3dd   : > { %3772 = vpow2.f32 %v3269_v53 }
 0x3de   : > { %3774 = vrcp.f32 %v2604_v42  ;;  %p3974_p0 = pnand %p3973_p7, %p3967_p11 }
 0x3df   : > { %3776 = vrcp.f32 %v2603_v59 }
 0x3e5   : > { %v3769_v27 = vpop.eup %3768 }
 0x3e6   : > { %v3771_v28 = vpop.eup %3770  ;;  %v2602_v38 = vadd.f32 1.0, %v3769_v27 }
 0x3e7   : > { %v3773_v33 = vpop.eup %3772  ;;  %v2848_v23 = vmul.f32 %v3771_v28, %v2846_v12 }
 0x3e8   : > { %v3775_v30 = vpop.eup %3774  ;;  %v2605_v10 = vadd.f32 1.0, %v3773_v33  ;;  %3778 = vrcp.f32 %v2602_v38 }
 0x3e9   : > { %v3777_v50 = vpop.eup %3776  ;;  %v2849_v32 = vmul.f32 %v3775_v30, %v2847_v34 }
 0x46e   : > { %v2831_v11 = vpop.f32.mrb[4].mxu1 }
 0x46f   : > { %v2832_v62 = vadd.f32 %v2831_v11, %v2655_v17  ;;  %v2833_v7 = vpop.f32.mrb[5].mxu1 }
 0x470   : > { %v2834_v52 = vadd.f32 %v2833_v7, %v2659_v61  ;;  %v2835_v6 = vpop.f32.mrb[6].mxu1 }
 0x471   : > { %v2840_v46 = vadd.f32 %v2832_v62, %v1273_v25  ;;  %v2836_v1 = vadd.f32 %v2835_v6, %v2655_v17  ;;  %v2837_v58 = vpop.f32.mrb[7].mxu1 }
 0x472   : > { %v2841_v35 = vadd.f32 %v2834_v52, %v1314_v29  ;;  %v2838_v21 = vadd.f32 %v2837_v58, %v2659_v61 }
 0x473   : > { %v2842_v36 = vadd.f32 %v2836_v1, %v1277_v39 }
 0x474   : > { %v2844_v40 = vmax.f32 %v2840_v46, %v2841_v35  ;;  %v2843_v43 = vadd.f32 %v2838_v21, %v1318_v63 }
 0x476   : > { %v2850_v45 = vmul.f32 %v3767_v60, %v2844_v40  ;;  %v2845_v56 = vmax.f32 %v2842_v36, %v2843_v43 }
 0x478   : > { %v2852_v57 = vadd.f32 %v2850_v45, %v2848_v23  ;;  %v2851_v4 = vmul.f32 %v3777_v50, %v2845_v56 }
 0x47a   : > { %3780 = vtanh.f32 %v2852_v57  ;;  %2868 = vst [vmem:[%s565_s14] sm:$0xff] %v2852_v57  ;;  %v2853_v22 = vadd.f32 %v2851_v4, %v2849_v32 }
 0x47b   : > { %3782 = vrcp.f32 %v2605_v10 }
 0x47c   : > { %3784 = vtanh.f32 %v2853_v22  ;;  %2869 = vst [vmem:[%s565_s14 + $0x8] sm:$0xff] %v2853_v22 }
 0x47d   : > { %3977 = shalt.err (!%p3974_p0)
}
 0x47e   : > { %s3978_s17 = scalar_lea.hbm %s5074_s16, 256  ;;  %s3982_s18 = scalar_lea.hbm %s5234_s30, 512 }
 0x47f   : > { %p3979_p12 = scmp.ne.s32.totalorder %s5074_s16, %s3978_s17  ;;  %p3983_p6 = scmp.lt.u32.totalorder %s5074_s16, %s5234_s30 }
 0x480   : > { %p3984_p2 = scmp.lt.u32.totalorder %s3982_s18, %s3978_s17  ;;  %p3986_p10 = scmp.lt.u32.totalorder %s3978_s17, %s5074_s16 }
 0x481   : > { %p3980_p3 = pnand %p3979_p12, %p5235_p1 }
 0x482   : > { %p3985_p8 = por %p3984_p2, %p3983_p6 }
 0x483   : > { %p3981_p9 = pneg %p3980_p3 }
 0x484   : > { %p3987_p5 = por %p3986_p10, %p3985_p8 }
 0x486   : > { %p3988_p11 = pnand %p3987_p5, %p3981_p9 }
 0x488   : > { %3991 = shalt.err (!%p3988_p11)
}
 0x489   : > { %s4095_s21 = smov 128   ;;  %s4096_s24 = smov 8   ;;  %v3779_v16 = vpop.eup %3778 }
 0x48a   : > { %3329 = dma.vmem_to_hbm [thread:$0]  (%p5235_p1), %s5076_s27, 256, %s5074_s16, %s2876_s1, %s4095_s21, %s4095_s21, %s4096_s24   ;;  %v3781_v49 = vpop.eup %3780 }
 0x48b   : > { %s3122_s10 = sshll.u32 %s4461_s23, 3  ;;  %v3783_v14 = vpop.eup %3782  ;;  %v2856_v15 = vmul.f32 %v3781_v49, %v3779_v16  ;;  %s3305_s14 = sshll.u32 %s4184_s9, 7 }
 0x48c   : > { %s558_s28 = scalar_lea.vmem [#allocation14], %s3122_s10  ;;  %v3785_v9 = vpop.eup %3784  ;;  %s5236_s29 = sld [smem:[#allocation36_spill]] }
 0x48d   : > { %s2889_s26 = sshll.u32 %s558_s28, 4  ;;  %v2857_v47 = vmul.f32 %v3785_v9, %v3783_v14  ;;  %s2871_s27 = scalar_lea.sflag [#allocation5], %s4461_s23  ;;  %s5109_s26 = int_to_ptr.vmem [resolvable:$true] %s2889_s26 }
 0x48e   : > { %s3992_s16 = scalar_lea.vmem %s5109_s26, 128  ;;  %s4097_s9 = smov [#allocation14]  }
 0x48f   : > { %v3310_v19 = vpack.c.bf16 %v2857_v47, %v2856_v15  ;;  %p3993_p4 = scmp.ne.s32.totalorder %s5109_s26, %s3992_s16  ;;  %s3996_s1 = sshll.u32 %s4097_s9, 4  ;;  %s3997_s1 = int_to_ptr.vmem [resolvable:$false] %s3996_s1 }
 0x490   : > { %s3998_s17 = scalar_lea.vmem %s3997_s1, 256  ;;  %p3999_p0 = scmp.lt.s32.totalorder %s5109_s26, %s3997_s1 }
 0x491   : > { %3311 = vst [vmem:[%s558_s28] sm:$0xff] %v3310_v19   ;;  %p3994_p13 = pnand %p3993_p4, %p5235_p1  ;;  %p4000_p12 = scmp.lt.s32.totalorder %s3998_s17, %s3992_s16 }
 0x492   : > { %s5107_s11 = scalar_lea.hbm %s5236_s29, %s3305_s14 }
 0x493   : > { %p3995_p7 = pneg %p3994_p13  ;;  %p4001_p3 = por %p4000_p12, %p3999_p0 }
 0x495   : > { %p4002_p9 = pnand %p4001_p3, %p3995_p7 }
 0x497   : > { %4005 = shalt.err (!%p4002_p9)
}
 0x498   : > { %s4006_s19 = scalar_lea.hbm %s5107_s11, 128  ;;  %s4010_s4 = scalar_lea.hbm %s5236_s29, 256 }
 0x499   : > { %p4007_p6 = scmp.ne.s32.totalorder %s5107_s11, %s4006_s19  ;;  %p4011_p10 = scmp.lt.u32.totalorder %s5107_s11, %s5236_s29 }
 0x49a   : > { %p4012_p5 = scmp.lt.u32.totalorder %s4010_s4, %s4006_s19  ;;  %p4014_p4 = scmp.lt.u32.totalorder %s4006_s19, %s5107_s11 }
 0x49b   : > { %p4008_p2 = pnand %p4007_p6, %p5235_p1 }
 0x49c   : > { %p4013_p11 = por %p4012_p5, %p4011_p10 }
 0x49d   : > { %p4009_p8 = pneg %p4008_p2 }
 0x49e   : > { %p4015_p13 = por %p4014_p4, %p4013_p11 }
 0x4a0   : > { %p4016_p7 = pnand %p4015_p13, %p4009_p8 }
 0x4a2   : > { %4019 = shalt.err (!%p4016_p7)
}
 0x4a3   : > { %s4098_s24 = smov 64   ;;  %s4099_s10 = smov 4  }
 0x4a4   : > { %3328 = dma.vmem_to_hbm [thread:$0]  (%p5235_p1), %s5109_s26, 128, %s5107_s11, %s2871_s27, %s4098_s24, %s4098_s24, %s4099_s10  }
 0x4a5 PF: > { %s5237_s14 = sld [smem:[#allocation24_spill]]  ;;  %s5238_s28 = sld [smem:[#allocation29_spill]] }
 0x4a6   : > { %p5240_p12 = scmp.ge.s32.totalorder %s4078_s22, 2 }
 0x4ab   : > { %s2920_s15 = sand.u32 1, %s5237_s14   ;;  %p5239_p0 = scmp.ne.s32.totalorder %s5238_s28, 0 }
 0x4ac   : > { %s2921_s7 = scalar_lea.sflag [#allocation5], %s2920_s15 }
 0x4ad   : > { %p3353_p3 = pnand %p5240_p12, %p5239_p0 }
 0x4af   : > { %4057 = dma.done.wait (!%p3353_p3), %s2921_s7, 128  }
 0x4b0   : > { %4059 = vsyncadd (!%p3353_p3), %s2921_s7, 4294967168  ;;  %s2930_s16 = scalar_lea.sflag [#allocation16], %s2920_s15 }
 0x4b1   : > { %4061 = dma.done.wait (!%p3353_p3), %s2930_s16, 256  }
 0x4b2   : > { %4063 = vsyncadd (!%p3353_p3), %s2930_s16, 4294967040  ;;  %s5241_s22 = sld [smem:[#allocation26_spill]]  ;;  %s5242_s9 = sld [smem:[#allocation25_spill]] }
 0x4b3   : > { %s5243_s21 = sld [smem:[#allocation27_spill]]  ;;  %s5244_s19 = smov %s4070_s20 }
 0x4b8   : > { %p36_p1 = scmp.ge.s32.totalorder %s5241_s22, 4   ;;  %s5245_s20 = smov %s5242_s9 }
 0x4ba   :  { %38 = sbr.rel (!%p36_p1) target bundleno = 19 (0x13), region = 167 }
 0x4c1   :  { %2935 = vsyncpa [#allocation4], 1 }
 0x4c2   :  { %2937 = vsyncpa [#allocation4 + $0x1], 1 }
 0x4c3   :  { %2938 = vsyncpa [#allocation7], 1 }
 0x4c4   :  { %2940 = vsyncpa [#allocation7 + $0x1], 1 }
 0x4c5   :  { %2941 = vsyncpa [#allocation10], 1 }
 0x4c6   :  { %2943 = vsyncpa [#allocation10 + $0x1], 1 }
 0x4c7   :  { %2944 = vsyncpa [#allocation13], 1 }
 0x4c8   :  { %2945 = vsyncpa [#allocation5], 1 }
 0x4c9   :  { %2947 = vsyncpa [#allocation5 + $0x1], 1 }
 0x4ca   :  { %2948 = vsyncpa [#allocation16], 1 }
 0x4cb   :  { %2950 = vsyncpa [#allocation16 + $0x1], 1 }

// kernel: tpu_custom_call.1
= control target key start
LH: loop header
LB: loop body
LE: loop exit
PB: predicated region body
PF: predicated region fallthrough
CT: control target
= control target key end

     0   :  { %s5153_s0 = inlined_call_operand.hbm [shape: bf16[32,256], index: 0, kind: input, shape index: {}]   ;;  %s5154_s1 = inlined_call_operand.hbm [shape: f32[32,128], index: 1, kind: input, shape index: {}]   ;;  %s5155_s2 = inlined_call_operand.hbm [shape: bf16[32,16,128], index: 2, kind: input, shape index: {}]   ;;  %s5156_s3 = inlined_call_operand.hbm [shape: bf16[32,16,128], index: 3, kind: input, shape index: {}]   ;;  %s5157_s4 = inlined_call_operand.hbm [shape: bf16[256,768], index: 4, kind: input, shape index: {}]   ;;  %s5158_s5 = inlined_call_operand.vmem [shape: f32[1,768], index: 5, kind: input, shape index: {}]   ;;  %s5159_s6 = inlined_call_operand.hbm [shape: bf16[128,256], index: 6, kind: input, shape index: {}]   ;;  %s5160_s7 = inlined_call_operand.vmem [shape: f32[1,256], index: 7, kind: input, shape index: {}]   ;;  %s5161_s8 = inlined_call_operand.vmem [shape: f32[1,128], index: 8, kind: input, shape index: {}]   ;;  %s5162_s9 = inlined_call_operand.<no memory space> [shape: f32[1], index: 9, kind: input, shape index: {}]   ;;  %s5163_s10 = inlined_call_operand.hbm [shape: bf16[32,128], index: 10, kind: output, shape index: {0}]   ;;  %s5164_s11 = inlined_call_operand.hbm [shape: f32[32,128], index: 11, kind: output, shape index: {1}]  }
   0x1   :  { %5188 = sst [smem:[#allocation33_spill]] %s5154_s1 }
   0x2   :  { %5189 = sst [smem:[#allocation34_spill]] %s5157_s4 }
   0x3   :  { %5190 = sst [smem:[#allocation35_spill]] %s5160_s7 }
   0x4   :  { %5191 = sst [smem:[#allocation36_spill]] %s5163_s10 }
   0x5   :  { %5192 = sst [smem:[#allocation37_spill]] %s5164_s11 }
   0x6   :  { %17 = sst [smem:[#allocation2]] %s5162_s9 }
   0x7   :  { %18 = vsyncpa [#allocation4], 0 }
   0x8   :  { %20 = vsyncpa [#allocation4 + $0x1], 0 }
   0x9   :  { %21 = vsyncpa [#allocation7], 0 }
   0xa   :  { %23 = vsyncpa [#allocation7 + $0x1], 0 }
   0xb   :  { %24 = vsyncpa [#allocation10], 0 }
   0xc   :  { %26 = vsyncpa [#allocation10 + $0x1], 0 }
   0xd   :  { %27 = vsyncpa [#allocation13], 0 }
   0xe   :  { %28 = vsyncpa [#allocation5], 0 }
   0xf   :  { %30 = vsyncpa [#allocation5 + $0x1], 0 }
  0x10   :  { %31 = vsyncpa [#allocation16], 0 }
  0x11   :  { %33 = vsyncpa [#allocation16 + $0x1], 0  ;;  %s4163_s19 = smov 0   ;;  %s4165_s20 = smov 0  }
  0x12   :  { %s4167_s21 = smov 0   ;;  %s4169_s22 = smov 0  }
  0x13 LB: > { %5193 = sst [smem:[#allocation24_spill]] %s4066_s19  ;;  %s4184_s9 = sadd.s32 4294967295, %s4078_s22   ;;  %s4078_s22 = sphi %s4169_s22, %s5241_s22   ;;  %s4074_s21 = sphi %s4167_s21, %s5243_s21   ;;  %s4070_s20 = sphi %s4165_s20, %s5245_s20   ;;  %s4066_s19 = sphi %s4163_s19, %s5244_s19  }
  0x14   : > { %5194 = sst [smem:[#allocation25_spill]] %s4074_s21  ;;  %s3095_s23 = sadd.s32 4294967294, %s4078_s22  }
  0x15   : > { %s4188_s24 = sadd.s32 1, %s4078_s22   ;;  %s46_s25 = sadd.s32 1, %s4074_s21 }
  0x16   : > { %5195 = sst [smem:[#allocation26_spill]] %s4188_s24  ;;  %s43_s26 = ssub.s32 %s4078_s22, %s4188_s24 }
  0x17   : > { %p53_p0 = scmp.ne.s32.totalorder %s4074_s21, %s4070_s20  ;;  %p44_p1 = scmp.eq.s32.totalorder %s43_s26, 0 }
  0x18   : > { %p54_p2 = scmp.eq.s32.totalorder %s4078_s22, 0  ;;  %p59_p3 = scmp.ne.s32.totalorder %s4070_s20, %s4066_s19 }
  0x19   : > { %p5167_p4 = scmp.eq.s32.totalorder %s4184_s9, 0  ;;  %p287_p7 = scmp.eq.s32.totalorder %s4184_s9, 1 }
  0x1a   : > { %s4200_s27 = scalar_select %p44_p1, %s4074_s21, %s46_s25  }
  0x1b   : > { %p4202_p5 = por %p54_p2, %p53_p0  ;;  %p4208_p6 = por %p5167_p4, %p59_p3 }
  0x1c   : > { %5196 = sst [smem:[#allocation27_spill]] %s4200_s27  ;;  %p293_p8 = scmp.eq.s32.totalorder %s3095_s23, 1 }
  0x1d   : > { %s5197_s28 = scalar_select %p4202_p5, 1, 0 }
  0x1e   : > { %s5198_s29 = scalar_select %p4208_p6, 1, 0 }
  0x1f   : > { %p3096_p9 = scmp.ge.s32.totalorder %s4078_s22, 1  ;;  %p326_p10 = scmp.lt.s32.totalorder %s4078_s22, 3 }
  0x20   : > { %p4215_p11 = por %p287_p7, %p53_p0  ;;  %p4219_p12 = por %p293_p8, %p59_p3 }
  0x21   : > { %p4223_p13 = pnand %p3096_p9, %p326_p10  ;;  %s4080_s14 = smov [#allocation11]  }
  0x22   : > { %s5199_s30 = scalar_select %p4215_p11, 1, 0 }
  0x23   : > { %s5201_s12 = scalar_select %p4219_p12, 1, 0 }
  0x24   : > { %5200 = sst [smem:[#allocation28_spill]] %s5199_s30  ;;  %p3332_p1 = pneg %p4223_p13 }
  0x25   : > { %5202 = sst [smem:[#allocation29_spill]] %s5201_s12  ;;  %s338_s15 = sshll.u32 %s4080_s14, 4  ;;  %s339_s15 = int_to_ptr.vmem [resolvable:$true] %s338_s15 }
  0x26   : > { %s5203_s13 = scalar_select %p4223_p13, 1, 0 }
  0x27   : > { %p4231_p2 = pnand %p3332_p1, %p5167_p4  ;;  %s5205_s4 = sld [smem:[#allocation34_spill]] }
  0x29   : > { %s5204_s16 = scalar_select %p4231_p2, 1, 0 }
  0x2a   : > { %p5177_p8 = pneg %p4231_p2 }
  0x2d   : > { %s3788_s23 = scalar_lea.hbm %s5205_s4, 12288 }
  0x2e   : > { %p3789_p7 = scmp.ne.s32.totalorder %s5205_s4, %s3788_s23  ;;  %p3795_p1 = scmp.lt.u32.totalorder %s3788_s23, %s5205_s4 }
  0x30   : > { %p3791_p9 = pnand %p5177_p8, %p3789_p7 }
  0x32   : > { %p3792_p10 = pneg %p3791_p9 }
  0x34   : > { %p3797_p0 = pnand %p3795_p1, %p3792_p10 }
  0x36   : > { %3800 = shalt.err (!%p3797_p0)
}
  0x37   : > { %s3801_s24 = scalar_lea.vmem %s339_s15, 12288  ;;  %p3809_p11 = scmp.lt.s32.totalorder %s339_s15, %s339_s15 }
  0x38   : > { %p3802_p4 = scmp.ne.s32.totalorder %s339_s15, %s3801_s24  ;;  %p3810_p6 = scmp.lt.s32.totalorder %s3801_s24, %s3801_s24 }
  0x3a   : > { %p3804_p3 = pnand %p3802_p4, %p5177_p8  ;;  %p3811_p13 = por %p3810_p6, %p3809_p11 }
  0x3c   : > { %p3805_p12 = pneg %p3804_p3 }
  0x3e   : > { %p3812_p5 = pnand %p3811_p13, %p3805_p12 }
  0x40   : > { %3815 = shalt.err (!%p3812_p5)
}
  0x41   : > { %s4081_s17 = smov 384   ;;  %s4082_s27 = smov 24  }
  0x42   : > { %3335 = dma.hbm_to_vmem [thread:$0]  (!%p4231_p2), %s5205_s4, 12288, %s339_s15, [#allocation10], %s4081_s17, %s4081_s17, %s4082_s27  }
  0x43   : > { %s4260_s25 = sand.u32 1, %s4074_s21   ;;  %s5175_s24 = sshll.u32 %s4078_s22, 8 }
  0x44   : > { %s5174_s26 = sshll.u32 %s4260_s25, 4  ;;  %p5206_p4 = scmp.ne.s32.totalorder %s5197_s28, 0 }
  0x45   : > { %p5207_p5 = scmp.lt.s32.totalorder %s4078_s22, 2  ;;  %s5176_s12 = sand.u32 1, %s4078_s22  }
  0x46   : > { %s5209_s1 = sld [smem:[#allocation33_spill]]  ;;  %s403_s15 = scalar_lea.vmem [#allocation6], %s5174_s26 }
  0x47   : > { %p4268_p6 = pnand %p5207_p5, %p5206_p4  ;;  %s410_s28 = sshll.u32 %s403_s15, 4  ;;  %s4282_s28 = int_to_ptr.vmem [resolvable:$true] %s410_s28 }
  0x48   : > { %s4286_s17 = scalar_lea.sflag [#allocation7], %s5176_s12 }
  0x49   : > { %s5208_s14 = scalar_select %p4268_p6, 1, 0 }
  0x4a   : > { %p4292_p12 = pneg %p4268_p6 }
  0x4c   : > { %s4278_s18 = scalar_lea.hbm %s5209_s1, %s5175_s24  ;;  %s3821_s15 = scalar_lea.hbm %s5209_s1, 512 }
  0x4d   : > { %s3816_s27 = scalar_lea.hbm %s4278_s18, 256  ;;  %p3822_p3 = scmp.lt.u32.totalorder %s4278_s18, %s5209_s1 }
  0x4e   : > { %p3817_p11 = scmp.ne.s32.totalorder %s4278_s18, %s3816_s27  ;;  %p3823_p7 = scmp.lt.u32.totalorder %s3821_s15, %s3816_s27 }
  0x4f   : > { %s5210_s23 = scalar_select %p4292_p12, 1, 0 }
  0x50   : > { %p3819_p13 = pnand %p4292_p12, %p3817_p11  ;;  %p3824_p9 = por %p3823_p7, %p3822_p3 }
  0x51   : > { %p3825_p10 = scmp.lt.u32.totalorder %s3816_s27, %s4278_s18 }
  0x52   : > { %p3820_p0 = pneg %p3819_p13 }
  0x53   : > { %p3826_p1 = por %p3825_p10, %p3824_p9 }
  0x55   : > { %p3827_p4 = pnand %p3826_p1, %p3820_p0 }
  0x57   : > { %3830 = shalt.err (!%p3827_p4)
}
  0x58   : > { %s3831_s12 = scalar_lea.vmem %s4282_s28, 256  ;;  %s4083_s10 = smov [#allocation6]  }
  0x59   : > { %p3832_p5 = scmp.ne.s32.totalorder %s4282_s28, %s3831_s12  ;;  %s3836_s19 = sshll.u32 %s4083_s10, 4  ;;  %s3837_s19 = int_to_ptr.vmem [resolvable:$false] %s3836_s19 }
  0x5a   : > { %s3838_s24 = scalar_lea.vmem %s3837_s19, 512  ;;  %p3839_p8 = scmp.lt.s32.totalorder %s4282_s28, %s3837_s19 }
  0x5b   : > { %p3834_p11 = pnand %p3832_p5, %p4292_p12  ;;  %p3840_p2 = scmp.lt.s32.totalorder %s3838_s24, %s3831_s12 }
  0x5d   : > { %p3835_p13 = pneg %p3834_p11  ;;  %p3841_p3 = por %p3840_p2, %p3839_p8 }
  0x5f   : > { %p3842_p7 = pnand %p3841_p3, %p3835_p13 }
  0x61   : > { %3845 = shalt.err (!%p3842_p7)
}
  0x62   : > { %s4084_s26 = smov 128   ;;  %s4085_s27 = smov 8  }
  0x63   : > { %3345 = dma.hbm_to_vmem [thread:$0]  (!%p4268_p6), %s4278_s18, 256, %s4282_s28, %s4286_s17, %s4084_s26, %s4084_s26, %s4085_s27  }
  0x64   : > { %s4086_s15 = smov [#allocation12]   ;;  %s5211_s12 = sshll.u32 %s4078_s22, 8 }
  0x65   : > { %s354_s10 = sshll.u32 %s4086_s15, 4  ;;  %s4324_s1 = scalar_lea.hbm %s5153_s0, %s5211_s12  ;;  %s355_s10 = int_to_ptr.vmem [resolvable:$true] %s354_s10 }
  0x66   : > { %s3846_s11 = scalar_lea.hbm %s5159_s6, 2048  ;;  %p5212_p8 = scmp.ne.s32.totalorder %s5204_s16, 0 }
  0x67   : > { %p3847_p2 = scmp.ne.s32.totalorder %s5159_s6, %s3846_s11  ;;  %p3853_p1 = scmp.lt.u32.totalorder %s3846_s11, %s5159_s6 }
  0x68   : > { %p5213_p0 = pneg %p5212_p8 }
  0x6a   : > { %p3849_p9 = pnand %p3847_p2, %p5213_p0 }
  0x6c   : > { %p3850_p10 = pneg %p3849_p9 }
  0x6e   : > { %p3855_p4 = pnand %p3853_p1, %p3850_p10 }
  0x70   : > { %3858 = shalt.err (!%p3855_p4)
}
  0x71   : > { %s3859_s15 = scalar_lea.vmem %s355_s10, 2048  ;;  %p5214_p11 = pmov %p5213_p0 }
  0x72   : > { %p3860_p5 = scmp.ne.s32.totalorder %s355_s10, %s3859_s15  ;;  %p3867_p7 = scmp.lt.s32.totalorder %s355_s10, %s355_s10 }
  0x73   : > { %p3868_p6 = scmp.lt.s32.totalorder %s3859_s15, %s3859_s15 }
  0x74   : > { %p3862_p13 = pnand %p3860_p5, %p5214_p11 }
  0x75   : > { %p3869_p12 = por %p3868_p6, %p3867_p7 }
  0x76   : > { %p3863_p3 = pneg %p3862_p13 }
  0x78   : > { %p3870_p0 = pnand %p3869_p12, %p3863_p3 }
  0x7a   : > { %3873 = shalt.err (!%p3870_p0)
}
  0x7b   : > { %3338 = dma.hbm_to_vmem [thread:$0]  (!%p5212_p8), %s5159_s6, 2048, %s355_s10, [#allocation13], %s4084_s26, %s4084_s26, %s4085_s27  }
  0x7c   : > { %s5215_s11 = sshll.u32 %s4260_s25, 4  ;;  %s3107_s12 = sshll.u32 %s4260_s25, 7 }
  0x7d   : > { %s381_s21 = scalar_lea.vmem [#allocation3], %s5215_s11  ;;  %s378_s16 = scalar_lea.sflag [#allocation4], %s4260_s25 }
  0x7e   : > { %s389_s30 = sshll.u32 %s381_s21, 4  ;;  %s3874_s19 = scalar_lea.hbm %s4324_s1, 256  ;;  %s4352_s30 = int_to_ptr.vmem [resolvable:$true] %s389_s30 }
  0x7f   : > { %p3875_p6 = scmp.ne.s32.totalorder %s4324_s1, %s3874_s19  ;;  %p5216_p12 = scmp.ne.s32.totalorder %s5210_s23, 0 }
  0x80   : > { %s3879_s28 = scalar_lea.hbm %s5153_s0, 512  ;;  %p3880_p8 = scmp.lt.u32.totalorder %s4324_s1, %s5153_s0 }
  0x81   : > { %p3877_p2 = pnand %p3875_p6, %p5216_p12  ;;  %p3881_p10 = scmp.lt.u32.totalorder %s3879_s28, %s3874_s19 }
  0x82   : > { %p3883_p4 = scmp.lt.u32.totalorder %s3874_s19, %s4324_s1 }
  0x83   : > { %p3878_p9 = pneg %p3877_p2  ;;  %p3882_p1 = por %p3881_p10, %p3880_p8 }
  0x85   : > { %p3884_p5 = por %p3883_p4, %p3882_p1 }
  0x87   : > { %p3885_p11 = pnand %p3884_p5, %p3878_p9 }
  0x89   : > { %3888 = shalt.err (!%p3885_p11)
}
  0x8a   : > { %s3889_s10 = scalar_lea.vmem %s4352_s30, 256  ;;  %s4087_s7 = smov [#allocation3]  }
  0x8b   : > { %p3890_p13 = scmp.ne.s32.totalorder %s4352_s30, %s3889_s10  ;;  %s3894_s11 = sshll.u32 %s4087_s7, 4  ;;  %s3895_s11 = int_to_ptr.vmem [resolvable:$false] %s3894_s11 }
  0x8c   : > { %s3896_s21 = scalar_lea.vmem %s3895_s11, 512  ;;  %p3897_p0 = scmp.lt.s32.totalorder %s4352_s30, %s3895_s11 }
  0x8d   : > { %p3892_p3 = pnand %p3890_p13, %p5216_p12  ;;  %p3898_p6 = scmp.lt.s32.totalorder %s3896_s21, %s3889_s10 }
  0x8f   : > { %p3893_p7 = pneg %p3892_p3  ;;  %p3899_p2 = por %p3898_p6, %p3897_p0 }
  0x91   : > { %p3900_p8 = pnand %p3899_p2, %p3893_p7 }
  0x93   : > { %3903 = shalt.err (!%p3900_p8)
}
  0x94   : > { %p5217_p9 = scmp.ne.s32.totalorder %s5208_s14, 0  ;;  %s3300_s19 = sshll.u32 %s4078_s22, 11 }
  0x95   : > { %s424_s24 = scalar_lea.vmem [#allocation8], %s3107_s12  ;;  %s4389_s4 = scalar_lea.hbm %s5155_s2, %s3300_s19 }
  0x96   : > { %3342 = dma.hbm_to_vmem [thread:$0]  (!%p5217_p9), %s4324_s1, 256, %s4352_s30, %s378_s16, %s4084_s26, %s4084_s26, %s4085_s27  }
  0x97   : > { %s432_s18 = sshll.u32 %s424_s24, 4  ;;  %s3904_s10 = scalar_lea.hbm %s4389_s4, 2048  ;;  %s4391_s18 = int_to_ptr.vmem [resolvable:$true] %s432_s18 }
  0x98   : > { %p3905_p10 = scmp.ne.s32.totalorder %s4389_s4, %s3904_s10  ;;  %s3909_s27 = scalar_lea.hbm %s5155_s2, 4096 }
  0x99   : > { %p3910_p5 = scmp.lt.u32.totalorder %s4389_s4, %s5155_s2  ;;  %p3911_p11 = scmp.lt.u32.totalorder %s3909_s27, %s3904_s10 }
  0x9a   : > { %p3907_p1 = pnand %p3905_p10, %p5216_p12  ;;  %p3913_p3 = scmp.lt.u32.totalorder %s3904_s10, %s4389_s4 }
  0x9b   : > { %p3912_p13 = por %p3911_p11, %p3910_p5 }
  0x9c   : > { %p3908_p4 = pneg %p3907_p1 }
  0x9d   : > { %p3914_p7 = por %p3913_p3, %p3912_p13 }
  0x9f   : > { %p3915_p0 = pnand %p3914_p7, %p3908_p4 }
  0xa1   : > { %3918 = shalt.err (!%p3915_p0)
}
  0xa2   : > { %s3919_s7 = scalar_lea.vmem %s4391_s18, 2048  ;;  %s4088_s11 = smov [#allocation8]  }
  0xa3   : > { %p3920_p6 = scmp.ne.s32.totalorder %s4391_s18, %s3919_s7  ;;  %s3924_s21 = sshll.u32 %s4088_s11, 4  ;;  %s3925_s21 = int_to_ptr.vmem [resolvable:$false] %s3924_s21 }
  0xa4   : > { %s3926_s24 = scalar_lea.vmem %s3925_s21, 4096  ;;  %p3927_p10 = scmp.lt.s32.totalorder %s4391_s18, %s3925_s21 }
  0xa5   : > { %p3922_p2 = pnand %p3920_p6, %p5216_p12  ;;  %p3928_p1 = scmp.lt.s32.totalorder %s3926_s24, %s3919_s7 }
  0xa7   : > { %p3923_p8 = pneg %p3922_p2  ;;  %p3929_p5 = por %p3928_p1, %p3927_p10 }
  0xa9   : > { %p3930_p11 = pnand %p3929_p5, %p3923_p8 }
  0xab   : > { %3933 = shalt.err (!%p3930_p11)
}
  0xac   : > { %s4089_s28 = smov 64   ;;  %s4090_s15 = smov 4  }
  0xad   : > { %3348 = dma.hbm_to_vmem [thread:$0]  (!%p5217_p9), %s4389_s4, 2048, %s4391_s18, %s4286_s17, %s4089_s28, %s4089_s28, %s4090_s15  }
  0xae   : > { %s4423_s26 = scalar_lea.hbm %s5156_s3, %s3300_s19  ;;  %s446_s27 = scalar_lea.vmem [#allocation9], %s3107_s12 }
  0xaf   : > { %s454_s30 = sshll.u32 %s446_s27, 4  ;;  %s5218_s16 = sand.u32 1, %s4078_s22   ;;  %s4427_s30 = int_to_ptr.vmem [resolvable:$true] %s454_s30 }
  0xb0   : > { %s4431_s7 = scalar_lea.sflag [#allocation10], %s5218_s16  ;;  %s3934_s11 = scalar_lea.hbm %s4423_s26, 2048 }
  0xb1   : > { %p3935_p4 = scmp.ne.s32.totalorder %s4423_s26, %s3934_s11  ;;  %s3939_s25 = scalar_lea.hbm %s5156_s3, 4096 }
  0xb2   : > { %p3940_p7 = scmp.lt.u32.totalorder %s4423_s26, %s5156_s3  ;;  %p3941_p0 = scmp.lt.u32.totalorder %s3939_s25, %s3934_s11 }
  0xb3   : > { %p3937_p13 = pnand %p3935_p4, %p5216_p12  ;;  %p3943_p2 = scmp.lt.u32.totalorder %s3934_s11, %s4423_s26 }
  0xb4   : > { %p3942_p6 = por %p3941_p0, %p3940_p7 }
  0xb5   : > { %p3938_p3 = pneg %p3937_p13 }
  0xb6   : > { %p3944_p8 = por %p3943_p2, %p3942_p6 }
  0xb8   : > { %p3945_p10 = pnand %p3944_p8, %p3938_p3 }
  0xba   : > { %3948 = shalt.err (!%p3945_p10)
}
  0xbb   : > { %s3949_s12 = scalar_lea.vmem %s4427_s30, 2048  ;;  %s4091_s21 = smov [#allocation9]  }
  0xbc   : > { %p3950_p1 = scmp.ne.s32.totalorder %s4427_s30, %s3949_s12  ;;  %s3954_s24 = sshll.u32 %s4091_s21, 4  ;;  %s3955_s24 = int_to_ptr.vmem [resolvable:$false] %s3954_s24 }
  0xbd   : > { %s3956_s10 = scalar_lea.vmem %s3955_s24, 4096  ;;  %p3957_p4 = scmp.lt.s32.totalorder %s4427_s30, %s3955_s24 }
  0xbe   : > { %p3952_p5 = pnand %p3950_p1, %p5216_p12  ;;  %p3958_p13 = scmp.lt.s32.totalorder %s3956_s10, %s3949_s12 }
  0xc0   : > { %p3953_p11 = pneg %p3952_p5  ;;  %p3959_p7 = por %p3958_p13, %p3957_p4 }
  0xc2   : > { %p3960_p0 = pnand %p3959_p7, %p3953_p11 }
  0xc4   : > { %3963 = shalt.err (!%p3960_p0)
}
  0xc5   : > { %3351 = dma.hbm_to_vmem [thread:$0]  (!%p5217_p9), %s4423_s26, 2048, %s4427_s30, %s4431_s7, %s4089_s28, %s4089_s28, %s4090_s15  }
  0xc6   : > { %p5219_p12 = scmp.ne.s32.totalorder %s5203_s13, 0 }
  0xc8   : > { %466 = sbr.rel (%p5219_p12) target bundleno = 1189 (0x4a5), region = 60 }
  0xcf   : > { %s4461_s23 = sand.u32 1, %s4070_s20   ;;  %p5220_p3 = scmp.ne.s32.totalorder %s5198_s29, 0 }
  0xd0   : > { %s4464_s1 = sshll.u32 %s4461_s23, 4  ;;  %s469_s14 = scalar_lea.sflag [#allocation4], %s4461_s23 }
  0xd1   : > { %s4468_s27 = scalar_lea.vmem [#allocation3], %s4464_s1 }
  0xd2   : > { %4037 = dma.done.wait (%p5220_p3), %s469_s14, 256  }
  0xd3   : > { %4039 = vsyncadd (%p5220_p3), %s469_s14, 4294967040  ;;  %s477_s13 = sand.u32 1, %s4184_s9   ;;  %s481_s15 = scalar_lea.vmem [#allocation6], %s4464_s1 }
  0xd4   : > { %s478_s28 = scalar_lea.sflag [#allocation7], %s477_s13 }
  0xd5   : > { %4041 = dma.done.wait (%p5220_p3), %s478_s28, 2304  }
  0xd6   : > { %4043 = vsyncadd (%p5220_p3), %s478_s28, 4294964992  ;;  %s3118_s26 = sshll.u32 %s4461_s23, 7  ;;  %s496_s16 = scalar_lea.sflag [#allocation10], %s477_s13 }
  0xd7   : > { %s4481_s30 = scalar_lea.vmem [#allocation8], %s3118_s26  ;;  %s4483_s7 = scalar_lea.vmem [#allocation9], %s3118_s26 }
  0xd8   : > { %4045 = dma.done.wait (%p5220_p3), %s496_s16, 2048  }
  0xd9   : > { %4047 = vsyncadd (%p5220_p3), %s496_s16, 4294965248  ;;  %p5221_p9 = scmp.eq.s32.totalorder %s4184_s9, 0 }
  0xdb   : > { %4049 = dma.done.wait (%p5221_p9), [#allocation10], 12288   ;;  %p5222_p6 = pmov %p5221_p9 }
  0xdd   : > { %4051 = vsyncadd (%p5222_p6), [#allocation10], 4294955008  ;;  %p5223_p2 = pmov %p5222_p6 }
  0xdf   : > { %4053 = dma.done.wait (%p5223_p2), [#allocation13], 2048   ;;  %p5224_p8 = pmov %p5223_p2 }
  0xe0   : > { %v3411_v0 = vld [vmem:[#allocation11 + $0x4] ss:$24 sps:$4 sm:$0xff]   ;;  %v3413_v1 = vld [vmem:[#allocation11] ss:$24 sps:$4 sm:$0xff]   ;;  %v3414_v2 = vld [vmem:[#allocation11 + $0x34] ss:$24 sps:$4 sm:$0xff]  }
  0xe1   : > { %4055 = vsyncadd (%p5224_p8), [#allocation13], 4294965248  ;;  %1193 = vmatprep.subr.bf16.mxu0 %v3411_v0  ;;  %v3416_v3 = vld [vmem:[#allocation11 + $0x30] ss:$24 sps:$4 sm:$0xff]   ;;  %v3417_v4 = vld [vmem:[#allocation11 + $0x64] ss:$24 sps:$4 sm:$0xff]  }
  0xe2   : > { %1194 = vmatpush1.bf16.msra.mxu0 %v3413_v1  ;;  %v3419_v5 = vld [vmem:[#allocation11 + $0x60] ss:$24 sps:$4 sm:$0xff]   ;;  %v3420_v6 = vld [vmem:[#allocation11 + $0x94] ss:$24 sps:$4 sm:$0xff]   ;;  %v3422_v7 = vld [vmem:[#allocation11 + $0x90] ss:$24 sps:$4 sm:$0xff]  }
  0xe3   : > { %1195 = vmatprep.subr.bf16.mxu0 %v3414_v2  ;;  %v3423_v8 = vld [vmem:[#allocation11 + $0xc4] ss:$24 sps:$4 sm:$0xff]   ;;  %v3425_v9 = vld [vmem:[#allocation11 + $0xc0] ss:$24 sps:$4 sm:$0xff]   ;;  %v3426_v10 = vld [vmem:[#allocation11 + $0xf4] ss:$24 sps:$4 sm:$0xff]  }
  0xe4   : > { %v3428_v11 = vld [vmem:[#allocation11 + $0xf0] ss:$24 sps:$4 sm:$0xff]   ;;  %v3429_v12 = vld [vmem:[#allocation11 + $0x124] ss:$24 sps:$4 sm:$0xff]   ;;  %v3431_v14 = vld [vmem:[#allocation11 + $0x120] ss:$24 sps:$4 sm:$0xff]  }
  0xe5   : > { %v3459_v13 = vld [vmem:[%s4468_s27 + $0x4] ss:$8 sps:$4 sm:$0xff]   ;;  %v3434_v16 = vld [vmem:[#allocation11 + $0x150] ss:$24 sps:$4 sm:$0xff]   ;;  %v3437_v18 = vld [vmem:[#allocation11 + $0x180] ss:$24 sps:$4 sm:$0xff]  }
  0xe6   : > { %1196 = vmatpush1.bf16.msra.mxu0 %v3416_v3  ;;  %v3432_v15 = vld [vmem:[#allocation11 + $0x154] ss:$24 sps:$4 sm:$0xff]   ;;  %1225 = vmatprep.mubr.bf16.mxu0 %v3459_v13  ;;  %v3435_v17 = vld [vmem:[#allocation11 + $0x184] ss:$24 sps:$4 sm:$0xff]   ;;  %v3440_v20 = vld [vmem:[#allocation11 + $0x1b0] ss:$24 sps:$4 sm:$0xff]  }
  0xe7   : > { %1197 = vmatprep.subr.bf16.mxu0 %v3417_v4  ;;  %1268 = vmatprep.mubr.bf16.mxu1 %v3459_v13  ;;  %v3438_v19 = vld [vmem:[#allocation11 + $0x1b4] ss:$24 sps:$4 sm:$0xff]   ;;  %v3441_v21 = vld [vmem:[#allocation11 + $0x1e4] ss:$24 sps:$4 sm:$0xff]   ;;  %v3443_v22 = vld [vmem:[#allocation11 + $0x1e0] ss:$24 sps:$4 sm:$0xff]  }
  0xe8   : > { %v3444_v23 = vld [vmem:[#allocation11 + $0x214] ss:$24 sps:$4 sm:$0xff]   ;;  %v3446_v24 = vld [vmem:[#allocation11 + $0x210] ss:$24 sps:$4 sm:$0xff]   ;;  %v3447_v25 = vld [vmem:[#allocation11 + $0x244] ss:$24 sps:$4 sm:$0xff]  }
  0xe9   : > { %v3449_v26 = vld [vmem:[#allocation11 + $0x240] ss:$24 sps:$4 sm:$0xff]   ;;  %v3450_v27 = vld [vmem:[#allocation11 + $0x274] ss:$24 sps:$4 sm:$0xff]   ;;  %v3452_v28 = vld [vmem:[#allocation11 + $0x270] ss:$24 sps:$4 sm:$0xff]  }
  0xea   : > { %1198 = vmatpush1.bf16.msra.mxu0 %v3419_v5  ;;  %v3453_v29 = vld [vmem:[#allocation11 + $0x2a4] ss:$24 sps:$4 sm:$0xff]   ;;  %v3455_v30 = vld [vmem:[#allocation11 + $0x2a0] ss:$24 sps:$4 sm:$0xff]   ;;  %v3456_v31 = vld [vmem:[#allocation11 + $0x2d4] ss:$24 sps:$4 sm:$0xff]  }
  0xeb   : > { %1199 = vmatprep.subr.bf16.mxu0 %v3420_v6  ;;  %v3458_v32 = vld [vmem:[#allocation11 + $0x2d0] ss:$24 sps:$4 sm:$0xff]   ;;  %v3464_v33 = vld [vmem:[#allocation11 + $0x14] ss:$24 sps:$4 sm:$0xff]   ;;  %v3467_v36 = vld [vmem:[#allocation11 + $0x44] ss:$24 sps:$4 sm:$0xff]   ;;  %v673_v6 = vlaneseq }
  0xec   : > { %v4499_v34 = vld [vmem:[%s4468_s27] ss:$8 sps:$4 sm:$0xff]   ;;  %v3470_v38 = vld [vmem:[#allocation11 + $0x74] ss:$24 sps:$4 sm:$0xff]   ;;  %v3473_v40 = vld [vmem:[#allocation11 + $0xa4] ss:$24 sps:$4 sm:$0xff]  }
  0xed   : > { %v3462_v35 = vld [vmem:[#allocation11 + $0x10] ss:$24 sps:$4 sm:$0xff]   ;;  %v3465_v37 = vld [vmem:[#allocation11 + $0x40] ss:$24 sps:$4 sm:$0xff]   ;;  %v3476_v42 = vld [vmem:[#allocation11 + $0xd4] ss:$24 sps:$4 sm:$0xff]  }
  0xee   : > { %1200 = vmatpush1.bf16.msra.mxu0 %v3422_v7  ;;  %v3468_v39 = vld [vmem:[#allocation11 + $0x70] ss:$24 sps:$4 sm:$0xff]   ;;  %v3471_v41 = vld [vmem:[#allocation11 + $0xa0] ss:$24 sps:$4 sm:$0xff]   ;;  %v3479_v44 = vld [vmem:[#allocation11 + $0x104] ss:$24 sps:$4 sm:$0xff]  }
  0xef   : > { %1201 = vmatprep.subr.bf16.mxu0 %v3423_v8  ;;  %v3474_v43 = vld [vmem:[#allocation11 + $0xd0] ss:$24 sps:$4 sm:$0xff]   ;;  %v3477_v45 = vld [vmem:[#allocation11 + $0x100] ss:$24 sps:$4 sm:$0xff]   ;;  %v3482_v46 = vld [vmem:[#allocation11 + $0x134] ss:$24 sps:$4 sm:$0xff]  }
  0xf0   : > { %v3480_v47 = vld [vmem:[#allocation11 + $0x130] ss:$24 sps:$4 sm:$0xff]   ;;  %v3485_v48 = vld [vmem:[#allocation11 + $0x164] ss:$24 sps:$4 sm:$0xff]   ;;  %v3483_v49 = vld [vmem:[#allocation11 + $0x160] ss:$24 sps:$4 sm:$0xff]  }
  0xf1   : > { %v3488_v50 = vld [vmem:[#allocation11 + $0x194] ss:$24 sps:$4 sm:$0xff]   ;;  %v3486_v51 = vld [vmem:[#allocation11 + $0x190] ss:$24 sps:$4 sm:$0xff]   ;;  %v3491_v52 = vld [vmem:[#allocation11 + $0x1c4] ss:$24 sps:$4 sm:$0xff]  }
  0xf2   : > { %1202 = vmatpush1.bf16.msra.mxu0 %v3425_v9  ;;  %v3489_v53 = vld [vmem:[#allocation11 + $0x1c0] ss:$24 sps:$4 sm:$0xff]   ;;  %v3494_v54 = vld [vmem:[#allocation11 + $0x1f4] ss:$24 sps:$4 sm:$0xff]   ;;  %v3492_v55 = vld [vmem:[#allocation11 + $0x1f0] ss:$24 sps:$4 sm:$0xff]  }
  0xf3   : > { %1203 = vmatprep.subr.bf16.mxu0 %v3426_v10  ;;  %v3497_v56 = vld [vmem:[#allocation11 + $0x224] ss:$24 sps:$4 sm:$0xff]   ;;  %v3495_v57 = vld [vmem:[#allocation11 + $0x220] ss:$24 sps:$4 sm:$0xff]   ;;  %v3500_v58 = vld [vmem:[#allocation11 + $0x254] ss:$24 sps:$4 sm:$0xff]  }
  0xf4   : > { %v3498_v59 = vld [vmem:[#allocation11 + $0x250] ss:$24 sps:$4 sm:$0xff]   ;;  %v3503_v60 = vld [vmem:[#allocation11 + $0x284] ss:$24 sps:$4 sm:$0xff]   ;;  %v3501_v61 = vld [vmem:[#allocation11 + $0x280] ss:$24 sps:$4 sm:$0xff]  }
  0xf5   : > { %v3506_v62 = vld [vmem:[#allocation11 + $0x2b4] ss:$24 sps:$4 sm:$0xff]   ;;  %v3504_v63 = vld [vmem:[#allocation11 + $0x2b0] ss:$24 sps:$4 sm:$0xff]   ;;  %v3509_v0 = vld [vmem:[#allocation11 + $0x2e4] ss:$24 sps:$4 sm:$0xff]  }
  0xf6   : > { %1204 = vmatpush1.bf16.msra.mxu0 %v3428_v11  ;;  %v3507_v1 = vld [vmem:[#allocation11 + $0x2e0] ss:$24 sps:$4 sm:$0xff]   ;;  %v4511_v7 = vshrl.u32 %v673_v6, 7  ;;  %v4092_v9 = vmov 1966171168   ;;  %s1876_s25 = sld [smem:[#allocation2]] }
  0xf7   : > { %1205 = vmatprep.subr.bf16.mxu0 %v3429_v12  ;;  %v1358_v10 = vunpack.c.l.s4 %v4092_v9  ;;  %v671_v11 = vld [vmem:[%s5158_s5] sm:$0x3f]  ;;  %vm2694_vm0 = vcmask 1041409   ;;  %vm2696_vm1 = vcmask 1042434   ;;  %vm2698_vm2 = vcmask 1043459   ;;  %s5230_s24 = sld [smem:[#allocation35_spill]] }
  0xf8   : > { %v695_v8 = vsub.s32 5, %v4511_v7  ;;  %vm2700_vm3 = vcmask 1044484   ;;  %vm2702_vm4 = vcmask 1045509   ;;  %vm2704_vm5 = vcmask 1046534   ;;  %s3306_s10 = sshll.u32 %s4184_s9, 8  ;;  %s565_s14 = scalar_lea.vmem [#allocation15], %s4464_s1 }
  0xf9   : > { %vm2706_vm6 = vcmask 1047559   ;;  %s5233_s13 = sld [smem:[#allocation28_spill]]  ;;  %s2876_s1 = scalar_lea.sflag [#allocation16], %s4461_s23 }
  0xfa   : > { %1206 = vmatpush1.bf16.msra.mxu0 %v3431_v14  ;;  %v1359_v14 = vunpack.c.0.s8 %v1358_v10 }
  0xfb   : > { %1207 = vmatprep.subr.bf16.mxu0 %v3432_v15 }
  0xfe   : > { %1208 = vmatpush1.bf16.msra.mxu0 %v3434_v16 }
  0xff   : > { %1209 = vmatprep.subr.bf16.mxu0 %v3435_v17  ;;  %p5235_p1 = scmp.ne.s32.totalorder %s5233_s13, 0 }
 0x102   : > { %1210 = vmatpush1.bf16.msra.mxu0 %v3437_v18 }
 0x103   : > { %1211 = vmatprep.subr.bf16.mxu0 %v3438_v19 }
 0x106   : > { %1212 = vmatpush1.bf16.msra.mxu0 %v3440_v20  ;;  %v1362_v20 = vsub.s32 %v1359_v14, %v4511_v7 }
 0x107   : > { %1213 = vmatprep.subr.bf16.mxu0 %v3441_v21 }
 0x10a   : > { %1214 = vmatpush1.bf16.msra.mxu0 %v3443_v22 }
 0x10b   : > { %1215 = vmatprep.subr.bf16.mxu0 %v3444_v23 }
 0x10e   : > { %1216 = vmatpush1.bf16.msra.mxu0 %v3446_v24 }
 0x10f   : > { %1217 = vmatprep.subr.bf16.mxu0 %v3447_v25 }
 0x112   : > { %1218 = vmatpush1.bf16.msra.mxu0 %v3449_v26 }
 0x113   : > { %1219 = vmatprep.subr.bf16.mxu0 %v3450_v27 }
 0x116   : > { %1220 = vmatpush1.bf16.msra.mxu0 %v3452_v28 }
 0x117   : > { %1221 = vmatprep.subr.bf16.mxu0 %v3453_v29 }
 0x11a   : > { %1222 = vmatpush1.bf16.msra.mxu0 %v3455_v30 }
 0x11b   : > { %1223 = vmatprep.subr.bf16.mxu0 %v3456_v31 }
 0x11e   : > { %1224 = vmatpush1.bf16.msra.mxu0 %v3458_v32 }
 0x11f   : > { %1279 = vmatprep.subr.bf16.mxu0 %v3464_v33 }
 0x121   : > { %1226 = vmatmul.mubr.bf16.vlgmr.msra.gmra.mrb[0].mxu0 %v4499_v34 }
 0x122   : > { %1280 = vmatpush1.bf16.msra.mxu0 %v3462_v35  ;;  %1311 = vmatprep.mubr.bf16.mxu0 %v3459_v13  ;;  %v696_v13 = vrot.slane %v671_v11, %v695_v8  ;;  %v1325_v11 = vld [vmem:[%s4483_s7 + $0xc] sm:$0xf] }
 0x123   : > { %1281 = vmatprep.subr.bf16.mxu0 %v3467_v36 }
 0x126   : > { %1282 = vmatpush1.bf16.msra.mxu0 %v3465_v37  ;;  %v4529_v37 = vsub.s32 0, %v4511_v7 }
 0x127   : > { %1283 = vmatprep.subr.bf16.mxu0 %v3470_v38 }
 0x12a   : > { %1284 = vmatpush1.bf16.msra.mxu0 %v3468_v39 }
 0x12b   : > { %1285 = vmatprep.subr.bf16.mxu0 %v3473_v40 }
 0x12e   : > { %1286 = vmatpush1.bf16.msra.mxu0 %v3471_v41 }
 0x12f   : > { %1287 = vmatprep.subr.bf16.mxu0 %v3476_v42 }
 0x132   : > { %1288 = vmatpush1.bf16.msra.mxu0 %v3474_v43 }
 0x133   : > { %1289 = vmatprep.subr.bf16.mxu0 %v3479_v44 }
 0x136   : > { %1290 = vmatpush1.bf16.msra.mxu0 %v3477_v45 }
 0x137   : > { %1291 = vmatprep.subr.bf16.mxu0 %v3482_v46 }
 0x13a   : > { %1292 = vmatpush1.bf16.msra.mxu0 %v3480_v47 }
 0x13b   : > { %1293 = vmatprep.subr.bf16.mxu0 %v3485_v48 }
 0x13e   : > { %1294 = vmatpush1.bf16.msra.mxu0 %v3483_v49 }
 0x13f   : > { %1295 = vmatprep.subr.bf16.mxu0 %v3488_v50 }
 0x142   : > { %1296 = vmatpush1.bf16.msra.mxu0 %v3486_v51 }
 0x143   : > { %1297 = vmatprep.subr.bf16.mxu0 %v3491_v52 }
 0x146   : > { %1298 = vmatpush1.bf16.msra.mxu0 %v3489_v53 }
 0x147   : > { %1299 = vmatprep.subr.bf16.mxu0 %v3494_v54 }
 0x14a   : > { %1300 = vmatpush1.bf16.msra.mxu0 %v3492_v55  ;;  %v1339_v55 = vld [vmem:[%s4483_s7 + $0x44] sm:$0xf] }
 0x14b   : > { %1301 = vmatprep.subr.bf16.mxu0 %v3497_v56  ;;  %v1322_v56 = vld [vmem:[%s4483_s7] sm:$0xf] }
 0x14e   : > { %1302 = vmatpush1.bf16.msra.mxu0 %v3495_v57  ;;  %v1323_v57 = vld [vmem:[%s4483_s7 + $0x4] sm:$0xf] }
 0x14f   : > { %1303 = vmatprep.subr.bf16.mxu0 %v3500_v58 }
 0x152   : > { %1304 = vmatpush1.bf16.msra.mxu0 %v3498_v59 }
 0x153   : > { %1305 = vmatprep.subr.bf16.mxu0 %v3503_v60 }
 0x156   : > { %1306 = vmatpush1.bf16.msra.mxu0 %v3501_v61 }
 0x157   : > { %1307 = vmatprep.subr.bf16.mxu0 %v3506_v62  ;;  %v1324_v62 = vld [vmem:[%s4483_s7 + $0x8] sm:$0xf] }
 0x15a   : > { %1308 = vmatpush1.bf16.msra.mxu0 %v3504_v63 }
 0x15b   : > { %1309 = vmatprep.subr.bf16.mxu0 %v3509_v0 }
 0x15e   : > { %1310 = vmatpush1.bf16.msra.mxu0 %v3507_v1  ;;  %v1338_v1 = vld [vmem:[%s4483_s7 + $0x40] sm:$0xf] }
 0x161   : > { %1312 = vmatmul.mubr.bf16.vlgmr.msra.gmra.mrb[4].mxu0 %v4499_v34 }
 0x1f4   : > { %v4503_v2 = vpop.f32.mrb[0].mxu0 }
 0x1f5   : > { %v4505_v3 = vpop.f32.mrb[1].mxu0 }
 0x1f6   : > { %v4507_v4 = vpop.f32.mrb[2].mxu0 }
 0x1f7   : > { %5225 = vst [vmem:[#allocation30_spill] sm:$0xff] %v4507_v4  ;;  %v4509_v5 = vpop.f32.mrb[3].mxu0 }
 0x234   : > { %v4517_v12 = vpop.f32.mrb[4].mxu0 }
 0x235   : > { %5226 = vst [vmem:[#allocation31_spill] sm:$0xff] %v4517_v12  ;;  %v1315_v15 = vpop.f32.mrb[5].mxu0 }
 0x236   : > { %v4519_v16 = vpop.f32.mrb[6].mxu0  ;;  %v1316_v18 = vadd.f32 %v1315_v15, %v696_v13 }
 0x237   : > { %5227 = vst [vmem:[#allocation32_spill] sm:$0xff] %v4519_v16  ;;  %v1319_v17 = vpop.f32.mrb[7].mxu0 }
 0x238   : > { %v1320_v19 = vadd.f32 %v1319_v17, %v696_v13 }
 0x23a   : > { %v1354_v21 = vpack.c.bf16 %v1320_v19, %v1316_v18  ;;  %v3222_v22 = vpack.c.bf16 %v1320_v19, %v1320_v19 }
 0x23c   : > { %v1363_v23 = vrot.slane %v1354_v21, %v1362_v20  ;;  %v1370_v24 = vrot.slane %v3222_v22, %v1362_v20  ;;  %v1341_v22 = vld [vmem:[%s4483_s7 + $0x4c] sm:$0xf] }
 0x23e   : > { %v1371_v25 = vcombine.high %v1363_v23, %v1363_v23  ;;  %v1379_v26 = vrot.slane %v1363_v23, %v1362_v20  ;;  %v1386_v27 = vrot.slane %v1370_v24, %v1362_v20  ;;  %v1372_v28 = vcombine.high %v1370_v24, %v1370_v24  ;;  %v1340_v23 = vld [vmem:[%s4483_s7 + $0x48] sm:$0xf] }
 0x240   : > { %v4522_v29 = vrot.slane %v1371_v25, %v1362_v20  ;;  %v1406_v30 = vunpack.i.h.s16 %v1379_v26  ;;  %v1414_v31 = vunpack.i.h.s16 %v1386_v27  ;;  %v3223_v32 = vpack.i.b16 %v1379_v26, %v1379_v26 }
 0x241   : > { %v3227_v33 = vpack.i.b16 %v1386_v27, %v1386_v27  ;;  %v4524_v34 = vrot.slane %v1372_v28, %v1362_v20  ;;  %v4535_v43 = vcombine.high %v1379_v26, %v1379_v26  ;;  %v4540_v50 = vcombine.high %v1386_v27, %v1386_v27 }
 0x242   : > { %v1422_v35 = vpack.i.b16 %v1406_v30, %v1406_v30  ;;  %v3224_v36 = vpack.i.b16 %v4522_v29, %v4522_v29  ;;  %v1430_v38 = vpack.i.b16 %v1414_v31, %v1414_v31  ;;  %v1440_v40 = vrot.slane %v3223_v32, %v4529_v37 }
 0x243   : > { %v1472_v39 = vrot.slane %v3227_v33, %v4529_v37  ;;  %v3228_v44 = vpack.i.b16 %v4524_v34, %v4524_v34  ;;  %v3225_v54 = vpack.i.b16 %v4535_v43, %v4535_v43  ;;  %v3229_v6 = vpack.i.b16 %v4540_v50, %v4540_v50  ;;  %v1327_v33 = vld [vmem:[%s4483_s7 + $0x14] sm:$0xf] }
 0x244   : > { %v1444_v41 = vrot.slane %v1422_v35, %v4529_v37  ;;  %v1476_v42 = vrot.slane %v1430_v38, %v4529_v37  ;;  %v1448_v45 = vrot.slane %v3224_v36, %v4529_v37  ;;  %v1502_v47 = vpack.i.b16 %v1440_v40, %v1440_v40  ;;  %v1326_v35 = vld [vmem:[%s4483_s7 + $0x10] sm:$0xf] }
 0x245   : > { %v1558_v46 = vpack.i.b16 %v1472_v39, %v1472_v39  ;;  %v1480_v59 = vrot.slane %v3228_v44, %v4529_v37  ;;  %v1408_v13 = vunpack.i.h.s16 %v4522_v29  ;;  %v1456_v17 = vrot.slane %v3225_v54, %v4529_v37  ;;  %v1343_v44 = vld [vmem:[%s4483_s7 + $0x54] sm:$0xf] }
 0x246   : > { %v1509_v48 = vpack.i.b16 %v1444_v41, %v1444_v41  ;;  %v1565_v49 = vpack.i.b16 %v1476_v42, %v1476_v42  ;;  %v1507_v52 = vrot.slane %v1502_v47, %v4529_v37  ;;  %v1516_v58 = vpack.i.b16 %v1448_v45, %v1448_v45 }
 0x247   : > { %v1563_v51 = vrot.slane %v1558_v46, %v4529_v37  ;;  %v1572_v15 = vpack.i.b16 %v1480_v59, %v1480_v59  ;;  %v1488_v24 = vrot.slane %v3229_v6, %v4529_v37  ;;  %v1416_v25 = vunpack.i.h.s16 %v4524_v34  ;;  %v1330_v6 = vld [vmem:[%s4483_s7 + $0x20] sm:$0xf] }
 0x248   : > { %v1514_v53 = vrot.slane %v1509_v48, %v4529_v37  ;;  %v3231_v61 = vcombine.low %v1507_v52, %v1507_v52  ;;  %v1570_v0 = vrot.slane %v1565_v49, %v4529_v37  ;;  %v1521_v20 = vrot.slane %v1516_v58, %v4529_v37  ;;  %v1342_v48 = vld [vmem:[%s4483_s7 + $0x50] sm:$0xf] }
 0x249   : > { %v3239_v60 = vcombine.low %v1563_v51, %v1563_v51  ;;  %v1577_v26 = vrot.slane %v1572_v15, %v4529_v37  ;;  %v1530_v27 = vpack.i.b16 %v1456_v17, %v1456_v17  ;;  %v1424_v28 = vpack.i.b16 %v1408_v13, %v1408_v13 }
 0x24a   : > { %v3232_v63 = vcombine.low %v1514_v53, %v1514_v53  ;;  %v1677_v9 = vadd.bf16 %v3231_v61, %v1322_v56  ;;  %v1678_v10 = vadd.bf16 %v3231_v61, %v1323_v57  ;;  %v3240_v19 = vcombine.low %v1570_v0, %v1570_v0  ;;  %v1331_v61 = vld [vmem:[%s4483_s7 + $0x24] sm:$0xf] }
 0x24b   : > { %v1694_v8 = vadd.bf16 %v3239_v60, %v1339_v55  ;;  %v1693_v18 = vadd.bf16 %v3239_v60, %v1338_v1  ;;  %v3233_v31 = vcombine.low %v1521_v20, %v1521_v20  ;;  %v1586_v36 = vpack.i.b16 %v1488_v24, %v1488_v24  ;;  %v1347_v20 = vld [vmem:[%s4483_s7 + $0x64] sm:$0xf]  ;;  %v1346_v24 = vld [vmem:[%s4483_s7 + $0x60] sm:$0xf] }
 0x24c   : > { %v1679_v14 = vadd.bf16 %v3232_v63, %v1324_v62  ;;  %v1680_v21 = vadd.bf16 %v3232_v63, %v1325_v11  ;;  %v1696_v30 = vadd.bf16 %v3240_v19, %v1341_v22  ;;  %v1695_v32 = vadd.bf16 %v3240_v19, %v1340_v23 }
 0x24d   : > { %3598 = vtanh.bf16 %v1694_v8  ;;  %v1410_v38 = vunpack.i.h.s16 %v4535_v43  ;;  %v3241_v39 = vcombine.low %v1577_v26, %v1577_v26  ;;  %v1535_v40 = vrot.slane %v1530_v27, %v4529_v37  ;;  %v4577_v43 = vld [vmem:[%s5161_s8] ss:$0 sm:$0xff] }
 0x24e   : > { %3600 = vtanh.bf16 %v1677_v9  ;;  %v1432_v41 = vpack.i.b16 %v1416_v25, %v1416_v25  ;;  %v1682_v42 = vadd.bf16 %v3233_v31, %v1327_v33  ;;  %v1452_v45 = vrot.slane %v1424_v28, %v4529_v37 }
 0x24f   : > { %3602 = vtanh.bf16 %v1678_v10  ;;  %v1681_v46 = vadd.bf16 %v3233_v31, %v1326_v35  ;;  %v1418_v47 = vunpack.i.h.s16 %v4540_v50  ;;  %v1591_v49 = vrot.slane %v1586_v36, %v4529_v37 }
 0x250   : > { %3604 = vtanh.bf16 %v1679_v14  ;;  %v1426_v52 = vpack.i.b16 %v1410_v38, %v1410_v38  ;;  %v1698_v53 = vadd.bf16 %v3241_v39, %v1343_v44  ;;  %v3235_v54 = vcombine.low %v1535_v40, %v1535_v40  ;;  %v1329_v38 = vld [vmem:[%s4483_s7 + $0x1c] sm:$0xf] }
 0x251   : > { %3606 = vtanh.bf16 %v1693_v18  ;;  %v1523_v57 = vpack.i.b16 %v1452_v45, %v1452_v45  ;;  %v1484_v50 = vrot.slane %v1432_v41, %v4529_v37  ;;  %v1697_v60 = vadd.bf16 %v3241_v39, %v1342_v48  ;;  %v1328_v41 = vld [vmem:[%s4483_s7 + $0x18] sm:$0xf] }
 0x252   : > { %3608 = vtanh.bf16 %v1680_v21  ;;  %v4583_v63 = vcombine.high %v4522_v29, %v4522_v29  ;;  %v1434_v0 = vpack.i.b16 %v1418_v47, %v1418_v47  ;;  %v3243_v8 = vcombine.low %v1591_v49, %v1591_v49 }
 0x253   : > { %3610 = vtanh.bf16 %v1696_v30  ;;  %v1460_v14 = vrot.slane %v1426_v52, %v4529_v37  ;;  %v1686_v17 = vadd.bf16 %v3235_v54, %v1331_v61  ;;  %v1528_v29 = vrot.slane %v1523_v57, %v4529_v37 }
 0x254   : > { %3612 = vtanh.bf16 %v1695_v32  ;;  %v1579_v18 = vpack.i.b16 %v1484_v50, %v1484_v50  ;;  %v1685_v19 = vadd.bf16 %v3235_v54, %v1330_v6  ;;  %v4593_v21 = vcombine.high %v4524_v34, %v4524_v34 }
 0x255   : > { %3614 = vtanh.bf16 %v1682_v42  ;;  %v1492_v25 = vrot.slane %v1434_v0, %v4529_v37  ;;  %v1537_v30 = vpack.i.b16 %v1460_v14, %v1460_v14  ;;  %v3226_v31 = vpack.i.b16 %v4583_v63, %v4583_v63 }
 0x256   : > { %3616 = vtanh.bf16 %v1681_v46  ;;  %v1702_v34 = vadd.bf16 %v3243_v8, %v1347_v20  ;;  %v3234_v33 = vcombine.low %v1528_v29, %v1528_v29  ;;  %v1584_v35 = vrot.slane %v1579_v18, %v4529_v37 }
 0x257   : > { %3618 = vtanh.bf16 %v1698_v53  ;;  %v1701_v36 = vadd.bf16 %v3243_v8, %v1346_v24  ;;  %v1593_v42 = vpack.i.b16 %v1492_v25, %v1492_v25  ;;  %v3230_v44 = vpack.i.b16 %v4593_v21, %v4593_v21  ;;  %v1349_v25 = vld [vmem:[%s4483_s7 + $0x6c] sm:$0xf] }
 0x258   : > { %v3599_v51 = vpop.eup %3598  ;;  %3620 = vtanh.bf16 %v1697_v60  ;;  %v1542_v48 = vrot.slane %v1537_v30, %v4529_v37  ;;  %v1464_v49 = vrot.slane %v3226_v31, %v4529_v37  ;;  %v1684_v52 = vadd.bf16 %v3234_v33, %v1329_v38 }
 0x259   : > { %v3601_v55 = vpop.eup %3600  ;;  %v1758_v56 = vunpack.c.l.bf16 %v3599_v51  ;;  %3622 = vtanh.bf16 %v1686_v17  ;;  %v3242_v53 = vcombine.low %v1584_v35, %v1584_v35  ;;  %v1412_v54 = vunpack.i.h.s16 %v4583_v63  ;;  %v1332_v17 = vld [vmem:[%s4483_s7 + $0x28] sm:$0xf] }
 0x25a   : > { %v3603_v58 = vpop.eup %3602  ;;  %v1741_v59 = vunpack.c.l.bf16 %v3601_v55  ;;  %3624 = vtanh.bf16 %v1685_v19  ;;  %v1683_v55 = vadd.bf16 %v3234_v33, %v1328_v41  ;;  %v1496_v60 = vrot.slane %v3230_v44, %v4529_v37 }
 0x25b   : > { %v3605_v62 = vpop.eup %3604  ;;  %v1797_v1 = vmul.f32 %v4577_v43, %v1758_v56  ;;  %v1742_v11 = vunpack.c.l.bf16 %v3603_v58  ;;  %3626 = vtanh.bf16 %v1702_v34  ;;  %v1345_v56 = vld [vmem:[%s4483_s7 + $0x5c] sm:$0xf]  ;;  %v1344_v58 = vld [vmem:[%s4483_s7 + $0x58] sm:$0xf]  ;;  %v1544_v63 = vpack.i.b16 %v1464_v49, %v1464_v49 }
 0x25c   : > { %v3607_v9 = vpop.eup %3606  ;;  %v1780_v10 = vmul.f32 %v4577_v43, %v1741_v59  ;;  %v1743_v13 = vunpack.c.l.bf16 %v3605_v62  ;;  %3628 = vtanh.bf16 %v1701_v36  ;;  %v1598_v59 = vrot.slane %v1593_v42, %v4529_v37 }
 0x25d   : > { %v3609_v15 = vpop.eup %3608  ;;  %1846 = vadd.xlane.f32.xlu1 %v1797_v1  ;;  %v1781_v27 = vmul.f32 %v4577_v43, %v1742_v11  ;;  %v1757_v28 = vunpack.c.l.bf16 %v3607_v9  ;;  %v3236_v1 = vcombine.low %v1542_v48, %v1542_v48  ;;  %3630 = vtanh.bf16 %v1684_v52  ;;  %v1334_v48 = vld [vmem:[%s4483_s7 + $0x30] sm:$0xf] }
 0x25e   : > { %1812 = vadd.xlane.f32.xlu0 %v1780_v10  ;;  %v1782_v22 = vmul.f32 %v4577_v43, %v1743_v13  ;;  %v1744_v23 = vunpack.c.l.bf16 %v3609_v15  ;;  %v3611_v26 = vpop.eup %3610  ;;  %v1700_v8 = vadd.bf16 %v3242_v53, %v1345_v56  ;;  %v1428_v9 = vpack.i.b16 %v1412_v54, %v1412_v54  ;;  %v1333_v13 = vld [vmem:[%s4483_s7 + $0x2c] sm:$0xf] }
 0x25f   : > { %v3613_v32 = vpop.eup %3612  ;;  %v1760_v40 = vunpack.c.l.bf16 %v3611_v26  ;;  %v1796_v46 = vmul.f32 %v4577_v43, %v1757_v28  ;;  %v1420_v10 = vunpack.i.h.s16 %v4593_v21  ;;  %3632 = vtanh.bf16 %v1683_v55 }
 0x260   : > { %v1783_v39 = vmul.f32 %v4577_v43, %v1744_v23  ;;  %v3615_v45 = vpop.eup %3614  ;;  %v1759_v47 = vunpack.c.l.bf16 %v3613_v32  ;;  %v1699_v11 = vadd.bf16 %v3242_v53, %v1344_v58  ;;  %v1600_v29 = vpack.i.b16 %v1496_v60, %v1496_v60  ;;  %v1348_v32 = vld [vmem:[%s4483_s7 + $0x68] sm:$0xf]  ;;  %v1351_v58 = vld [vmem:[%s4483_s7 + $0x74] sm:$0xf] }
 0x261   : > { %1816 = vadd.xlane.f32.xlu1 %v1782_v22  ;;  %v3617_v51 = vpop.eup %3616  ;;  %v1799_v57 = vmul.f32 %v4577_v43, %v1760_v40  ;;  %v1746_v50 = vunpack.c.l.bf16 %v3615_v45  ;;  %v3244_v22 = vcombine.low %v1598_v59, %v1598_v59  ;;  %v1549_v23 = vrot.slane %v1544_v63, %v4529_v37  ;;  %v1335_v40 = vld [vmem:[%s4483_s7 + $0x34] sm:$0xf] }
 0x262   : > { %1814 = vadd.xlane.f32.xlu0 %v1781_v27  ;;  %v3619_v61 = vpop.eup %3618  ;;  %v1798_v62 = vmul.f32 %v4577_v43, %v1759_v47  ;;  %v1745_v0 = vunpack.c.l.bf16 %v3617_v51  ;;  %3634 = vtanh.bf16 %v1700_v8  ;;  %v1688_v21 = vadd.bf16 %v3236_v1, %v1333_v13 }
 0x263   : > { %v3621_v6 = vpop.eup %3620  ;;  %v1785_v14 = vmul.f32 %v4577_v43, %v1746_v50  ;;  %v1762_v15 = vunpack.c.l.bf16 %v3619_v61  ;;  %v1468_v26 = vrot.slane %v1428_v9, %v4529_v37  ;;  %v1436_v27 = vpack.i.b16 %v1420_v10, %v1420_v10  ;;  %v1350_v61 = vld [vmem:[%s4483_s7 + $0x70] sm:$0xf] }
 0x264   : > { %v3623_v18 = vpop.eup %3622  ;;  %v1784_v19 = vmul.f32 %v4577_v43, %v1745_v0  ;;  %v1761_v20 = vunpack.c.l.bf16 %v3621_v6  ;;  %3636 = vtanh.bf16 %v1699_v11  ;;  %v1687_v28 = vadd.bf16 %v3236_v1, %v1332_v17  ;;  %v1337_v11 = vld [vmem:[%s4483_s7 + $0x3c] sm:$0xf] }
 0x265   : > { %1818 = vadd.xlane.f32.xlu1 %v1783_v39  ;;  %v3625_v24 = vpop.eup %3624  ;;  %v1801_v30 = vmul.f32 %v4577_v43, %v1762_v15  ;;  %v1750_v31 = vunpack.c.l.bf16 %v3623_v18  ;;  %v1704_v36 = vadd.bf16 %v3244_v22, %v1349_v25  ;;  %v3237_v38 = vcombine.low %v1549_v23, %v1549_v23  ;;  %v1336_v15 = vld [vmem:[%s4483_s7 + $0x38] sm:$0xf] }
 0x266   : > { %1844 = vadd.xlane.f32.xlu0 %v1796_v46  ;;  %v3627_v34 = vpop.eup %3626  ;;  %v1800_v33 = vmul.f32 %v4577_v43, %v1761_v20  ;;  %v1749_v35 = vunpack.c.l.bf16 %v3625_v24  ;;  %3638 = vtanh.bf16 %v1688_v21  ;;  %v1605_v41 = vrot.slane %v1600_v29, %v4529_v37  ;;  %v1353_v24 = vld [vmem:[%s4483_s7 + $0x7c] sm:$0xf] }
 0x267   : > { %v3629_v39 = vpop.eup %3628  ;;  %v1551_v42 = vpack.i.b16 %v1468_v26, %v1468_v26  ;;  %v1500_v44 = vrot.slane %v1436_v27, %v4529_v37  ;;  %3640 = vtanh.bf16 %v1687_v28  ;;  %v1703_v45 = vadd.bf16 %v3244_v22, %v1348_v32  ;;  %v1352_v26 = vld [vmem:[%s4483_s7 + $0x78] sm:$0xf]  ;;  %s4094_s7 = smov [#allocation15]  }
 0x268   : > { %v1789_v46 = vmul.f32 %v4577_v43, %v1750_v31  ;;  %v1766_v47 = vunpack.c.l.bf16 %v3627_v34  ;;  %v3631_v49 = vpop.eup %3630  ;;  %v1788_v51 = vmul.f32 %v4577_v43, %v1749_v35  ;;  %v1765_v52 = vunpack.c.l.bf16 %v3629_v39  ;;  %s3968_s29 = sshll.u32 %s4094_s7, 4  ;;  %s3969_s29 = int_to_ptr.vmem [resolvable:$false] %s3968_s29 }
 0x269   : > { %1850 = vadd.xlane.f32.xlu1 %v1799_v57  ;;  %v1690_v53 = vadd.bf16 %v3237_v38, %v1335_v40  ;;  %3642 = vtanh.bf16 %v1704_v36  ;;  %v3245_v55 = vcombine.low %v1605_v41, %v1605_v41  ;;  %v1556_v56 = vrot.slane %v1551_v42, %v4529_v37  ;;  %s3970_s11 = scalar_lea.vmem %s3969_s29, 512 }
 0x26a   : > { %1848 = vadd.xlane.f32.xlu0 %v1798_v62  ;;  %v3633_v54 = vpop.eup %3632  ;;  %v1607_v57 = vpack.i.b16 %v1500_v44, %v1500_v44  ;;  %3644 = vtanh.bf16 %v1703_v45  ;;  %v1689_v50 = vadd.bf16 %v3237_v38, %v1334_v48  ;;  %v1805_v59 = vmul.f32 %v4577_v43, %v1766_v47 }
 0x26b   : > { %v1748_v60 = vunpack.c.l.bf16 %v3631_v49  ;;  %v1804_v0 = vmul.f32 %v4577_v43, %v1765_v52  ;;  %v1747_v1 = vunpack.c.l.bf16 %v3633_v54  ;;  %3646 = vtanh.bf16 %v1690_v53 }
 0x26c   : > { %v1706_v6 = vadd.bf16 %v3245_v55, %v1351_v58  ;;  %v3238_v8 = vcombine.low %v1556_v56, %v1556_v56  ;;  %v1612_v9 = vrot.slane %v1607_v57, %v4529_v37  ;;  %3648 = vtanh.bf16 %v1689_v50 }
 0x26d   : > { %1822 = vadd.xlane.f32.xlu1 %v1785_v14  ;;  %v3635_v62 = vpop.eup %3634  ;;  %v1705_v10 = vadd.bf16 %v3245_v55, %v1350_v61  ;;  %v1787_v13 = vmul.f32 %v4577_v43, %v1748_v60  ;;  %v1786_v29 = vmul.f32 %v4577_v43, %v1747_v1 }
 0x26e   : > { %1820 = vadd.xlane.f32.xlu0 %v1784_v19  ;;  %v1764_v14 = vunpack.c.l.bf16 %v3635_v62  ;;  %3650 = vtanh.bf16 %v1706_v6  ;;  %v1692_v20 = vadd.bf16 %v3238_v8, %v1337_v11  ;;  %v3246_v22 = vcombine.low %v1612_v9, %v1612_v9  ;;  %v3522_v6 = vld [vmem:[#allocation11 + $0xc] ss:$24 sps:$4 sm:$0xff]   ;;  %v3526_v9 = vld [vmem:[#allocation11 + $0x3c] ss:$24 sps:$4 sm:$0xff]  }
 0x26f   : > { %v3637_v63 = vpop.eup %3636  ;;  %3652 = vtanh.bf16 %v1705_v10  ;;  %v1691_v23 = vadd.bf16 %v3238_v8, %v1336_v15  ;;  %1236 = vmatprep.subr.bf16.mxu1 %v3522_v6  ;;  %v3525_v8 = vld [vmem:[#allocation11 + $0x8] ss:$24 sps:$4 sm:$0xff]   ;;  %v3529_v10 = vld [vmem:[#allocation11 + $0x38] ss:$24 sps:$4 sm:$0xff]   ;;  %v3530_v11 = vld [vmem:[#allocation11 + $0x6c] ss:$24 sps:$4 sm:$0xff]  }
 0x270   : > { %v1763_v18 = vunpack.c.l.bf16 %v3637_v63  ;;  %v1803_v21 = vmul.f32 %v4577_v43, %v1764_v14  ;;  %3654 = vtanh.bf16 %v1692_v20  ;;  %v1708_v32 = vadd.bf16 %v3246_v22, %v1353_v24  ;;  %1237 = vmatpush1.bf16.msra.mxu1 %v3525_v8  ;;  %v3534_v14 = vld [vmem:[#allocation11 + $0x9c] ss:$24 sps:$4 sm:$0xff]   ;;  %v3537_v15 = vld [vmem:[#allocation11 + $0x98] ss:$24 sps:$4 sm:$0xff]   ;;  %v3546_v20 = vld [vmem:[#allocation11 + $0x128] ss:$24 sps:$4 sm:$0xff]  }
 0x271   : > { %1854 = vadd.xlane.f32.xlu1 %v1801_v30  ;;  %v3639_v17 = vpop.eup %3638  ;;  %3656 = vtanh.bf16 %v1691_v23  ;;  %v1707_v34 = vadd.bf16 %v3246_v22, %v1352_v26  ;;  %1238 = vmatprep.subr.bf16.mxu1 %v3526_v9  ;;  %v3547_v22 = vld [vmem:[#allocation11 + $0x15c] ss:$24 sps:$4 sm:$0xff]   ;;  %v3549_v23 = vld [vmem:[#allocation11 + $0x158] ss:$24 sps:$4 sm:$0xff]   ;;  %v3552_v26 = vld [vmem:[#allocation11 + $0x188] ss:$24 sps:$4 sm:$0xff]  }
 0x272   : > { %1852 = vadd.xlane.f32.xlu0 %v1800_v33  ;;  %v3641_v19 = vpop.eup %3640  ;;  %v1752_v25 = vunpack.c.l.bf16 %v3639_v17  ;;  %v1802_v28 = vmul.f32 %v4577_v43, %v1763_v18  ;;  %3658 = vtanh.bf16 %v1708_v32  ;;  %v3538_v17 = vld [vmem:[#allocation11 + $0xcc] ss:$24 sps:$4 sm:$0xff]   ;;  %v3543_v18 = vld [vmem:[#allocation11 + $0xf8] ss:$24 sps:$4 sm:$0xff]  }
 0x273   : > { %v1751_v30 = vunpack.c.l.bf16 %v3641_v19  ;;  %3660 = vtanh.bf16 %v1707_v34  ;;  %v3544_v19 = vld [vmem:[#allocation11 + $0x12c] ss:$24 sps:$4 sm:$0xff]  }
 0x274   : > { %v3643_v27 = vpop.eup %3642  ;;  %v1791_v33 = vmul.f32 %v4577_v43, %v1752_v25  ;;  %1239 = vmatpush1.bf16.msra.mxu1 %v3529_v10  ;;  %v3550_v25 = vld [vmem:[#allocation11 + $0x18c] ss:$24 sps:$4 sm:$0xff]  }
 0x275   : > { %1830 = vadd.xlane.f32.xlu1 %v1789_v46  ;;  %v3645_v31 = vpop.eup %3644  ;;  %v1768_v35 = vunpack.c.l.bf16 %v3643_v27  ;;  %v1790_v38 = vmul.f32 %v4577_v43, %v1751_v30  ;;  %1240 = vmatprep.subr.bf16.mxu1 %v3530_v11  ;;  %v4660_v27 = vstv %s1876_s25  ;;  %v3562_v8 = vld [vmem:[#allocation11 + $0x24c] ss:$24 sps:$4 sm:$0xff]  }
 0x276   : > { %1828 = vadd.xlane.f32.xlu0 %v1788_v51  ;;  %v3647_v36 = vpop.eup %3646  ;;  %v1767_v39 = vunpack.c.l.bf16 %v3645_v31  ;;  %v3553_v31 = vld [vmem:[#allocation11 + $0x1bc] ss:$24 sps:$4 sm:$0xff]  }
 0x277   : > { %v3649_v40 = vpop.eup %3648  ;;  %v1807_v41 = vmul.f32 %v4577_v43, %v1768_v35  ;;  %v1754_v42 = vunpack.c.l.bf16 %v3647_v36 }
 0x278   : > { %v1806_v45 = vmul.f32 %v4577_v43, %v1767_v39  ;;  %v1753_v46 = vunpack.c.l.bf16 %v3649_v40 }
 0x279   : > { %1862 = vadd.xlane.f32.xlu1 %v1805_v59  ;;  %v3651_v44 = vpop.eup %3650  ;;  %v1793_v48 = vmul.f32 %v4577_v43, %v1754_v42 }
 0x27a   : > { %1860 = vadd.xlane.f32.xlu0 %v1804_v0  ;;  %v3653_v47 = vpop.eup %3652  ;;  %v1770_v49 = vunpack.c.l.bf16 %v3651_v44  ;;  %v1792_v52 = vmul.f32 %v4577_v43, %v1753_v46  ;;  %v3558_v46 = vld [vmem:[#allocation11 + $0x1e8] ss:$24 sps:$4 sm:$0xff]  }
 0x27b   : > { %v3655_v51 = vpop.eup %3654  ;;  %v1769_v53 = vunpack.c.l.bf16 %v3653_v47 }
 0x27c   : > { %v3657_v54 = vpop.eup %3656  ;;  %v1809_v55 = vmul.f32 %v4577_v43, %v1770_v49  ;;  %v1756_v56 = vunpack.c.l.bf16 %v3655_v51 }
 0x27d   : > { %1826 = vadd.xlane.f32.xlu1 %v1787_v13  ;;  %v3659_v57 = vpop.eup %3658  ;;  %v1808_v50 = vmul.f32 %v4577_v43, %v1769_v53  ;;  %v1755_v58 = vunpack.c.l.bf16 %v3657_v54  ;;  %v3533_v13 = vld [vmem:[#allocation11 + $0x68] ss:$24 sps:$4 sm:$0xff]  }
 0x27e   : > { %1824 = vadd.xlane.f32.xlu0 %v1786_v29  ;;  %v3661_v59 = vpop.eup %3660  ;;  %v1795_v60 = vmul.f32 %v4577_v43, %v1756_v56  ;;  %v1772_v61 = vunpack.c.l.bf16 %v3659_v57  ;;  %1241 = vmatpush1.bf16.msra.mxu1 %v3533_v13  ;;  %v3541_v29 = vld [vmem:[#allocation11 + $0xfc] ss:$24 sps:$4 sm:$0xff]  }
 0x27f   : > { %v1794_v62 = vmul.f32 %v4577_v43, %v1755_v58  ;;  %v1771_v0 = vunpack.c.l.bf16 %v3661_v59  ;;  %1242 = vmatprep.subr.bf16.mxu1 %v3534_v14  ;;  %v3561_v58 = vld [vmem:[#allocation11 + $0x218] ss:$24 sps:$4 sm:$0xff]   ;;  %v3564_v14 = vld [vmem:[#allocation11 + $0x248] ss:$24 sps:$4 sm:$0xff]  }
 0x280   : > { %v1811_v1 = vmul.f32 %v4577_v43, %v1772_v61 }
 0x281   : > { %1858 = vadd.xlane.f32.xlu1 %v1803_v21  ;;  %v1810_v63 = vmul.f32 %v4577_v43, %v1771_v0  ;;  %v3540_v43 = vld [vmem:[#allocation11 + $0xc8] ss:$24 sps:$4 sm:$0xff]  }
 0x282   : > { %1856 = vadd.xlane.f32.xlu0 %v1802_v28  ;;  %1243 = vmatpush1.bf16.msra.mxu1 %v3537_v15 }
 0x283   : > { %1244 = vmatprep.subr.bf16.mxu1 %v3538_v17 }
 0x285   : > { %1834 = vadd.xlane.f32.xlu1 %v1791_v33  ;;  %v3555_v33 = vld [vmem:[#allocation11 + $0x1b8] ss:$24 sps:$4 sm:$0xff]  }
 0x286   : > { %1832 = vadd.xlane.f32.xlu0 %v1790_v38  ;;  %1245 = vmatpush1.bf16.msra.mxu1 %v3540_v43 }
 0x287   : > { %1246 = vmatprep.subr.bf16.mxu1 %v3541_v29 }
 0x289   : > { %1866 = vadd.xlane.f32.xlu1 %v1807_v41  ;;  %v3556_v41 = vld [vmem:[#allocation11 + $0x1ec] ss:$24 sps:$4 sm:$0xff]  }
 0x28a   : > { %1864 = vadd.xlane.f32.xlu0 %v1806_v45  ;;  %1247 = vmatpush1.bf16.msra.mxu1 %v3543_v18 }
 0x28b   : > { %1248 = vmatprep.subr.bf16.mxu1 %v3544_v19 }
 0x28d   : > { %1838 = vadd.xlane.f32.xlu1 %v1793_v48 }
 0x28e   : > { %1836 = vadd.xlane.f32.xlu0 %v1792_v52  ;;  %1249 = vmatpush1.bf16.msra.mxu1 %v3546_v20 }
 0x28f   : > { %1250 = vmatprep.subr.bf16.mxu1 %v3547_v22 }
 0x291   : > { %1870 = vadd.xlane.f32.xlu1 %v1809_v55  ;;  %v3559_v55 = vld [vmem:[#allocation11 + $0x21c] ss:$24 sps:$4 sm:$0xff]  }
 0x292   : > { %1868 = vadd.xlane.f32.xlu0 %v1808_v50  ;;  %1251 = vmatpush1.bf16.msra.mxu1 %v3549_v23 }
 0x293   : > { %1252 = vmatprep.subr.bf16.mxu1 %v3550_v25 }
 0x295   : > { %1842 = vadd.xlane.f32.xlu1 %v1795_v60 }
 0x296   : > { %1840 = vadd.xlane.f32.xlu0 %v1794_v62  ;;  %1253 = vmatpush1.bf16.msra.mxu1 %v3552_v26 }
 0x297   : > { %1254 = vmatprep.subr.bf16.mxu1 %v3553_v31 }
 0x299   : > { %1874 = vadd.xlane.f32.xlu1 %v1811_v1 }
 0x29a   : > { %1872 = vadd.xlane.f32.xlu0 %v1810_v63  ;;  %1255 = vmatpush1.bf16.msra.mxu1 %v3555_v33 }
 0x29b   : > { %1256 = vmatprep.subr.bf16.mxu1 %v3556_v41 }
 0x29e   : > { %1257 = vmatpush1.bf16.msra.mxu1 %v3558_v46 }
 0x29f   : > { %1258 = vmatprep.subr.bf16.mxu1 %v3559_v55 }
 0x2a2   : > { %1259 = vmatpush1.bf16.msra.mxu1 %v3561_v58 }
 0x2a3   : > { %1260 = vmatprep.subr.bf16.mxu1 %v3562_v8  ;;  %v3573_v8 = vld [vmem:[#allocation11 + $0x2d8] ss:$24 sps:$4 sm:$0xff]  }
 0x2a6   : > { %1261 = vmatpush1.bf16.msra.mxu1 %v3564_v14 }
 0x2ea   : > { %v1847_v24 = vpop.xlane.xlu1 %1846 }
 0x2eb   : > { %v1813_v21 = vpop.xlane.xlu0 %1812  ;;  %v4677_v42 = vadd.f32 %v4660_v27, %v1847_v24  ;;  %v3565_v24 = vld [vmem:[#allocation11 + $0x27c] ss:$24 sps:$4 sm:$0xff]  }
 0x2ec   : > { %v4663_v32 = vadd.f32 %v4660_v27, %v1813_v21  ;;  %1262 = vmatprep.subr.bf16.mxu1 %v3565_v24  ;;  %v3786_v24 = vld [vmem:[%s4468_s27] ss:$8 sps:$4 sm:$0xff]   ;;  %s2905_s27 = sshll.u32 %s565_s14, 4  ;;  %s5076_s27 = int_to_ptr.vmem [resolvable:$true] %s2905_s27 }
 0x2ed   : > { %p3971_p4 = scmp.lt.s32.totalorder %s5076_s27, %s3969_s29 }
 0x2ee   : > { %v1817_v28 = vpop.xlane.xlu1 %1816 }
 0x2ef   : > { %v1815_v30 = vpop.xlane.xlu0 %1814  ;;  %v4671_v38 = vadd.f32 %v4660_v27, %v1817_v28 }
 0x2f0   : > { %v4666_v34 = vadd.f32 %v4660_v27, %v1815_v30  ;;  %v3567_v30 = vld [vmem:[#allocation11 + $0x278] ss:$24 sps:$4 sm:$0xff]  }
 0x2f1   : > { %1263 = vmatpush1.bf16.msra.mxu1 %v3567_v30 }
 0x2f2   : > { %v1910_v35 = vmax.f32 %v4663_v32, %v4666_v34  ;;  %v1819_v36 = vpop.xlane.xlu1 %1818 }
 0x2f3   : > { %v1845_v39 = vpop.xlane.xlu0 %1844  ;;  %v4674_v40 = vadd.f32 %v4660_v27, %v1819_v36 }
 0x2f4   : > { %v1911_v44 = vrot.slane %v1910_v35, 4  ;;  %v4680_v45 = vadd.f32 %v4660_v27, %v1845_v39 }
 0x2f5   : > { %v1917_v47 = vmax.f32 %v4671_v38, %v4674_v40 }
 0x2f6   : > { %v1912_v48 = vmax.f32 %v1910_v35, %v1911_v44  ;;  %v1966_v49 = vmax.f32 %v4680_v45, %v4677_v42  ;;  %v1851_v51 = vpop.xlane.xlu1 %1850 }
 0x2f7   : > { %v1918_v52 = vrot.slane %v1917_v47, 4  ;;  %v1849_v53 = vpop.xlane.xlu0 %1848  ;;  %v4687_v54 = vadd.f32 %v4660_v27, %v1851_v51 }
 0x2f8   : > { %v1913_v56 = vrot.slane %v1912_v48, 2  ;;  %v1967_v57 = vrot.slane %v1966_v49, 4  ;;  %v4690_v50 = vadd.f32 %v4660_v27, %v1849_v53 }
 0x2f9   : > { %v1919_v59 = vmax.f32 %v1917_v47, %v1918_v52  ;;  %v3570_v52 = vld [vmem:[#allocation11 + $0x2a8] ss:$24 sps:$4 sm:$0xff]  }
 0x2fa   : > { %v1914_v60 = vmax.f32 %v1912_v48, %v1913_v56  ;;  %v1968_v61 = vmax.f32 %v1966_v49, %v1967_v57  ;;  %v1973_v62 = vmax.f32 %v4690_v50, %v4687_v54  ;;  %v1823_v0 = vpop.xlane.xlu1 %1822  ;;  %v3568_v48 = vld [vmem:[#allocation11 + $0x2ac] ss:$24 sps:$4 sm:$0xff]  }
 0x2fb   : > { %v1920_v1 = vrot.slane %v1919_v59, 2  ;;  %v4695_v63 = vadd.f32 %v4660_v27, %v1823_v0  ;;  %v1821_v6 = vpop.xlane.xlu0 %1820  ;;  %1264 = vmatprep.subr.bf16.mxu1 %v3568_v48  ;;  %v3571_v0 = vld [vmem:[#allocation11 + $0x2dc] ss:$24 sps:$4 sm:$0xff]  }
 0x2fc   : > { %v1915_v9 = vrot.slane %v1914_v60, 1  ;;  %v1969_v10 = vrot.slane %v1968_v61, 2  ;;  %v1974_v11 = vrot.slane %v1973_v62, 4  ;;  %v4698_v13 = vadd.f32 %v4660_v27, %v1821_v6  ;;  %1265 = vmatpush1.bf16.msra.mxu1 %v3570_v52 }
 0x2fd   : > { %v1921_v15 = vmax.f32 %v1919_v59, %v1920_v1  ;;  %1266 = vmatprep.subr.bf16.mxu1 %v3571_v0 }
 0x2fe   : > { %v1916_v17 = vmax.f32 %v1914_v60, %v1915_v9  ;;  %v1970_v43 = vmax.f32 %v1968_v61, %v1969_v10  ;;  %v1975_v29 = vmax.f32 %v1973_v62, %v1974_v11  ;;  %v1924_v18 = vmax.f32 %v4698_v13, %v4695_v63  ;;  %v1855_v19 = vpop.xlane.xlu1 %1854 }
 0x2ff   : > { %v1922_v20 = vrot.slane %v1921_v15, 1  ;;  %v4703_v22 = vadd.f32 %v4660_v27, %v1855_v19  ;;  %v1853_v23 = vpop.xlane.xlu0 %1852 }
 0x300   : > { %v2022_v21 = vsub.f32 %v4663_v32, %v1916_v17  ;;  %v2023_v25 = vsub.f32 %v4666_v34, %v1916_v17  ;;  %v1971_v26 = vrot.slane %v1970_v43, 1  ;;  %v1976_v28 = vrot.slane %v1975_v29, 2  ;;  %1267 = vmatpush1.bf16.msra.mxu1 %v3573_v8 }
 0x301   : > { %v1923_v31 = vmax.f32 %v1921_v15, %v1922_v20  ;;  %v1925_v33 = vrot.slane %v1924_v18, 4  ;;  %v4708_v35 = vadd.f32 %v4660_v27, %v1853_v23 }
 0x302   : > { %v2054_v36 = vmul.f32 1.442695, %v2022_v21  ;;  %v2056_v39 = vmul.f32 1.442695, %v2023_v25  ;;  %v1972_v41 = vmax.f32 %v1970_v43, %v1971_v26  ;;  %v1977_v44 = vmax.f32 %v1975_v29, %v1976_v28  ;;  %v1831_v46 = vpop.xlane.xlu1 %1830  ;;  %v3576_v21 = vld [vmem:[#allocation12 + $0x4] ss:$8 sps:$4 sm:$0xff]  }
 0x303   : > { %v1926_v47 = vmax.f32 %v1924_v18, %v1925_v33  ;;  %v1980_v32 = vmax.f32 %v4708_v35, %v4703_v22  ;;  %v1829_v34 = vpop.xlane.xlu0 %1828  ;;  %v2024_v56 = vsub.f32 %v4671_v38, %v1923_v31  ;;  %v2025_v57 = vsub.f32 %v4674_v40, %v1923_v31  ;;  %1269 = vmatmul.mubr.bf16.vlgmr.msra.gmra.mrb[0].mxu1 %v3786_v24  ;;  %v3574_v33 = vld [vmem:[#allocation12] ss:$8 sps:$4 sm:$0xff]  }
 0x304   : > { %3662 = vpow2.f32 %v2054_v36  ;;  %v2038_v49 = vsub.f32 %v4680_v45, %v1972_v41  ;;  %v2039_v51 = vsub.f32 %v4677_v42, %v1972_v41  ;;  %v1978_v53 = vrot.slane %v1977_v44, 1  ;;  %2797 = vmatprep.subr.bf16.mxu1 %v3576_v21 }
 0x305   : > { %3664 = vpow2.f32 %v2056_v39  ;;  %v1927_v55 = vrot.slane %v1926_v47, 2  ;;  %v1981_v58 = vrot.slane %v1980_v32, 4  ;;  %v4717_v62 = vadd.f32 %v4660_v27, %v1831_v46  ;;  %2798 = vmatpush1.bf16.msra.mxu1 %v3574_v33 }
 0x306   : > { %v1863_v59 = vpop.xlane.xlu1 %1862  ;;  %v2086_v60 = vmul.f32 1.442695, %v2038_v49  ;;  %v4720_v45 = vadd.f32 %v4660_v27, %v1829_v34  ;;  %v2088_v1 = vmul.f32 1.442695, %v2039_v51  ;;  %v1979_v9 = vmax.f32 %v1977_v44, %v1978_v53  ;;  %v3579_v34 = vld [vmem:[#allocation12 + $0x14] ss:$8 sps:$4 sm:$0xff]  }
 0x307   : > { %v1928_v61 = vmax.f32 %v1926_v47, %v1927_v55  ;;  %v1861_v42 = vpop.xlane.xlu0 %1860  ;;  %v1982_v6 = vmax.f32 %v1980_v32, %v1981_v58  ;;  %v2058_v40 = vmul.f32 1.442695, %v2024_v56  ;;  %v2060_v15 = vmul.f32 1.442695, %v2025_v57  ;;  %v3577_v53 = vld [vmem:[#allocation12 + $0x10] ss:$8 sps:$4 sm:$0xff]   ;;  %2799 = vmatprep.subr.bf16.mxu1 %v3579_v34 }
 0x308   : > { %v1938_v38 = vmax.f32 %v4720_v45, %v4717_v62  ;;  %3666 = vpow2.f32 %v2086_v60  ;;  %v2040_v20 = vsub.f32 %v4690_v50, %v1979_v9  ;;  %v2041_v26 = vsub.f32 %v4687_v54, %v1979_v9 }
 0x309   : > { %v1929_v10 = vrot.slane %v1928_v61, 1  ;;  %v1983_v11 = vrot.slane %v1982_v6, 2  ;;  %3668 = vpow2.f32 %v2088_v1  ;;  %v4749_v51 = vadd.f32 %v4660_v27, %v1863_v59  ;;  %2800 = vmatpush1.bf16.msra.mxu1 %v3577_v53  ;;  %v3582_v59 = vld [vmem:[#allocation12 + $0x24] ss:$8 sps:$4 sm:$0xff]   ;;  %v3580_v1 = vld [vmem:[#allocation12 + $0x20] ss:$8 sps:$4 sm:$0xff]  }
 0x30a   : > { %v1827_v14 = vpop.xlane.xlu1 %1826  ;;  %v1939_v17 = vrot.slane %v1938_v38, 4  ;;  %3670 = vpow2.f32 %v2058_v40  ;;  %v2090_v46 = vmul.f32 1.442695, %v2040_v20  ;;  %v2092_v48 = vmul.f32 1.442695, %v2041_v26  ;;  %2801 = vmatprep.subr.bf16.mxu1 %v3582_v59 }
 0x30b   : > { %v4725_v43 = vadd.f32 %v4660_v27, %v1827_v14  ;;  %v1825_v29 = vpop.xlane.xlu0 %1824  ;;  %v1984_v18 = vmax.f32 %v1982_v6, %v1983_v11  ;;  %v1930_v28 = vmax.f32 %v1928_v61, %v1929_v10  ;;  %3672 = vpow2.f32 %v2060_v15  ;;  %v3583_v11 = vld [vmem:[#allocation12 + $0x30] ss:$8 sps:$4 sm:$0xff]   ;;  %v3585_v14 = vld [vmem:[#allocation12 + $0x34] ss:$8 sps:$4 sm:$0xff]   ;;  %v3588_v20 = vld [vmem:[#allocation12 + $0x44] ss:$8 sps:$4 sm:$0xff]  }
 0x30c   : > { %v4728_v19 = vadd.f32 %v4660_v27, %v1825_v29  ;;  %v1940_v23 = vmax.f32 %v1938_v38, %v1939_v17  ;;  %v4752_v52 = vadd.f32 %v4660_v27, %v1861_v42  ;;  %3674 = vpow2.f32 %v2090_v46 }
 0x30d   : > { %v1985_v39 = vrot.slane %v1984_v18, 1  ;;  %v2026_v49 = vsub.f32 %v4698_v13, %v1930_v28  ;;  %v2027_v55 = vsub.f32 %v4695_v63, %v1930_v28  ;;  %3676 = vpow2.f32 %v2092_v48  ;;  %2802 = vmatpush1.bf16.msra.mxu1 %v3580_v1  ;;  %v3586_v28 = vld [vmem:[#allocation12 + $0x40] ss:$8 sps:$4 sm:$0xff]   ;;  %v3589_v48 = vld [vmem:[#allocation12 + $0x50] ss:$8 sps:$4 sm:$0xff]  }
 0x30e   : > { %v4732_v25 = vpop.eup %3662  ;;  %v1931_v30 = vmax.f32 %v4728_v19, %v4725_v43  ;;  %v1859_v31 = vpop.xlane.xlu1 %1858  ;;  %v1941_v47 = vrot.slane %v1940_v23, 2  ;;  %v1994_v63 = vmax.f32 %v4752_v52, %v4749_v51  ;;  %2803 = vmatprep.subr.bf16.mxu1 %v3585_v14  ;;  %v3592_v1 = vld [vmem:[#allocation12 + $0x60] ss:$8 sps:$4 sm:$0xff]  }
 0x30f   : > { %v4737_v36 = vpop.eup %3664  ;;  %v4740_v50 = vadd.f32 %v4660_v27, %v1859_v31  ;;  %v1857_v41 = vpop.xlane.xlu0 %1856  ;;  %v1986_v56 = vmax.f32 %v1984_v18, %v1985_v39  ;;  %v2062_v42 = vmul.f32 1.442695, %v2026_v49  ;;  %v2064_v6 = vmul.f32 1.442695, %v2027_v55  ;;  %v3591_v39 = vld [vmem:[#allocation12 + $0x54] ss:$8 sps:$4 sm:$0xff]  }
 0x310   : > { %v1932_v44 = vrot.slane %v1931_v30, 4  ;;  %v2118_v54 = vadd.f32 %v4737_v36, %v4732_v25  ;;  %v4745_v32 = vadd.f32 %v4660_v27, %v1857_v41  ;;  %v1942_v13 = vmax.f32 %v1940_v23, %v1941_v47 }
 0x311   : > { %v2042_v8 = vsub.f32 %v4708_v35, %v1986_v56  ;;  %v2043_v10 = vsub.f32 %v4703_v22, %v1986_v56  ;;  %3678 = vpow2.f32 %v2062_v42  ;;  %v1995_v35 = vrot.slane %v1994_v63, 4  ;;  %2804 = vmatpush1.bf16.msra.mxu1 %v3583_v11  ;;  %v3594_v56 = vld [vmem:[#allocation12 + $0x64] ss:$8 sps:$4 sm:$0xff]  }
 0x312   : > { %v1933_v57 = vmax.f32 %v1931_v30, %v1932_v44  ;;  %v1987_v58 = vmax.f32 %v4745_v32, %v4740_v50  ;;  %v4757_v60 = vpop.eup %3666  ;;  %v2119_v61 = vrot.slane %v2118_v54, 4  ;;  %v1943_v18 = vrot.slane %v1942_v13, 1  ;;  %2805 = vmatprep.subr.bf16.mxu1 %v3588_v20 }
 0x313   : > { %v4759_v0 = vpop.eup %3668  ;;  %3680 = vpow2.f32 %v2064_v6  ;;  %v2094_v23 = vmul.f32 1.442695, %v2042_v8  ;;  %v2096_v26 = vmul.f32 1.442695, %v2043_v10  ;;  %v1996_v41 = vmax.f32 %v1994_v63, %v1995_v35  ;;  %v1835_v35 = vpop.xlane.xlu1 %1834 }
 0x314   : > { %v1934_v9 = vrot.slane %v1933_v57, 2  ;;  %v1988_v38 = vrot.slane %v1987_v58, 4  ;;  %v4764_v40 = vpop.eup %3670  ;;  %v2120_v17 = vadd.f32 %v2119_v61, %v2118_v54  ;;  %v2174_v29 = vadd.f32 %v4759_v0, %v4757_v60 }
 0x315   : > { %v4767_v15 = vpop.eup %3672  ;;  %v1944_v33 = vmax.f32 %v1942_v13, %v1943_v18  ;;  %3682 = vpow2.f32 %v2094_v23  ;;  %2806 = vmatpush1.bf16.msra.mxu1 %v3586_v28  ;;  %v1833_v23 = vpop.xlane.xlu0 %1832 }
 0x316   : > { %v1935_v24 = vmax.f32 %v1933_v57, %v1934_v9  ;;  %v1989_v21 = vmax.f32 %v1987_v58, %v1988_v38  ;;  %v2125_v22 = vadd.f32 %v4767_v15, %v4764_v40  ;;  %v2121_v30 = vrot.slane %v2120_v17, 2  ;;  %v4773_v44 = vpop.eup %3674  ;;  %2807 = vmatprep.subr.bf16.mxu1 %v3591_v39  ;;  %v3597_v38 = vld [vmem:[#allocation12 + $0x74] ss:$8 sps:$4 sm:$0xff]  }
 0x317   : > { %v2175_v31 = vrot.slane %v2174_v29, 4  ;;  %v4775_v47 = vpop.eup %3676  ;;  %3684 = vpow2.f32 %v2096_v26  ;;  %v2030_v55 = vsub.f32 %v4720_v45, %v1944_v33  ;;  %v2031_v57 = vsub.f32 %v4717_v62, %v1944_v33 }
 0x318   : > { %v1936_v54 = vrot.slane %v1935_v24, 1  ;;  %v1990_v46 = vrot.slane %v1989_v21, 2  ;;  %v2126_v34 = vrot.slane %v2125_v22, 4  ;;  %v2122_v49 = vadd.f32 %v2121_v30, %v2120_v17 }
 0x319   : > { %v2176_v53 = vadd.f32 %v2175_v31, %v2174_v29  ;;  %v1997_v58 = vrot.slane %v1996_v41, 2  ;;  %v2181_v61 = vadd.f32 %v4775_v47, %v4773_v44  ;;  %2808 = vmatpush1.bf16.msra.mxu1 %v3589_v48  ;;  %v2070_v45 = vmul.f32 1.442695, %v2030_v55 }
 0x31a   : > { %v1937_v13 = vmax.f32 %v1935_v24, %v1936_v54  ;;  %v1991_v59 = vmax.f32 %v1989_v21, %v1990_v46  ;;  %v2127_v63 = vadd.f32 %v2126_v34, %v2125_v22  ;;  %v2123_v8 = vrot.slane %v2122_v49, 1  ;;  %2809 = vmatprep.subr.bf16.mxu1 %v3594_v56  ;;  %v3595_v24 = vld [vmem:[#allocation12 + $0x70] ss:$8 sps:$4 sm:$0xff]  }
 0x31b   : > { %v4781_v42 = vpop.eup %3678  ;;  %v2177_v9 = vrot.slane %v2176_v53, 2  ;;  %v2072_v10 = vmul.f32 1.442695, %v2031_v57  ;;  %v1998_v62 = vmax.f32 %v1996_v41, %v1997_v58  ;;  %v2182_v14 = vrot.slane %v2181_v61, 4 }
 0x31c   : > { %v1992_v11 = vrot.slane %v1991_v59, 1  ;;  %v2028_v17 = vsub.f32 %v4728_v19, %v1937_v13  ;;  %v2128_v29 = vrot.slane %v2127_v63, 2  ;;  %v2029_v20 = vsub.f32 %v4725_v43, %v1937_v13 }
 0x31d   : > { %v4783_v6 = vpop.eup %3680  ;;  %2810 = vmatpush1.bf16.msra.mxu1 %v3592_v1  ;;  %v2124_v22 = vadd.f32 %v2123_v8, %v2122_v49  ;;  %v2178_v26 = vadd.f32 %v2177_v9, %v2176_v53  ;;  %3686 = vpow2.f32 %v2070_v45  ;;  %v1999_v19 = vrot.slane %v1998_v62, 1 }
 0x31e   : > { %v2132_v18 = vadd.f32 %v4783_v6, %v4781_v42  ;;  %2811 = vmatprep.subr.bf16.mxu1 %v3597_v38  ;;  %3688 = vpow2.f32 %v2072_v10  ;;  %v1993_v30 = vmax.f32 %v1991_v59, %v1992_v11  ;;  %v2183_v31 = vadd.f32 %v2182_v14, %v2181_v61  ;;  %v1867_v11 = vpop.xlane.xlu1 %1866 }
 0x31f   : > { %v4789_v21 = vpop.eup %3682  ;;  %v2066_v33 = vmul.f32 1.442695, %v2028_v17  ;;  %v4794_v39 = vadd.f32 %v4660_v27, %v1835_v35  ;;  %v4797_v43 = vadd.f32 %v4660_v27, %v1833_v23  ;;  %v2129_v41 = vadd.f32 %v2128_v29, %v2127_v63  ;;  %v1865_v17 = vpop.xlane.xlu0 %1864 }
 0x320   : > { %v2133_v54 = vrot.slane %v2132_v18, 4  ;;  %v2068_v46 = vmul.f32 1.442695, %v2029_v20  ;;  %3690 = vrcp.f32 %v2124_v22  ;;  %v2179_v34 = vrot.slane %v2178_v26, 1 }
 0x321   : > { %v4791_v28 = vpop.eup %3684  ;;  %2812 = vmatpush1.bf16.msra.mxu1 %v3595_v24  ;;  %v2000_v49 = vmax.f32 %v1998_v62, %v1999_v19  ;;  %v2044_v53 = vsub.f32 %v4745_v32, %v1993_v30  ;;  %v2184_v55 = vrot.slane %v2183_v31, 2  ;;  %3692 = vpow2.f32 %v2066_v33 }
 0x322   : > { %v2188_v48 = vadd.f32 %v4791_v28, %v4789_v21  ;;  %v2045_v56 = vsub.f32 %v4740_v50, %v1993_v30  ;;  %v1945_v57 = vmax.f32 %v4797_v43, %v4794_v39  ;;  %v2130_v58 = vrot.slane %v2129_v41, 1 }
 0x323   : > { %v2134_v61 = vadd.f32 %v2133_v54, %v2132_v18  ;;  %3694 = vpow2.f32 %v2068_v46  ;;  %v2180_v13 = vadd.f32 %v2179_v34, %v2178_v26  ;;  %v2046_v63 = vsub.f32 %v4752_v52, %v2000_v49 }
 0x324   : > { %v2189_v59 = vrot.slane %v2188_v48, 4  ;;  %v2047_v1 = vsub.f32 %v4749_v51, %v2000_v49  ;;  %v2098_v8 = vmul.f32 1.442695, %v2044_v53  ;;  %v2185_v32 = vadd.f32 %v2184_v55, %v2183_v31 }
 0x325   : > { %v2100_v45 = vmul.f32 1.442695, %v2045_v56  ;;  %v1946_v38 = vrot.slane %v1945_v57, 4  ;;  %v2131_v50 = vadd.f32 %v2130_v58, %v2129_v41  ;;  %v2135_v62 = vrot.slane %v2134_v61, 2  ;;  %v1839_v41 = vpop.xlane.xlu1 %1838 }
 0x326   : > { %3696 = vrcp.f32 %v2180_v13  ;;  %v2190_v14 = vadd.f32 %v2189_v59, %v2188_v48  ;;  %v2102_v29 = vmul.f32 1.442695, %v2046_v63  ;;  %v2104_v18 = vmul.f32 1.442695, %v2047_v1  ;;  %v1837_v48 = vpop.xlane.xlu0 %1836 }
 0x327   : > { %v4807_v9 = vpop.eup %3686  ;;  %3698 = vpow2.f32 %v2098_v8  ;;  %v2186_v20 = vrot.slane %v2185_v32, 1  ;;  %v1947_v35 = vmax.f32 %v1945_v57, %v1946_v38  ;;  %v2136_v23 = vadd.f32 %v2135_v62, %v2134_v61  ;;  %v3510_v57 = vld [vmem:[%s4481_s30] sm:$0xff]  }
 0x328   : > { %v4809_v10 = vpop.eup %3688  ;;  %3700 = vpow2.f32 %v2100_v45  ;;  %v4814_v24 = vadd.f32 %v4660_v27, %v1867_v11  ;;  %v4817_v22 = vadd.f32 %v4660_v27, %v1865_v17  ;;  %v2191_v19 = vrot.slane %v2190_v14, 2 }
 0x329   : > { %v2146_v51 = vadd.f32 %v4809_v10, %v4807_v9  ;;  %3702 = vrcp.f32 %v2131_v50  ;;  %v2187_v54 = vadd.f32 %v2186_v20, %v2185_v32  ;;  %v1948_v34 = vrot.slane %v1947_v35, 2  ;;  %v1871_v1 = vpop.xlane.xlu1 %1870 }
 0x32a   : > { %v3691_v52 = vpop.eup %3690  ;;  %3704 = vpow2.f32 %v2102_v29  ;;  %v2137_v49 = vrot.slane %v2136_v23, 1  ;;  %v2001_v53 = vmax.f32 %v4817_v22, %v4814_v24  ;;  %v2192_v55 = vadd.f32 %v2191_v19, %v2190_v14  ;;  %v1869_v38 = vpop.xlane.xlu0 %1868 }
 0x32b   : > { %v4819_v26 = vpop.eup %3692  ;;  %v2246_v31 = vmul.f32 %v3691_v52, %v4732_v25  ;;  %v2247_v33 = vmul.f32 %v3691_v52, %v4737_v36  ;;  %v2147_v46 = vrot.slane %v2146_v51, 4  ;;  %3706 = vpow2.f32 %v2104_v18 }
 0x32c   : > { %3708 = vrcp.f32 %v2187_v54  ;;  %v1949_v61 = vmax.f32 %v1947_v35, %v1948_v34  ;;  %v2138_v59 = vadd.f32 %v2137_v49, %v2136_v23  ;;  %v2002_v63 = vrot.slane %v2001_v53, 4 }
 0x32d   : > { %v4821_v30 = vpop.eup %3694  ;;  %v2278_v58 = vpack.c.bf16 %v2247_v33, %v2246_v31  ;;  %v2148_v36 = vadd.f32 %v2147_v46, %v2146_v51  ;;  %v2193_v32 = vrot.slane %v2192_v55, 1  ;;  %v4845_v54 = vadd.f32 %v4660_v27, %v1839_v41  ;;  %v1843_v46 = vpop.xlane.xlu1 %1842 }
 0x32e   : > { %v2139_v56 = vadd.f32 %v4821_v30, %v4819_v26  ;;  %v1950_v29 = vrot.slane %v1949_v61, 1  ;;  %3710 = vrcp.f32 %v2138_v59  ;;  %v2003_v52 = vmax.f32 %v2001_v53, %v2002_v63 }
 0x32f   : > { %v2422_v62 = vmul.bf16 %v3510_v57, %v2278_v58  ;;  %v2149_v17 = vrot.slane %v2148_v36, 2  ;;  %v2194_v35 = vadd.f32 %v2193_v32, %v2192_v55  ;;  %v3511_v55 = vld [vmem:[%s4481_s30 + $0x40] sm:$0xff]  }
 0x330   : > { %v3697_v25 = vpop.eup %3696  ;;  %v2140_v45 = vrot.slane %v2139_v56, 4  ;;  %v1951_v19 = vmax.f32 %v1949_v61, %v1950_v29  ;;  %v2004_v33 = vrot.slane %v2003_v52, 2  ;;  %v4853_v61 = vadd.f32 %v4660_v27, %v1837_v48  ;;  %v3512_v29 = vld [vmem:[%s4481_s30 + $0x8] sm:$0xff]  }
 0x331   : > { %v4830_v13 = vpop.eup %3698  ;;  %v2262_v11 = vmul.f32 %v3697_v25, %v4757_v60  ;;  %v2263_v14 = vmul.f32 %v3697_v25, %v4759_v0  ;;  %v2438_v60 = vunpack.c.l.bf16 %v2422_v62  ;;  %v2439_v34 = vunpack.c.h.bf16 %v2422_v62 }
 0x332   : > { %v4832_v8 = vpop.eup %3700  ;;  %v2141_v23 = vadd.f32 %v2140_v45, %v2139_v56  ;;  %v4847_v53 = vadd.f32 %v2149_v17, %v2148_v36  ;;  %v2032_v57 = vsub.f32 %v4797_v43, %v1951_v19  ;;  %v2033_v58 = vsub.f32 %v4794_v39, %v1951_v19  ;;  %v1875_v17 = vpop.xlane.xlu1 %1874 }
 0x333   : > { %v3703_v50 = vpop.eup %3702  ;;  %v2195_v18 = vadd.f32 %v4832_v8, %v4830_v13  ;;  %v2286_v49 = vpack.c.bf16 %v2263_v14, %v2262_v11  ;;  %v2005_v25 = vmax.f32 %v2003_v52, %v2004_v33  ;;  %3712 = vrcp.f32 %v2194_v35 }
 0x334   : > { %v4838_v20 = vpop.eup %3704  ;;  %v2248_v51 = vmul.f32 %v3703_v50, %v4764_v40  ;;  %v2249_v0 = vmul.f32 %v3703_v50, %v4767_v15  ;;  %v1841_v40 = vpop.xlane.xlu0 %1840  ;;  %v2142_v59 = vrot.slane %v2141_v23, 2  ;;  %v2074_v36 = vmul.f32 1.442695, %v2032_v57 }
 0x335   : > { %v4841_v31 = vpop.eup %3706  ;;  %v2196_v56 = vrot.slane %v2195_v18, 4  ;;  %v2076_v63 = vmul.f32 1.442695, %v2033_v58  ;;  %v2006_v32 = vrot.slane %v2005_v25, 1  ;;  %v1952_v43 = vmax.f32 %v4853_v61, %v4845_v54 }
 0x336   : > { %v3709_v15 = vpop.eup %3708  ;;  %v2202_v41 = vadd.f32 %v4841_v31, %v4838_v20  ;;  %v4860_v45 = vadd.f32 %v4660_v27, %v1871_v1  ;;  %v4862_v39 = vadd.f32 %v2439_v34, %v2438_v60  ;;  %v2279_v48 = vpack.c.bf16 %v2249_v0, %v2248_v51 }
 0x337   : > { %3714 = vpow2.f32 %v2074_v36  ;;  %v4865_v50 = vadd.f32 %v4660_v27, %v1869_v38  ;;  %v4867_v62 = vmul.bf16 %v3511_v55, %v2286_v49  ;;  %v4870_v11 = vmul.f32 %v3709_v15, %v4773_v44 }
 0x338   : > { %v2197_v14 = vadd.f32 %v2196_v56, %v2195_v18  ;;  %3716 = vpow2.f32 %v2076_v63  ;;  %v4874_v52 = vmul.f32 %v3709_v15, %v4775_v47  ;;  %v2203_v1 = vrot.slane %v2202_v41, 4  ;;  %v1873_v51 = vpop.xlane.xlu0 %1872  ;;  %v4876_v60 = vpop.eup %3710 }
 0x339   : > { %v2007_v35 = vmax.f32 %v2005_v25, %v2006_v32  ;;  %v1953_v19 = vrot.slane %v1952_v43, 4  ;;  %v2143_v38 = vadd.f32 %v2142_v59, %v2141_v23  ;;  %v2008_v0 = vmax.f32 %v4865_v50, %v4860_v45 }
 0x33a   : > { %v4881_v44 = vadd.f32 %v4660_v27, %v1843_v46  ;;  %v4884_v18 = vadd.f32 %v4660_v27, %v1841_v40  ;;  %v4889_v49 = vadd.f32 %v4660_v27, %v1875_v17  ;;  %v2198_v57 = vrot.slane %v2197_v14, 2 }
 0x33b   : > { %v2048_v33 = vsub.f32 %v4817_v22, %v2007_v35  ;;  %v2049_v47 = vsub.f32 %v4814_v24, %v2007_v35  ;;  %v1954_v34 = vmax.f32 %v1952_v43, %v1953_v19  ;;  %v2009_v55 = vrot.slane %v2008_v0, 4 }
 0x33c   : > { %v1959_v23 = vmax.f32 %v4884_v18, %v4881_v44  ;;  %v4894_v56 = vadd.f32 %v4660_v27, %v1873_v51  ;;  %v4896_v46 = vmul.bf16 %v3512_v29, %v2279_v48  ;;  %v2151_v40 = vrot.slane %v4847_v53, 1 }
 0x33d   : > { %v2106_v58 = vmul.f32 1.442695, %v2048_v33  ;;  %v2108_v22 = vmul.f32 1.442695, %v2049_v47  ;;  %v2204_v25 = vadd.f32 %v2203_v1, %v2202_v41  ;;  %v1955_v15 = vrot.slane %v1954_v34, 2  ;;  %v4900_v36 = vpop.eup %3712 }
 0x33e   : > { %v2010_v59 = vmax.f32 %v2008_v0, %v2009_v55  ;;  %v2144_v63 = vrot.slane %v2143_v38, 1  ;;  %v1960_v32 = vrot.slane %v1959_v23, 4  ;;  %v2015_v27 = vmax.f32 %v4894_v56, %v4889_v49 }
 0x33f   : > { %3718 = vpow2.f32 %v2106_v58  ;;  %v2199_v43 = vadd.f32 %v2198_v57, %v2197_v14  ;;  %v1956_v48 = vmax.f32 %v1954_v34, %v1955_v15  ;;  %v2454_v35 = vunpack.c.l.bf16 %v4867_v62 }
 0x340   : > { %3720 = vpow2.f32 %v2108_v22  ;;  %v2011_v17 = vrot.slane %v2010_v59, 2  ;;  %v2455_v41 = vunpack.c.h.bf16 %v4867_v62  ;;  %v1961_v1 = vmax.f32 %v1959_v23, %v1960_v32 }
 0x341   : > { %v4904_v29 = vpop.eup %3714  ;;  %v2152_v51 = vadd.f32 %v2151_v40, %v4847_v53  ;;  %v1957_v0 = vrot.slane %v1956_v48, 1  ;;  %v2016_v47 = vrot.slane %v2015_v27, 4  ;;  %v4093_v55 = vmov 0  }
 0x342   : > { %v4908_v19 = vpop.eup %3716  ;;  %v2012_v33 = vmax.f32 %v2010_v59, %v2011_v17  ;;  %2829 = vmatprep.mubr.bf16.mxu1 %v4093_v55  ;;  %v2287_v14 = vpack.c.bf16 %v4874_v52, %v4870_v11  ;;  %v2205_v34 = vrot.slane %v2204_v25, 2  ;;  %v1962_v58 = vrot.slane %v1961_v1, 2  ;;  %v3513_v17 = vld [vmem:[%s4481_s30 + $0x48] sm:$0xff]  }
 0x343   : > { %v2153_v57 = vadd.f32 %v4908_v19, %v4904_v29  ;;  %v2440_v62 = vunpack.c.l.bf16 %v4896_v46  ;;  %v2145_v23 = vadd.f32 %v2144_v63, %v2143_v38  ;;  %v2200_v22 = vrot.slane %v2199_v43, 1 }
 0x344   : > { %v1958_v15 = vmax.f32 %v1956_v48, %v1957_v0  ;;  %v2441_v53 = vunpack.c.h.bf16 %v4896_v46  ;;  %v2013_v59 = vrot.slane %v2012_v33, 1  ;;  %v1963_v32 = vmax.f32 %v1961_v1, %v1962_v58 }
 0x345   : > { %v2154_v40 = vrot.slane %v2153_v57, 4  ;;  %3722 = vrcp.f32 %v2152_v51  ;;  %v2017_v52 = vmax.f32 %v2015_v27, %v2016_v47  ;;  %v2206_v24 = vadd.f32 %v2205_v34, %v2204_v25 }
 0x346   : > { %v2034_v55 = vsub.f32 %v4853_v61, %v1958_v15  ;;  %v2035_v11 = vsub.f32 %v4845_v54, %v1958_v15  ;;  %v2014_v12 = vmax.f32 %v2012_v33, %v2013_v59  ;;  %v1964_v4 = vrot.slane %v1963_v32, 1 }
 0x347   : > { %v2155_v16 = vadd.f32 %v2154_v40, %v2153_v57  ;;  %3724 = vrcp.f32 %v2145_v23  ;;  %v2201_v38 = vadd.f32 %v2200_v22, %v2199_v43  ;;  %v2018_v58 = vrot.slane %v2017_v52, 2 }
 0x348   : > { %v2078_v63 = vmul.f32 1.442695, %v2034_v55  ;;  %v2080_v48 = vmul.f32 1.442695, %v2035_v11  ;;  %v2050_v1 = vsub.f32 %v4865_v50, %v2014_v12  ;;  %v2051_v51 = vsub.f32 %v4860_v45, %v2014_v12 }
 0x349   : > { %v4920_v0 = vpop.eup %3718  ;;  %v2156_v46 = vrot.slane %v2155_v16, 2  ;;  %v2526_v54 = vadd.f32 %v2455_v41, %v2454_v35  ;;  %v2431_v27 = vmul.bf16 %v3513_v17, %v2287_v14  ;;  %v1965_v25 = vmax.f32 %v1963_v32, %v1964_v4 }
 0x34a   : > { %v4924_v61 = vpop.eup %3720  ;;  %3726 = vpow2.f32 %v2078_v63  ;;  %v2207_v33 = vrot.slane %v2206_v24, 1  ;;  %v2110_v34 = vmul.f32 1.442695, %v2050_v1  ;;  %v2112_v57 = vmul.f32 1.442695, %v2051_v51 }
 0x34b   : > { %v2157_v47 = vadd.f32 %v2156_v46, %v2155_v16  ;;  %v2209_v43 = vadd.f32 %v4924_v61, %v4920_v0  ;;  %3728 = vpow2.f32 %v2080_v48  ;;  %v2036_v50 = vsub.f32 %v4884_v18, %v1965_v25 }
 0x34c   : > { %3730 = vrcp.f32 %v2201_v38  ;;  %v2037_v45 = vsub.f32 %v4881_v44, %v1965_v25  ;;  %v2019_v22 = vmax.f32 %v2017_v52, %v2018_v58  ;;  %v2477_v35 = vadd.f32 %v2441_v53, %v2440_v62 }
 0x34d   : > { %v2158_v23 = vrot.slane %v2157_v47, 1  ;;  %v2210_v12 = vrot.slane %v2209_v43, 4  ;;  %v2250_v4 = vmul.f32 %v4876_v60, %v4781_v42  ;;  %3732 = vpow2.f32 %v2110_v34 }
 0x34e   : > { %v2082_v16 = vmul.f32 1.442695, %v2036_v50  ;;  %3734 = vpow2.f32 %v2112_v57  ;;  %v2084_v15 = vmul.f32 1.442695, %v2037_v45  ;;  %v2251_v59 = vmul.f32 %v4876_v60, %v4783_v6 }
 0x34f   : > { %v2159_v41 = vadd.f32 %v2158_v23, %v2157_v47  ;;  %v2211_v14 = vadd.f32 %v2210_v12, %v2209_v43  ;;  %v3723_v40 = vpop.eup %3722  ;;  %v2208_v18 = vadd.f32 %v2207_v33, %v2206_v24  ;;  %v2020_v32 = vrot.slane %v2019_v22, 1  ;;  %v3515_v43 = vld [vmem:[%s4481_s30 + $0x50] sm:$0xff]  }
 0x350   : > { %3736 = vpow2.f32 %v2082_v16  ;;  %v5228_v44 = vrot.slane %v4862_v39, 4  ;;  %v2527_v53 = vrot.slane %v2526_v54, 4  ;;  %v2456_v42 = vunpack.c.l.bf16 %v2431_v27 }
 0x351   : > { %v2212_v17 = vrot.slane %v2211_v14, 2  ;;  %v3725_v55 = vpop.eup %3724  ;;  %v2478_v11 = vrot.slane %v2477_v35, 4  ;;  %v2457_v52 = vunpack.c.h.bf16 %v2431_v27  ;;  %3738 = vpow2.f32 %v2084_v15 }
 0x352   : > { %v2472_v62 = vadd.f32 %v5228_v44, %v4862_v39  ;;  %v2021_v38 = vmax.f32 %v2019_v22, %v2020_v32  ;;  %v2266_v63 = vmul.f32 %v4900_v36, %v4789_v21  ;;  %v2267_v6 = vmul.f32 %v4900_v36, %v4791_v28  ;;  %v3514_v39 = vld [vmem:[%s4481_s30 + $0x10] sm:$0xff]  }
 0x353   : > { %3740 = vrcp.f32 %v2159_v41  ;;  %v2213_v60 = vadd.f32 %v2212_v17, %v2211_v14  ;;  %v2280_v48 = vpack.c.bf16 %v2251_v59, %v2250_v4  ;;  %v4950_v33 = vadd.f32 %v2527_v53, %v2526_v54  ;;  %v3516_v53 = vld [vmem:[%s4481_s30 + $0x20] sm:$0xff]  }
 0x354   : > { %v4941_v24 = vpop.eup %3726  ;;  %3742 = vrcp.f32 %v2208_v18  ;;  %v2052_v46 = vsub.f32 %v4894_v56, %v2021_v38  ;;  %v2053_v1 = vsub.f32 %v4889_v49, %v2021_v38  ;;  %v2473_v21 = vrot.slane %v2472_v62, 2 }
 0x355   : > { %v4946_v51 = vpop.eup %3728  ;;  %v2214_v58 = vrot.slane %v2213_v60, 1  ;;  %v2533_v47 = vadd.f32 %v2457_v52, %v2456_v42  ;;  %v2288_v34 = vpack.c.bf16 %v2267_v6, %v2266_v63  ;;  %v4955_v56 = vadd.f32 %v2478_v11, %v2477_v35  ;;  %v3519_v6 = vld [vmem:[%s4481_s30 + $0x58] sm:$0xff]  }
 0x356   : > { %v3731_v27 = vpop.eup %3730  ;;  %v2160_v28 = vadd.f32 %v4946_v51, %v4941_v24  ;;  %v2114_v36 = vmul.f32 1.442695, %v2052_v46  ;;  %v2116_v25 = vmul.f32 1.442695, %v2053_v1  ;;  %v2424_v49 = vmul.bf16 %v3514_v39, %v2280_v48 }
 0x357   : > { %v2215_v57 = vadd.f32 %v2214_v58, %v2213_v60  ;;  %v4953_v50 = vpop.eup %3732  ;;  %v2254_v45 = vmul.f32 %v3723_v40, %v4807_v9  ;;  %v2255_v22 = vmul.f32 %v3723_v40, %v4809_v10  ;;  %v2252_v54 = vmul.f32 %v3725_v55, %v4819_v26 }
 0x358   : > { %v2161_v23 = vrot.slane %v2160_v28, 4  ;;  %3744 = vpow2.f32 %v2114_v36  ;;  %v4957_v12 = vpop.eup %3734  ;;  %v2253_v16 = vmul.f32 %v3725_v55, %v4821_v30  ;;  %v2432_v14 = vmul.bf16 %v3515_v43, %v2288_v34  ;;  %v3518_v55 = vld [vmem:[%s4481_s30 + $0x18] sm:$0xff]  }
 0x359   : > { %3746 = vrcp.f32 %v2215_v57  ;;  %v2216_v35 = vadd.f32 %v4957_v12, %v4953_v50  ;;  %v2268_v15 = vmul.f32 %v3731_v27, %v4830_v13  ;;  %v2269_v9 = vmul.f32 %v3731_v27, %v4832_v8 }
 0x35a   : > { %v4962_v4 = vpop.eup %3736  ;;  %v2162_v41 = vadd.f32 %v2161_v23, %v2160_v28  ;;  %3748 = vpow2.f32 %v2116_v25  ;;  %v4971_v26 = vadd.f32 %v2473_v21, %v2472_v62  ;;  %v2529_v40 = vrot.slane %v4950_v33, 2 }
 0x35b   : > { %v4969_v10 = vpop.eup %3738  ;;  %v2217_v30 = vrot.slane %v2216_v35, 4  ;;  %v2480_v32 = vrot.slane %v4955_v56, 2  ;;  %v2534_v44 = vrot.slane %v2533_v47, 4  ;;  %v2282_v42 = vpack.c.bf16 %v2255_v22, %v2254_v45 }
 0x35c   : > { %v2163_v59 = vrot.slane %v2162_v41, 2  ;;  %v2167_v13 = vadd.f32 %v4969_v10, %v4962_v4  ;;  %v2442_v8 = vunpack.c.l.bf16 %v2424_v49  ;;  %v2281_v11 = vpack.c.bf16 %v2253_v16, %v2252_v54  ;;  %v3520_v16 = vld [vmem:[%s4481_s30 + $0x28] sm:$0xff]  }
 0x35d   : > { %v3741_v18 = vpop.eup %3740  ;;  %v2218_v52 = vadd.f32 %v2217_v30, %v2216_v35  ;;  %v2443_v38 = vunpack.c.h.bf16 %v2424_v49  ;;  %v2458_v63 = vunpack.c.l.bf16 %v2432_v14  ;;  %v2289_v60 = vpack.c.bf16 %v2269_v9, %v2268_v15  ;;  %v3517_v30 = vld [vmem:[%s4481_s30 + $0x60] sm:$0xff]  }
 0x35e   : > { %v3743_v17 = vpop.eup %3742  ;;  %v2164_v62 = vadd.f32 %v2163_v59, %v2162_v41  ;;  %v2168_v39 = vrot.slane %v2167_v13, 4  ;;  %v2256_v48 = vmul.f32 %v3741_v18, %v4904_v29  ;;  %v2257_v46 = vmul.f32 %v3741_v18, %v4908_v19 }
 0x35f   : > { %v2219_v58 = vrot.slane %v2218_v52, 2  ;;  %v2459_v27 = vunpack.c.h.bf16 %v2432_v14  ;;  %v2426_v21 = vmul.bf16 %v3516_v53, %v2282_v42  ;;  %v2270_v28 = vmul.f32 %v3743_v17, %v4838_v20  ;;  %v3521_v14 = vld [vmem:[%s4481_s30 + $0x68] sm:$0xff]  }
 0x360   : > { %v2165_v1 = vrot.slane %v2164_v62, 1  ;;  %v2169_v36 = vadd.f32 %v2168_v39, %v2167_v13  ;;  %v2271_v43 = vmul.f32 %v3743_v17, %v4841_v31  ;;  %v2425_v34 = vmul.bf16 %v3518_v55, %v2281_v11 }
 0x361   : > { %v2220_v49 = vadd.f32 %v2219_v58, %v2218_v52  ;;  %v4986_v29 = vadd.f32 %v2534_v44, %v2533_v47  ;;  %v2484_v19 = vadd.f32 %v2443_v38, %v2442_v8  ;;  %v2433_v45 = vmul.bf16 %v3519_v6, %v2289_v60 }
 0x362   : > { %v4983_v25 = vpop.eup %3744  ;;  %v2166_v57 = vadd.f32 %v2165_v1, %v2164_v62  ;;  %v2170_v22 = vrot.slane %v2169_v36, 2  ;;  %v2283_v20 = vpack.c.bf16 %v2257_v46, %v2256_v48  ;;  %v2540_v31 = vadd.f32 %v2459_v27, %v2458_v63 }
 0x363   : > { %v3747_v23 = vpop.eup %3746  ;;  %v2221_v15 = vrot.slane %v2220_v49, 1  ;;  %v2446_v59 = vunpack.c.l.bf16 %v2426_v21  ;;  %v2290_v18 = vpack.c.bf16 %v2271_v43, %v2270_v28  ;;  %v2444_v44 = vunpack.c.l.bf16 %v2425_v34 }
 0x364   : > { %v4988_v54 = vpop.eup %3748  ;;  %v2272_v41 = vmul.f32 %v3747_v23, %v4920_v0  ;;  %v2273_v35 = vmul.f32 %v3747_v23, %v4924_v61  ;;  %3750 = vrcp.f32 %v2166_v57  ;;  %v2171_v9 = vadd.f32 %v2170_v22, %v2169_v36 }
 0x365   : > { %v2223_v47 = vadd.f32 %v4988_v54, %v4983_v25  ;;  %v2445_v42 = vunpack.c.h.bf16 %v2425_v34  ;;  %v2222_v13 = vadd.f32 %v2221_v15, %v2220_v49  ;;  %v2447_v0 = vunpack.c.h.bf16 %v2426_v21 }
 0x366   : > { %v2291_v53 = vpack.c.bf16 %v2273_v35, %v2272_v41  ;;  %v2172_v17 = vrot.slane %v2171_v9, 1  ;;  %v2460_v55 = vunpack.c.l.bf16 %v2433_v45  ;;  %v2461_v61 = vunpack.c.h.bf16 %v2433_v45 }
 0x367   : > { %v2224_v8 = vrot.slane %v2223_v47, 4  ;;  %v2427_v11 = vmul.bf16 %v3520_v16, %v2283_v20  ;;  %3752 = vrcp.f32 %v2222_v13  ;;  %v5000_v63 = vadd.f32 %v2529_v40, %v4950_v33 }
 0x368   : > { %v2435_v62 = vmul.bf16 %v3521_v14, %v2291_v53  ;;  %v2173_v52 = vadd.f32 %v2172_v17, %v2171_v9  ;;  %v2485_v6 = vrot.slane %v2484_v19, 4  ;;  %v2541_v60 = vrot.slane %v2540_v31, 4 }
 0x369   : > { %v2225_v38 = vadd.f32 %v2224_v8, %v2223_v47  ;;  %v2434_v39 = vmul.bf16 %v3517_v30, %v2290_v18  ;;  %v5005_v48 = vadd.f32 %v2480_v32, %v4955_v56  ;;  %v2491_v46 = vadd.f32 %v2445_v42, %v2444_v44  ;;  %v3524_v32 = vld [vmem:[%s4481_s30 + $0x30] sm:$0xff]  }
 0x36a   : > { %3754 = vrcp.f32 %v2173_v52  ;;  %v2536_v58 = vrot.slane %v4986_v29, 2  ;;  %v2498_v27 = vadd.f32 %v2447_v0, %v2446_v59  ;;  %v2547_v21 = vadd.f32 %v2461_v61, %v2460_v55  ;;  %v3528_v8 = vld [vmem:[%s4481_s30 + $0x70] sm:$0xff]  }
 0x36b   : > { %v2226_v1 = vrot.slane %v2225_v38, 2  ;;  %v2448_v28 = vunpack.c.l.bf16 %v2427_v11  ;;  %v2449_v36 = vunpack.c.h.bf16 %v2427_v11  ;;  %v2464_v33 = vunpack.c.l.bf16 %v2435_v62 }
 0x36c   : > { %v2465_v40 = vunpack.c.h.bf16 %v2435_v62  ;;  %v2486_v57 = vadd.f32 %v2485_v6, %v2484_v19  ;;  %v2542_v49 = vadd.f32 %v2541_v60, %v2540_v31  ;;  %v2462_v23 = vunpack.c.l.bf16 %v2434_v39  ;;  %v3532_v60 = vld [vmem:[%s4481_s30 + $0x38] sm:$0xff]  }
 0x36d   : > { %v2227_v43 = vadd.f32 %v2226_v1, %v2225_v38  ;;  %v2463_v45 = vunpack.c.h.bf16 %v2434_v39  ;;  %v2492_v56 = vrot.slane %v2491_v46, 4  ;;  %v2475_v41 = vrot.slane %v4971_v26, 1 }
 0x36e   : > { %v3751_v34 = vpop.eup %3750  ;;  %v2531_v35 = vrot.slane %v5000_v63, 1  ;;  %v2499_v14 = vrot.slane %v2498_v27, 4  ;;  %v2548_v15 = vrot.slane %v2547_v21, 4  ;;  %v2505_v9 = vadd.f32 %v2449_v36, %v2448_v28 }
 0x36f   : > { %v2258_v22 = vmul.f32 %v3751_v34, %v4941_v24  ;;  %v2259_v16 = vmul.f32 %v3751_v34, %v4946_v51  ;;  %v2228_v20 = vrot.slane %v2227_v43, 1  ;;  %v2561_v47 = vadd.f32 %v2465_v40, %v2464_v33 }
 0x370   : > { %v2482_v59 = vrot.slane %v5005_v48, 1  ;;  %v5015_v30 = vadd.f32 %v2536_v58, %v4986_v29  ;;  %v2487_v24 = vrot.slane %v2486_v57, 2  ;;  %v2543_v18 = vrot.slane %v2542_v49, 2 }
 0x371   : > { %v2284_v19 = vpack.c.bf16 %v2259_v16, %v2258_v22  ;;  %v2229_v31 = vadd.f32 %v2228_v20, %v2227_v43  ;;  %v3753_v51 = vpop.eup %3752  ;;  %v2554_v44 = vadd.f32 %v2463_v45, %v2462_v23  ;;  %v2493_v53 = vadd.f32 %v2492_v56, %v2491_v46 }
 0x372   : > { %v2500_v13 = vadd.f32 %v2499_v14, %v2498_v27  ;;  %v2549_v17 = vadd.f32 %v2548_v15, %v2547_v21  ;;  %v2274_v0 = vmul.f32 %v3753_v51, %v4953_v50  ;;  %v2275_v55 = vmul.f32 %v3753_v51, %v4957_v12 }
 0x373   : > { %v2428_v42 = vmul.bf16 %v3524_v32, %v2284_v19  ;;  %3756 = vrcp.f32 %v2229_v31  ;;  %v2506_v29 = vrot.slane %v2505_v9, 4  ;;  %v2562_v52 = vrot.slane %v2561_v47, 4 }
 0x374   : > { %v3755_v61 = vpop.eup %3754  ;;  %v2538_v38 = vrot.slane %v5015_v30, 1  ;;  %v2292_v6 = vpack.c.bf16 %v2275_v55, %v2274_v0  ;;  %v2488_v1 = vadd.f32 %v2487_v24, %v2486_v57  ;;  %v2555_v58 = vrot.slane %v2554_v44, 4  ;;  %v3536_v24 = vld [vmem:[%s4481_s30 + $0x78] sm:$0xff]   ;;  %s5234_s30 = sld [smem:[#allocation37_spill]] }
 0x375   : > { %v2450_v11 = vunpack.c.l.bf16 %v2428_v42  ;;  %v2451_v62 = vunpack.c.h.bf16 %v2428_v42  ;;  %v2260_v39 = vmul.f32 %v3755_v61, %v4962_v4  ;;  %v2261_v46 = vmul.f32 %v3755_v61, %v4969_v10 }
 0x376   : > { %v2494_v27 = vrot.slane %v2493_v53, 2  ;;  %v2544_v50 = vadd.f32 %v2543_v18, %v2542_v49  ;;  %v2436_v28 = vmul.bf16 %v3528_v8, %v2292_v6  ;;  %v2501_v36 = vrot.slane %v2500_v13, 2 }
 0x377   : > { %v2512_v21 = vadd.f32 %v2451_v62, %v2450_v11  ;;  %v2285_v12 = vpack.c.bf16 %v2261_v46, %v2260_v39  ;;  %v2550_v33 = vrot.slane %v2549_v17, 2  ;;  %v2507_v40 = vadd.f32 %v2506_v29, %v2505_v9 }
 0x378   : > { %v2563_v34 = vadd.f32 %v2562_v52, %v2561_v47  ;;  %v2466_v23 = vunpack.c.l.bf16 %v2436_v28  ;;  %v2467_v45 = vunpack.c.h.bf16 %v2436_v28  ;;  %v5025_v4 = vadd.f32 %v2475_v41, %v4971_v26 }
 0x379   : > { %v2513_v43 = vrot.slane %v2512_v21, 4  ;;  %v2429_v56 = vmul.bf16 %v3532_v60, %v2285_v12  ;;  %v2556_v10 = vadd.f32 %v2555_v58, %v2554_v44  ;;  %v2489_v57 = vrot.slane %v2488_v1, 1 }
 0x37a   : > { %v2495_v32 = vadd.f32 %v2494_v27, %v2493_v53  ;;  %v5028_v20 = vadd.f32 %v2482_v59, %v5005_v48  ;;  %v2568_v14 = vadd.f32 %v2467_v45, %v2466_v23  ;;  %v2502_v9 = vadd.f32 %v2501_v36, %v2500_v13  ;;  %s5074_s16 = scalar_lea.hbm %s5234_s30, %s3306_s10 }
 0x37b   : > { %v2514_v22 = vadd.f32 %v2513_v43, %v2512_v21  ;;  %v2452_v16 = vunpack.c.l.bf16 %v2429_v56  ;;  %v2453_v49 = vunpack.c.h.bf16 %v2429_v56  ;;  %v2508_v47 = vrot.slane %v2507_v40, 2 }
 0x37c   : > { %v2551_v19 = vadd.f32 %v2550_v33, %v2549_v17  ;;  %v2564_v31 = vrot.slane %v2563_v34, 2  ;;  %v2569_v51 = vrot.slane %v2568_v14, 4  ;;  %v2490_v44 = vadd.f32 %v2489_v57, %v2488_v1 }
 0x37d   : > { %v3757_v15 = vpop.eup %3756  ;;  %v2519_v41 = vadd.f32 %v2453_v49, %v2452_v16  ;;  %v2496_v53 = vrot.slane %v2495_v32, 1  ;;  %v2515_v42 = vrot.slane %v2514_v22, 2  ;;  %v2557_v8 = vrot.slane %v2556_v10, 2 }
 0x37e   : > { %v2276_v18 = vmul.f32 %v3757_v15, %v4983_v25  ;;  %v2277_v26 = vmul.f32 %v3757_v15, %v4988_v54  ;;  %v2532_v59 = vadd.f32 %v2531_v35, %v5000_v63  ;;  %v2570_v13 = vadd.f32 %v2569_v51, %v2568_v14 }
 0x37f   : > { %v2520_v48 = vrot.slane %v2519_v41, 4  ;;  %v2503_v17 = vrot.slane %v2502_v9, 1  ;;  %v2509_v55 = vadd.f32 %v2508_v47, %v2507_v40  ;;  %v2545_v61 = vrot.slane %v2544_v50, 1 }
 0x380   : > { %v2293_v0 = vpack.c.bf16 %v2277_v26, %v2276_v18  ;;  %v2552_v11 = vrot.slane %v2551_v19, 1  ;;  %v2565_v54 = vadd.f32 %v2564_v31, %v2563_v34  ;;  %v2571_v29 = vrot.slane %v2570_v13, 2 }
 0x381   : > { %v2521_v62 = vadd.f32 %v2520_v48, %v2519_v41  ;;  %v2497_v52 = vadd.f32 %v2496_v53, %v2495_v32  ;;  %v2516_v6 = vadd.f32 %v2515_v42, %v2514_v22  ;;  %v2539_v60 = vadd.f32 %v2538_v38, %v5015_v30 }
 0x382   : > { %v2437_v25 = vmul.bf16 %v3536_v24, %v2293_v0  ;;  %v2558_v39 = vadd.f32 %v2557_v8, %v2556_v10  ;;  %v2572_v27 = vadd.f32 %v2571_v29, %v2570_v13  ;;  %v2504_v63 = vadd.f32 %v2503_v17, %v2502_v9 }
 0x383   : > { %v2522_v58 = vrot.slane %v2521_v62, 2  ;;  %v2546_v35 = vadd.f32 %v2545_v61, %v2544_v50  ;;  %v2553_v21 = vadd.f32 %v2552_v11, %v2551_v19  ;;  %v2618_v28 = vpack.c.bf16 %v5025_v4, %v5025_v4 }
 0x384   : > { %v2468_v46 = vunpack.c.l.bf16 %v2437_v25  ;;  %v2469_v1 = vunpack.c.h.bf16 %v2437_v25  ;;  %v2510_v12 = vrot.slane %v2509_v55, 1  ;;  %v2566_v33 = vrot.slane %v2565_v54, 1 }
 0x385   : > { %v2523_v36 = vadd.f32 %v2522_v58, %v2521_v62  ;;  %v2517_v43 = vrot.slane %v2516_v6, 1  ;;  %v2559_v30 = vrot.slane %v2558_v39, 1  ;;  %v2573_v38 = vrot.slane %v2572_v27, 1 }
 0x386   : > { %v2575_v40 = vadd.f32 %v2469_v1, %v2468_v46  ;;  %v2619_v34 = vpack.c.bf16 %v5028_v20, %v5028_v20  ;;  %v2620_v56 = vpack.c.bf16 %v2490_v44, %v2490_v44  ;;  %v2627_v50 = vpack.c.bf16 %v2539_v60, %v2539_v60 }
 0x387   : > { %v2524_v23 = vrot.slane %v2523_v36, 1  ;;  %v2621_v10 = vpack.c.bf16 %v2497_v52, %v2497_v52  ;;  %v2622_v57 = vpack.c.bf16 %v2504_v63, %v2504_v63  ;;  %v2626_v32 = vpack.c.bf16 %v2532_v59, %v2532_v59 }
 0x388   : > { %v2576_v45 = vrot.slane %v2575_v40, 4  ;;  %v2628_v4 = vpack.c.bf16 %v2546_v35, %v2546_v35  ;;  %v2511_v22 = vadd.f32 %v2510_v12, %v2509_v55  ;;  %v2567_v16 = vadd.f32 %v2566_v33, %v2565_v54 }
 0x389   : > { %v2629_v14 = vpack.c.bf16 %v2553_v21, %v2553_v21  ;;  %v2518_v15 = vadd.f32 %v2517_v43, %v2516_v6  ;;  %v2560_v9 = vadd.f32 %v2559_v30, %v2558_v39  ;;  %v2574_v47 = vadd.f32 %v2573_v38, %v2572_v27 }
 0x38a   : > { %v2577_v49 = vadd.f32 %v2576_v45, %v2575_v40  ;;  %v2679_v19 = vunpack.c.l.b16 %v2619_v34  ;;  %v2525_v31 = vadd.f32 %v2524_v23, %v2523_v36  ;;  %v2680_v18 = vunpack.c.l.b16 %v2620_v56 }
 0x38b   : > { %v2687_v20 = vunpack.c.l.b16 %v2627_v50  ;;  %v2678_v26 = vunpack.c.l.b16 %v2618_v28  ;;  %v2681_v41 = vunpack.c.l.b16 %v2621_v10  ;;  %v2686_v51 = vunpack.c.l.b16 %v2626_v32  ;;  %v3787_v10 = vld [vmem:[%s5158_s5] sm:$0x3f] }
 0x38c   : > { %v2578_v24 = vrot.slane %v2577_v49, 2  ;;  %v2688_v44 = vunpack.c.l.b16 %v2628_v4  ;;  %v2623_v42 = vpack.c.bf16 %v2511_v22, %v2511_v22  ;;  %v2631_v8 = vpack.c.bf16 %v2567_v16, %v2567_v16 }
 0x38d   : > { %v2689_v0 = vunpack.c.l.b16 %v2629_v14  ;;  %v2624_v48 = vpack.c.bf16 %v2518_v15, %v2518_v15  ;;  %v2630_v59 = vpack.c.bf16 %v2560_v9, %v2560_v9  ;;  %v2632_v13 = vpack.c.bf16 %v2574_v47, %v2574_v47  ;;  %v5229_v15 = vld [vmem:[#allocation30_spill] sm:$0xff] }
 0x38e   : > { %v2579_v53 = vadd.f32 %v2578_v24, %v2577_v49  ;;  %v2695_v17 = vsel %vm2694_vm0, %v2679_v19, %v2678_v26  ;;  %v2625_v61 = vpack.c.bf16 %v2525_v31, %v2525_v31  ;;  %v2708_v25 = vsel %vm2694_vm0, %v2687_v20, %v2686_v51 }
 0x38f   : > { %v2697_v11 = vsel %vm2696_vm1, %v2680_v18, %v2695_v17  ;;  %v2682_v62 = vunpack.c.l.b16 %v2622_v57  ;;  %v2709_v29 = vsel %vm2696_vm1, %v2688_v44, %v2708_v25  ;;  %v2683_v6 = vunpack.c.l.b16 %v2623_v42 }
 0x390   : > { %v2580_v55 = vrot.slane %v2579_v53, 1  ;;  %v2699_v54 = vsel %vm2698_vm2, %v2681_v41, %v2697_v11  ;;  %v2691_v60 = vunpack.c.l.b16 %v2631_v8  ;;  %v2710_v39 = vsel %vm2698_vm2, %v2689_v0, %v2709_v29 }
 0x391   : > { %v2684_v46 = vunpack.c.l.b16 %v2624_v48  ;;  %v2690_v1 = vunpack.c.l.b16 %v2630_v59  ;;  %v2692_v58 = vunpack.c.l.b16 %v2632_v13  ;;  %v2685_v63 = vunpack.c.l.b16 %v2625_v61  ;;  %v2650_v48 = vld [vmem:[%s5230_s24] sm:$0x3] }
 0x392   : > { %v2581_v52 = vadd.f32 %v2580_v55, %v2579_v53  ;;  %v2701_v35 = vsel %vm2700_vm3, %v2682_v62, %v2699_v54  ;;  %v679_v50 = vsub.s32 1, %v4511_v7  ;;  %v676_v57 = vrot.slane %v3787_v10, %v4529_v37  ;;  %v5231_v54 = vld [vmem:[#allocation31_spill] sm:$0xff] }
 0x393   : > { %v2711_v21 = vsel %vm2700_vm3, %v2690_v1, %v2710_v39  ;;  %v2703_v12 = vsel %vm2702_vm4, %v2683_v6, %v2701_v35  ;;  %v683_v31 = vsub.s32 2, %v4511_v7  ;;  %v687_v8 = vsub.s32 3, %v4511_v7 }
 0x394   : > { %v2633_v27 = vpack.c.bf16 %v2581_v52, %v2581_v52  ;;  %v2712_v36 = vsel %vm2702_vm4, %v2691_v60, %v2711_v21  ;;  %v2705_v33 = vsel %vm2704_vm5, %v2684_v46, %v2703_v12  ;;  %v680_v32 = vrot.slane %v3787_v10, %v679_v50  ;;  %v2846_v12 = vld [vmem:[%s481_s15] sm:$0xff] }
 0x395   : > { %v2713_v40 = vsel %vm2704_vm5, %v2692_v58, %v2712_v36  ;;  %v2707_v43 = vsel %vm2706_vm6, %v2685_v63, %v2705_v33  ;;  %v1228_v4 = vadd.f32 %v4503_v2, %v676_v57  ;;  %v1232_v9 = vadd.f32 %v5229_v15, %v676_v57 }
 0x396   : > { %v2693_v28 = vunpack.c.l.b16 %v2633_v27  ;;  %v1230_v22 = vadd.f32 %v4505_v3, %v680_v32  ;;  %v1234_v49 = vadd.f32 %v4509_v5, %v680_v32  ;;  %v684_v24 = vrot.slane %v3787_v10, %v683_v31 }
 0x397   : > { %v3264_v16 = vmul.f32 -1.442695, %v1228_v4  ;;  %v3267_v19 = vmul.f32 -1.442695, %v1232_v9  ;;  %v691_v0 = vsub.s32 4, %v4511_v7  ;;  %v688_v13 = vrot.slane %v3787_v10, %v687_v8 }
 0x398   : > { %v2714_v30 = vsel %vm2706_vm6, %v2693_v28, %v2713_v40  ;;  %v3265_v14 = vmul.f32 -1.442695, %v1230_v22  ;;  %v3268_v47 = vmul.f32 -1.442695, %v1234_v49  ;;  %v2655_v17 = vrot.slane %v2650_v48, %v4529_v37  ;;  %v5232_v37 = vld [vmem:[#allocation32_spill] sm:$0xff] }
 0x399   : > { %v2715_v38 = vpack.c.b16 %v2714_v30, %v2707_v43  ;;  %3758 = vpow2.f32 %v3264_v16  ;;  %v692_v55 = vrot.slane %v3787_v10, %v691_v0  ;;  %v2659_v61 = vrot.slane %v2650_v48, %v679_v50 }
 0x39a   : > { %3760 = vpow2.f32 %v3265_v14 }
 0x39b   : > { %2830 = vmatmul.mubr.bf16.vlgmr.msra.gmra.mrb[4].mxu1 %v2715_v38  ;;  %3762 = vpow2.f32 %v3268_v47  ;;  %v1314_v29 = vadd.f32 %v5231_v54, %v692_v55  ;;  %v1318_v63 = vadd.f32 %v5232_v37, %v692_v55 }
 0x39c   : > { %3764 = vpow2.f32 %v3267_v19 }
 0x3a3   : > { %v3759_v18 = vpop.eup %3758 }
 0x3a4   : > { %v3761_v2 = vpop.eup %3760  ;;  %v2600_v3 = vadd.f32 1.0, %v3759_v18 }
 0x3a5   : > { %v3763_v41 = vpop.eup %3762  ;;  %v2601_v5 = vadd.f32 1.0, %v3761_v2 }
 0x3a6   : > { %v3765_v44 = vpop.eup %3764  ;;  %3766 = vrcp.f32 %v2600_v3  ;;  %v2604_v42 = vadd.f32 1.0, %v3763_v41 }
 0x3a7   : > { %v2603_v59 = vadd.f32 1.0, %v3765_v44 }
 0x3b0   : > { %v3767_v60 = vpop.eup %3766 }
 0x3d6   : > { %v1270_v34 = vpop.f32.mrb[0].mxu1 }
 0x3d7   : > { %v1272_v23 = vpop.f32.mrb[1].mxu1  ;;  %v1271_v20 = vadd.f32 %v1270_v34, %v684_v24  ;;  %v2847_v34 = vld [vmem:[%s481_s15 + $0x8] sm:$0xff]  ;;  %s3964_s15 = scalar_lea.vmem %s5076_s27, 256 }
 0x3d8   : > { %v1274_v45 = vpop.f32.mrb[2].mxu1  ;;  %v1273_v25 = vadd.f32 %v1272_v23, %v688_v13  ;;  %p3965_p10 = scmp.ne.s32.totalorder %s5076_s27, %s3964_s15  ;;  %p3972_p13 = scmp.lt.s32.totalorder %s3970_s11, %s3964_s15 }
 0x3d9   : > { %v1276_v56 = vpop.f32.mrb[3].mxu1  ;;  %v1275_v26 = vadd.f32 %v1274_v45, %v684_v24  ;;  %v3266_v51 = vmul.f32 -1.442695, %v1271_v20 }
 0x3da   : > { %v1277_v39 = vadd.f32 %v1276_v56, %v688_v13  ;;  %p3966_p5 = pnand %p3965_p10, %p5235_p1  ;;  %p3973_p7 = por %p3972_p13, %p3971_p4 }
 0x3db   : > { %v3269_v53 = vmul.f32 -1.442695, %v1275_v26  ;;  %3768 = vpow2.f32 %v3266_v51 }
 0x3dc   : > { %3770 = vrcp.f32 %v2601_v5  ;;  %p3967_p11 = pneg %p3966_p5 }
 0x3dd   : > { %3772 = vpow2.f32 %v3269_v53 }
 0x3de   : > { %3774 = vrcp.f32 %v2604_v42  ;;  %p3974_p0 = pnand %p3973_p7, %p3967_p11 }
 0x3df   : > { %3776 = vrcp.f32 %v2603_v59 }
 0x3e5   : > { %v3769_v27 = vpop.eup %3768 }
 0x3e6   : > { %v3771_v28 = vpop.eup %3770  ;;  %v2602_v38 = vadd.f32 1.0, %v3769_v27 }
 0x3e7   : > { %v3773_v33 = vpop.eup %3772  ;;  %v2848_v23 = vmul.f32 %v3771_v28, %v2846_v12 }
 0x3e8   : > { %v3775_v30 = vpop.eup %3774  ;;  %v2605_v10 = vadd.f32 1.0, %v3773_v33  ;;  %3778 = vrcp.f32 %v2602_v38 }
 0x3e9   : > { %v3777_v50 = vpop.eup %3776  ;;  %v2849_v32 = vmul.f32 %v3775_v30, %v2847_v34 }
 0x46e   : > { %v2831_v11 = vpop.f32.mrb[4].mxu1 }
 0x46f   : > { %v2832_v62 = vadd.f32 %v2831_v11, %v2655_v17  ;;  %v2833_v7 = vpop.f32.mrb[5].mxu1 }
 0x470   : > { %v2834_v52 = vadd.f32 %v2833_v7, %v2659_v61  ;;  %v2835_v6 = vpop.f32.mrb[6].mxu1 }
 0x471   : > { %v2840_v46 = vadd.f32 %v2832_v62, %v1273_v25  ;;  %v2836_v1 = vadd.f32 %v2835_v6, %v2655_v17  ;;  %v2837_v58 = vpop.f32.mrb[7].mxu1 }
 0x472   : > { %v2841_v35 = vadd.f32 %v2834_v52, %v1314_v29  ;;  %v2838_v21 = vadd.f32 %v2837_v58, %v2659_v61 }
 0x473   : > { %v2842_v36 = vadd.f32 %v2836_v1, %v1277_v39 }
 0x474   : > { %v2844_v40 = vmax.f32 %v2840_v46, %v2841_v35  ;;  %v2843_v43 = vadd.f32 %v2838_v21, %v1318_v63 }
 0x476   : > { %v2850_v45 = vmul.f32 %v3767_v60, %v2844_v40  ;;  %v2845_v56 = vmax.f32 %v2842_v36, %v2843_v43 }
 0x478   : > { %v2852_v57 = vadd.f32 %v2850_v45, %v2848_v23  ;;  %v2851_v4 = vmul.f32 %v3777_v50, %v2845_v56 }
 0x47a   : > { %3780 = vtanh.f32 %v2852_v57  ;;  %2868 = vst [vmem:[%s565_s14] sm:$0xff] %v2852_v57  ;;  %v2853_v22 = vadd.f32 %v2851_v4, %v2849_v32 }
 0x47b   : > { %3782 = vrcp.f32 %v2605_v10 }
 0x47c   : > { %3784 = vtanh.f32 %v2853_v22  ;;  %2869 = vst [vmem:[%s565_s14 + $0x8] sm:$0xff] %v2853_v22 }
 0x47d   : > { %3977 = shalt.err (!%p3974_p0)
}
 0x47e   : > { %s3978_s17 = scalar_lea.hbm %s5074_s16, 256  ;;  %s3982_s18 = scalar_lea.hbm %s5234_s30, 512 }
 0x47f   : > { %p3979_p12 = scmp.ne.s32.totalorder %s5074_s16, %s3978_s17  ;;  %p3983_p6 = scmp.lt.u32.totalorder %s5074_s16, %s5234_s30 }
 0x480   : > { %p3984_p2 = scmp.lt.u32.totalorder %s3982_s18, %s3978_s17  ;;  %p3986_p10 = scmp.lt.u32.totalorder %s3978_s17, %s5074_s16 }
 0x481   : > { %p3980_p3 = pnand %p3979_p12, %p5235_p1 }
 0x482   : > { %p3985_p8 = por %p3984_p2, %p3983_p6 }
 0x483   : > { %p3981_p9 = pneg %p3980_p3 }
 0x484   : > { %p3987_p5 = por %p3986_p10, %p3985_p8 }
 0x486   : > { %p3988_p11 = pnand %p3987_p5, %p3981_p9 }
 0x488   : > { %3991 = shalt.err (!%p3988_p11)
}
 0x489   : > { %s4095_s21 = smov 128   ;;  %s4096_s24 = smov 8   ;;  %v3779_v16 = vpop.eup %3778 }
 0x48a   : > { %3329 = dma.vmem_to_hbm [thread:$0]  (%p5235_p1), %s5076_s27, 256, %s5074_s16, %s2876_s1, %s4095_s21, %s4095_s21, %s4096_s24   ;;  %v3781_v49 = vpop.eup %3780 }
 0x48b   : > { %s3122_s10 = sshll.u32 %s4461_s23, 3  ;;  %v3783_v14 = vpop.eup %3782  ;;  %v2856_v15 = vmul.f32 %v3781_v49, %v3779_v16  ;;  %s3305_s14 = sshll.u32 %s4184_s9, 7 }
 0x48c   : > { %s558_s28 = scalar_lea.vmem [#allocation14], %s3122_s10  ;;  %v3785_v9 = vpop.eup %3784  ;;  %s5236_s29 = sld [smem:[#allocation36_spill]] }
 0x48d   : > { %s2889_s26 = sshll.u32 %s558_s28, 4  ;;  %v2857_v47 = vmul.f32 %v3785_v9, %v3783_v14  ;;  %s2871_s27 = scalar_lea.sflag [#allocation5], %s4461_s23  ;;  %s5109_s26 = int_to_ptr.vmem [resolvable:$true] %s2889_s26 }
 0x48e   : > { %s3992_s16 = scalar_lea.vmem %s5109_s26, 128  ;;  %s4097_s9 = smov [#allocation14]  }
 0x48f   : > { %v3310_v19 = vpack.c.bf16 %v2857_v47, %v2856_v15  ;;  %p3993_p4 = scmp.ne.s32.totalorder %s5109_s26, %s3992_s16  ;;  %s3996_s1 = sshll.u32 %s4097_s9, 4  ;;  %s3997_s1 = int_to_ptr.vmem [resolvable:$false] %s3996_s1 }
 0x490   : > { %s3998_s17 = scalar_lea.vmem %s3997_s1, 256  ;;  %p3999_p0 = scmp.lt.s32.totalorder %s5109_s26, %s3997_s1 }
 0x491   : > { %3311 = vst [vmem:[%s558_s28] sm:$0xff] %v3310_v19   ;;  %p3994_p13 = pnand %p3993_p4, %p5235_p1  ;;  %p4000_p12 = scmp.lt.s32.totalorder %s3998_s17, %s3992_s16 }
 0x492   : > { %s5107_s11 = scalar_lea.hbm %s5236_s29, %s3305_s14 }
 0x493   : > { %p3995_p7 = pneg %p3994_p13  ;;  %p4001_p3 = por %p4000_p12, %p3999_p0 }
 0x495   : > { %p4002_p9 = pnand %p4001_p3, %p3995_p7 }
 0x497   : > { %4005 = shalt.err (!%p4002_p9)
}
 0x498   : > { %s4006_s19 = scalar_lea.hbm %s5107_s11, 128  ;;  %s4010_s4 = scalar_lea.hbm %s5236_s29, 256 }
 0x499   : > { %p4007_p6 = scmp.ne.s32.totalorder %s5107_s11, %s4006_s19  ;;  %p4011_p10 = scmp.lt.u32.totalorder %s5107_s11, %s5236_s29 }
 0x49a   : > { %p4012_p5 = scmp.lt.u32.totalorder %s4010_s4, %s4006_s19  ;;  %p4014_p4 = scmp.lt.u32.totalorder %s4006_s19, %s5107_s11 }
 0x49b   : > { %p4008_p2 = pnand %p4007_p6, %p5235_p1 }
 0x49c   : > { %p4013_p11 = por %p4012_p5, %p4011_p10 }
 0x49d   : > { %p4009_p8 = pneg %p4008_p2 }
 0x49e   : > { %p4015_p13 = por %p4014_p4, %p4013_p11 }
 0x4a0   : > { %p4016_p7 = pnand %p4015_p13, %p4009_p8 }
 0x4a2   : > { %4019 = shalt.err (!%p4016_p7)
}
 0x4a3   : > { %s4098_s24 = smov 64   ;;  %s4099_s10 = smov 4  }
 0x4a4   : > { %3328 = dma.vmem_to_hbm [thread:$0]  (%p5235_p1), %s5109_s26, 128, %s5107_s11, %s2871_s27, %s4098_s24, %s4098_s24, %s4099_s10  }
 0x4a5 PF: > { %s5237_s14 = sld [smem:[#allocation24_spill]]  ;;  %s5238_s28 = sld [smem:[#allocation29_spill]] }
 0x4a6   : > { %p5240_p12 = scmp.ge.s32.totalorder %s4078_s22, 2 }
 0x4ab   : > { %s2920_s15 = sand.u32 1, %s5237_s14   ;;  %p5239_p0 = scmp.ne.s32.totalorder %s5238_s28, 0 }
 0x4ac   : > { %s2921_s7 = scalar_lea.sflag [#allocation5], %s2920_s15 }
 0x4ad   : > { %p3353_p3 = pnand %p5240_p12, %p5239_p0 }
 0x4af   : > { %4057 = dma.done.wait (!%p3353_p3), %s2921_s7, 128  }
 0x4b0   : > { %4059 = vsyncadd (!%p3353_p3), %s2921_s7, 4294967168  ;;  %s2930_s16 = scalar_lea.sflag [#allocation16], %s2920_s15 }
 0x4b1   : > { %4061 = dma.done.wait (!%p3353_p3), %s2930_s16, 256  }
 0x4b2   : > { %4063 = vsyncadd (!%p3353_p3), %s2930_s16, 4294967040  ;;  %s5241_s22 = sld [smem:[#allocation26_spill]]  ;;  %s5242_s9 = sld [smem:[#allocation25_spill]] }
 0x4b3   : > { %s5243_s21 = sld [smem:[#allocation27_spill]]  ;;  %s5244_s19 = smov %s4070_s20 }
 0x4b8   : > { %p36_p1 = scmp.ge.s32.totalorder %s5241_s22, 4   ;;  %s5245_s20 = smov %s5242_s9 }
 0x4ba   :  { %38 = sbr.rel (!%p36_p1) target bundleno = 19 (0x13), region = 167 }
 0x4c1   :  { %2935 = vsyncpa [#allocation4], 1 }
 0x4c2   :  { %2937 = vsyncpa [#allocation4 + $0x1], 1 }
 0x4c3   :  { %2938 = vsyncpa [#allocation7], 1 }
 0x4c4   :  { %2940 = vsyncpa [#allocation7 + $0x1], 1 }
 0x4c5   :  { %2941 = vsyncpa [#allocation10], 1 }
 0x4c6   :  { %2943 = vsyncpa [#allocation10 + $0x1], 1 }
 0x4c7   :  { %2944 = vsyncpa [#allocation13], 1 }
 0x4c8   :  { %2945 = vsyncpa [#allocation5], 1 }
 0x4c9   :  { %2947 = vsyncpa [#allocation5 + $0x1], 1 }
 0x4ca   :  { %2948 = vsyncpa [#allocation16], 1 }
 0x4cb   :  { %2950 = vsyncpa [#allocation16 + $0x1], 1 }

</bundles_post_ra>
